<compile_context>
chip_gen: v7x
topology: tpu7x:2x2x1
jax: 0.10.0
libtpu: 0.0.40
codegen_flags: <defaults>
</compile_context>

<pallas_src>
import functools

import jax
import jax.numpy as jnp
from jax.experimental import pallas as pl
from jax.experimental.pallas import tpu as pltpu


def _round_up(x, m):
    return ((x + m - 1) // m) * m


# --------------------------------------------------------------------------
# Plain-JAX glue: camera math (tiny matmuls, not worth a kernel)
# --------------------------------------------------------------------------
def _normalize(v, eps=1e-8):
    return v / jnp.maximum(jnp.linalg.norm(v, axis=-1, keepdims=True), eps)


def look_at_rotation(camera_position, at=((0, 0, 0),), up=((0, 1, 0),)):
    cam = jnp.asarray(camera_position, jnp.float32)
    at = jnp.broadcast_to(jnp.asarray(at, jnp.float32), cam.shape)
    up = jnp.broadcast_to(jnp.asarray(up, jnp.float32), cam.shape)
    z_axis = _normalize(at - cam)
    x_axis = _normalize(jnp.cross(up, z_axis))
    y_axis = _normalize(jnp.cross(z_axis, x_axis))
    is_degen = jnp.isclose(jnp.sum(x_axis * x_axis, -1, keepdims=True), 0.0, atol=5e-3)
    x_axis = jnp.where(is_degen, _normalize(jnp.cross(y_axis, z_axis)), x_axis)
    R = jnp.stack([x_axis, y_axis, z_axis], axis=1)  # rows = axes
    return jnp.transpose(R, (0, 2, 1))               # columns = axes (pytorch3d conv.)


def rotation_theta(theta):
    theta = jnp.reshape(jnp.asarray(theta, jnp.float32), (-1, 1, 1))
    mul_ = jnp.array([[1, 0, 0, 0, 1, 0, 0, 0, 0],
                      [0, -1, 0, 1, 0, 0, 0, 0, 0]], jnp.float32).reshape(1, 2, 9)
    bia_ = jnp.array([0] * 8 + [1], jnp.float32).reshape(1, 1, 9)
    cos_sin = jnp.concatenate([jnp.cos(theta), jnp.sin(theta)], axis=2)  # (B,1,2)
    trans = jnp.matmul(cos_sin, mul_) + bia_
    return trans.reshape(-1, 3, 3)


def campos_to_R_T(campos, theta, at=((0, 0, 0),), up=((0, 1, 0),)):
    R = look_at_rotation(campos, at=at, up=up)
    R = jnp.matmul(R, rotation_theta(theta))
    T = -jnp.matmul(jnp.transpose(R, (0, 2, 1)), campos[:, :, None])[:, :, 0]
    return R, T


def pre_process_mesh_pascal(verts):
    return jnp.concatenate((verts[:, 0:1], verts[:, 2:3], -verts[:, 1:2]), axis=1)


def vertex_memory_to_face_memory(memory_bank, faces):
    return memory_bank[faces.astype(jnp.int32)]


def set_bary_coords_to_nearest(bary):
    exr = bary * (bary < 0)
    flat = bary.reshape(-1, bary.shape[-1])
    amax = jnp.argmax(flat, axis=1)
    onehot = jax.nn.one_hot(amax, flat.shape[-1], dtype=bary.dtype)
    return onehot.reshape(bary.shape) + exr


# --------------------------------------------------------------------------
# Simplified rasterizer (plain JAX) — stands in for pytorch3d MeshRasterizer.
# Emits LOCAL face ids (per mesh); face_memory is never replicated per camera.
# --------------------------------------------------------------------------
def simple_rasterize(R, T, verts, faces, H, W, focal=2.0):
    """Returns (pix_to_face: (B,H,W,1) int32 LOCAL ids, bary: (B,H,W,1,3) f32)."""
    eps = 1e-6
    vc = jnp.einsum('vj,bjk->bvk', verts, R) + T[:, None, :]   # (B,V,3) camera frame
    z = vc[..., 2]
    xs = focal * vc[..., 0] / jnp.maximum(z, eps)
    ys = focal * vc[..., 1] / jnp.maximum(z, eps)
    fx, fy, fz = xs[:, faces], ys[:, faces], z[:, faces]        # (B,F,3)

    px = (jnp.arange(W, dtype=jnp.float32) + 0.5) / W * 2.0 - 1.0
    py = (jnp.arange(H, dtype=jnp.float32) + 0.5) / H * 2.0 - 1.0
    PY, PX = jnp.meshgrid(py, px, indexing='ij')                # (H,W)

    def edge(ax, ay, bx, by, cx, cy):
        return (cx - ax) * (by - ay) - (cy - ay) * (bx - ax)

    X0, Y0 = fx[..., 0, None, None], fy[..., 0, None, None]
    X1, Y1 = fx[..., 1, None, None], fy[..., 1, None, None]
    X2, Y2 = fx[..., 2, None, None], fy[..., 2, None, None]
    PXb, PYb = PX[None, None], PY[None, None]

    area = edge(X0, Y0, X1, Y1, X2, Y2)                         # (B,F,1,1)
    w0 = edge(X1, Y1, X2, Y2, PXb, PYb)                         # (B,F,H,W)
    w1 = edge(X2, Y2, X0, Y0, PXb, PYb)
    w2 = edge(X0, Y0, X1, Y1, PXb, PYb)
    denom = jnp.where(jnp.abs(area) < 1e-8, 1e-8, area)
    b0, b1, b2 = w0 / denom, w1 / denom, w2 / denom
    inside = (b0 >= 0) & (b1 >= 0) & (b2 >= 0) & (jnp.abs(area) >= 1e-8)
    zpix = (b0 * fz[..., 0, None, None] + b1 * fz[..., 1, None, None]
            + b2 * fz[..., 2, None, None])
    valid = inside & (zpix > eps)
    depth = jnp.where(valid, zpix, jnp.inf)

    best = jnp.argmin(depth, axis=1)                            # (B,H,W) local face id
    any_valid = jnp.any(valid, axis=1)                          # (B,H,W)
    pix_to_face = jnp.where(any_valid, best, -1).astype(jnp.int32)

    bary = jnp.stack([b0, b1, b2], axis=-1)                     # (B,F,H,W,3)
    bary_best = jnp.take_along_axis(
        bary, best[:, None, :, :, None], axis=1)[:, 0]          # (B,H,W,3)
    bary_best = jnp.where(any_valid[..., None], bary_best, 0.0)
    return pix_to_face[..., None], bary_best[:, :, :, None, :]


# --------------------------------------------------------------------------
# Pallas kernel: interpolate_face_attributes (the hot path)
# --------------------------------------------------------------------------
def _interp_kernel(kmap_ref, meta_ref, fmem_ref, out_ref, *, cpack):
    # kmap_ref: (ntiles*nkb,) int32 SMEM — face block actually mapped into
    #           fmem_ref for (pixel tile i, step k); equals k iff this tile's
    #           face-id range overlaps block k (scalar-prefetch culling).
    # meta_ref: (TP, 8) f32 — col 0 = local face id (as f32), cols 1..3 = bary.
    # fmem_ref: (FBLK, CPAD3) — vertex-packed face features
    #           [v0 c0..C-1 | v1 c0..C-1 | v2 c0..C-1 | pad].
    # out_ref : (TP, CPAD3) f32 — doubles as accumulator across face blocks
    #           (out block index constant in k -> VMEM resident); at the last k
    #           the first C lanes are overwritten with the bary-combined result.
    i = pl.program_id(0)
    k = pl.program_id(1)
    nk = pl.num_programs(1)

    @pl.when(k == 0)
    def _():
        out_ref[...] = jnp.zeros_like(out_ref)

    kk = kmap_ref[i * nk + k]

    @pl.when(kk == k)                       # skip face blocks no pixel touches
    def _():
        tp = meta_ref.shape[0]
        fblk = fmem_ref.shape[0]
        # One-hot row per pixel.  Background pixels carry -1 and never match
        # the non-negative iota, so no explicit validity mask is needed.
        local = meta_ref[:, 0:1].astype(jnp.int32) - k * fblk           # (TP, 1)
        lane = jax.lax.broadcasted_iota(jnp.int32, (tp, fblk), 1)
        onehot = (lane == local).astype(fmem_ref.dtype)                 # (TP, FBLK)
        # Single fused matmul gathers all 3 vertex rows at once (lane-packed).
        out_ref[...] += jnp.dot(onehot, fmem_ref[...],
                                preferred_element_type=jnp.float32)

    @pl.when(k == nk - 1)
    def _():
        acc = out_ref[...]                                              # packed gather
        b0 = meta_ref[:, 1:2]
        b1 = meta_ref[:, 2:3]
        b2 = meta_ref[:, 3:4]
        out_ref[:, 0:cpack] = (b0 * acc[:, 0:cpack]
                               + b1 * acc[:, cpack:2 * cpack]
                               + b2 * acc[:, 2 * cpack:3 * cpack])


def interpolate_face_attributes_pallas(pix_to_face, bary_coords, face_memory,
                                       tile=1024, face_block=512,
                                       fmem_dtype=jnp.bfloat16):
    """pix_to_face (N,H,W,1) LOCAL face ids, bary (N,H,W,1,3),
       face_memory (F,3,C)  ->  (N,H,W,C) float32."""
    N, H, W, K = pix_to_face.shape
    assert K == 1
    F, nv, C = face_memory.shape
    assert nv == 3
    npix = N * H * W
    itemsize = jnp.dtype(fmem_dtype).itemsize

    # Pixel tile: as large as VMEM comfortably allows (amortizes face-memory
    # streaming and per-grid-step overhead); shrunk for tiny inputs.
    tile = int(max(256, min(tile, _round_up(npix, 256))))

    cpack = C                                    # tight vertex packing along lanes
    cpad3 = _round_up(3 * C, 128)                # lane-dense matmul N / output width

    # Face-block sizing.  Bound (a) the (tile, fblk) one-hot/iota intermediates
    # and (b) the double-buffered fmem block so everything fits in VMEM on all
    # generations (v7x has only 64 MiB / TC).  If the whole padded mesh fits,
    # keep the packed face memory VMEM-resident (nkb == 1, DMA'd once).
    inter_budget = 16 << 20
    fmem_budget = 16 << 20
    max_fblk = min(inter_budget // (8 * tile),
                   fmem_budget // (2 * cpad3 * itemsize))
    max_fblk = max(16, (max_fblk // 16) * 16)    # bf16 sublane tiling -> mult of 16
    fpad16 = _round_up(F, 16)
    if fpad16 <= max_fblk:
        fblk = fpad16                            # fully VMEM-resident face memory
    else:
        fblk = min(_round_up(face_block, 16), max_fblk)
    fpad = _round_up(F, fblk)
    nkb = fpad // fblk

    # Vertex-packed, lane-dense face memory: (F, 3, C) -> (fpad, cpad3).
    fmem = face_memory.astype(fmem_dtype).reshape(F, 3 * C)
    fmem = jnp.pad(fmem, ((0, fpad - F), (0, cpad3 - 3 * C)))

    # Meta block: face id (as f32, exact for ids < 2^24) + 3 bary weights.
    p2f = pix_to_face.reshape(npix).astype(jnp.int32)
    bary = bary_coords.reshape(npix, 3).astype(jnp.float32)
    ntot = _round_up(npix, tile)
    pad = ntot - npix
    if pad:
        p2f = jnp.concatenate([p2f, jnp.full((pad,), -1, jnp.int32)])
        bary = jnp.concatenate([bary, jnp.zeros((pad, 3), jnp.float32)])
    meta = jnp.concatenate([p2f[:, None].astype(jnp.float32), bary,
                            jnp.zeros((ntot, 4), jnp.float32)], axis=1)   # (ntot, 8)

    # Scalar-prefetch culling table: for each (pixel tile, k) the face block
    # actually mapped in is clip(k, lo_blk, hi_blk).  Out-of-range k's map to
    # an already-fetched neighbour block (consecutive equal block index -> the
    # pipeline skips the DMA) and the kernel skips their compute (kmap != k).
    ntiles = ntot // tile
    p2f_t = p2f.reshape(ntiles, tile)
    valid = p2f_t >= 0
    tmin = jnp.min(jnp.where(valid, p2f_t, jnp.int32(fpad)), axis=1)
    tmax = jnp.max(jnp.where(valid, p2f_t, jnp.int32(-1)), axis=1)
    lo_blk = jnp.clip(tmin // fblk, 0, nkb - 1)
    hi_blk = jnp.clip(tmax // fblk, 0, nkb - 1)
    ks = jnp.arange(nkb, dtype=jnp.int32)[None, :]
    kmap = jnp.clip(ks, lo_blk[:, None], hi_blk[:, None]).reshape(-1)
    kmap = kmap.astype(jnp.int32)                                        # (ntiles*nkb,)

    def fmem_index_map(i, k, km):
        return km[i * nkb + k], 0

    # Explicit VMEM limit: v5e scoped default is only 16 MiB; stay < 64 MiB (v7x).
    est_vmem = (2 * tile * 8 * 4 + 2 * tile * cpad3 * 4
                + 2 * fblk * cpad3 * itemsize + 8 * tile * fblk)
    vmem_limit = int(min(max(est_vmem + (8 << 20), 32 << 20), 56 << 20))

    out = pl.pallas_call(
        functools.partial(_interp_kernel, cpack=cpack),
        out_shape=jax.ShapeDtypeStruct((ntot, cpad3), jnp.float32),
        grid_spec=pltpu.PrefetchScalarGridSpec(
            num_scalar_prefetch=1,
            grid=(ntiles, nkb),                        # faces (reduction) axis last
            in_specs=[
                pl.BlockSpec((tile, 8), lambda i, k, km: (i, 0)),
                pl.BlockSpec((fblk, cpad3), fmem_index_map),
            ],
            out_specs=pl.BlockSpec((tile, cpad3), lambda i, k, km: (i, 0)),
        ),
        compiler_params=pltpu.CompilerParams(
            dimension_semantics=("parallel", "arbitrary"),
            vmem_limit_bytes=vmem_limit),
    )(kmap, meta, fmem)

    return out[:npix, :C].reshape(N, H, W, C)


# --------------------------------------------------------------------------
# MeshInterpolateModule (JAX version)
# --------------------------------------------------------------------------
class MeshInterpolateModule:
    def __init__(self, vertices, faces, memory_bank, rasterizer,
                 post_process=None, off_set_mesh=False):
        self.n_mesh = 1
        self.verts = pre_process_mesh_pascal(jnp.asarray(vertices, jnp.float32))
        self.faces = jnp.asarray(faces, jnp.int32)
        self.face_memory = vertex_memory_to_face_memory(
            jnp.asarray(memory_bank, jnp.float32), self.faces)   # (F, 3, C)
        self.rasterizer = rasterizer      # dict(H=..., W=..., focal=...)
        self.post_process = post_process
        self.off_set_mesh = off_set_mesh

    def forward(self, campos, theta, blur_radius=0, deform_verts=None,
                return_fragments=False, mode='bilinear', **kwargs):
        # TODO(synk): blur_radius > 0 barycentric-clipping / zbuf path not implemented.
        R, T = campos_to_R_T(campos, theta, **kwargs)
        verts = self.verts + deform_verts if self.off_set_mesh else self.verts
        n_cam = campos.shape[0]
        F = self.faces.shape[0]

        # Unlike the PyTorch original we do NOT repeat face_memory per camera
        # (meshes.extend()); the rasterizer emits local face ids which index the
        # single (F,3,C) face_memory -> identical output, n_cam x less work.
        pix_to_face, bary = simple_rasterize(
            R, T, verts, self.faces,
            self.rasterizer["H"], self.rasterizer["W"], self.rasterizer["focal"])

        if mode == 'nearest':
            bary = set_bary_coords_to_nearest(bary)

        out_map = interpolate_face_attributes_pallas(pix_to_face, bary,
                                                     self.face_memory)
        # PyTorch: squeeze(3).transpose(3,2).transpose(2,1)  ->  (N, C, H, W)
        get = jnp.transpose(out_map, (0, 3, 1, 2))

        if self.post_process is not None:
            get = self.post_process(get)
        if return_fragments:
            # Reconstruct pytorch3d-style GLOBAL (extended-mesh) face ids.
            batch_off = jnp.arange(n_cam, dtype=jnp.int32)[:, None, None, None] * F
            p2f_global = jnp.where(pix_to_face >= 0, pix_to_face + batch_off, -1)
            return get, (p2f_global, bary)
        return get

    __call__ = forward


# --------------------------------------------------------------------------
# Example / test
# --------------------------------------------------------------------------
def _make_cube():
    verts = jnp.array([[x, y, z]
                       for x in (-0.5, 0.5)
                       for y in (-0.5, 0.5)
                       for z in (-0.5, 0.5)], jnp.float32)       # 8 verts
    faces = jnp.array([
        [0, 1, 3], [0, 3, 2],    # -x
        [4, 6, 7], [4, 7, 5],    # +x
        [0, 4, 5], [0, 5, 1],    # -y
        [2, 3, 7], [2, 7, 6],    # +y
        [0, 2, 6], [0, 6, 4],    # -z
        [1, 5, 7], [1, 7, 3],    # +z
    ], jnp.int32)                                                # 12 faces
    return verts, faces


if __name__ == "__main__":
    key = jax.random.PRNGKey(0)
    k1, k2, k3 = jax.random.split(key, 3)

    C, H, W, n_cam = 32, 16, 16, 2
    verts, faces = _make_cube()
    memory_bank = jax.random.normal(k1, (verts.shape[0], C), jnp.float32)

    module = MeshInterpolateModule(
        verts, faces, memory_bank,
        rasterizer=dict(H=H, W=W, focal=2.0))

    dirs = jax.random.normal(k2, (n_cam, 3), jnp.float32)
    campos = 3.0 * dirs / jnp.linalg.norm(dirs, axis=1, keepdims=True)
    theta = jax.random.uniform(k3, (n_cam,), jnp.float32, minval=-0.5, maxval=0.5)

    out, (p2f_g, bary) = module(campos, theta, mode='bilinear',
                                return_fragments=True)
    out = jax.block_until_ready(out)

    assert out.shape == (n_cam, C, H, W), out.shape
    assert bool(jnp.isfinite(out).all())

    # Pure-JAX reference for interpolate_face_attributes (face memory rounded to
    # bf16 exactly as the kernel does).
    F = module.faces.shape[0]
    off = jnp.arange(n_cam, dtype=jnp.int32)[:, None, None, None] * F
    local = jnp.where(p2f_g >= 0, p2f_g - off, 0)[..., 0]               # (N,H,W)
    fm = module.face_memory.astype(jnp.bfloat16).astype(jnp.float32)    # (F,3,C)
    gathered = fm[local]                                                # (N,H,W,3,C)
    ref = jnp.sum(bary[:, :, :, 0, :, None] * gathered, axis=3)         # (N,H,W,C)
    ref = jnp.where(p2f_g >= 0, ref, 0.0)
    ref = jnp.transpose(ref, (0, 3, 1, 2))
    max_err = float(jnp.max(jnp.abs(out - ref)))
    assert max_err < 1e-3, max_err

    print("KERNEL_OK")
</pallas_src>

<mosaic_0001>
module attributes {stable_mosaic.version = 11 : i64} {
  func.func @_interp_kernel(%arg0: i32, %arg1: i32, %arg2: memref<1xi32, #tpu.memory_space<smem>>, %arg3: memref<512x8xf32, #tpu.memory_space<vmem>>, %arg4: memref<16x128xbf16, #tpu.memory_space<vmem>>, %arg5: memref<512x128xf32, #tpu.memory_space<vmem>>) attributes {dimension_semantics = [#tpu.dimension_semantics<parallel>, #tpu.dimension_semantics<arbitrary>], iteration_bounds = array<i64: 1, 1>, scalar_prefetch = 1 : i64, scratch_operands = 0 : i64, tpu.core_type = #tpu.core_type<tc>, window_params = [{transform_indices = @transform_0, window_bounds = array<i64: 512, 8>}, {transform_indices = @transform_1, window_bounds = array<i64: 16, 128>}, {transform_indices = @transform_2, window_bounds = array<i64: 512, 128>}]} {
    %c0_i32 = arith.constant 0 : i32
    %0 = arith.cmpi eq, %arg1, %c0_i32 : i32
    %1 = arith.extui %0 : i1 to i32
    %c0_i32_0 = arith.constant 0 : i32
    %2 = arith.cmpi ne, %1, %c0_i32_0 : i32
    scf.if %2 {
      %cst = arith.constant 0.000000e+00 : f32
      %13 = vector.broadcast %cst : f32 to vector<512x128xf32>
      %c0 = arith.constant 0 : index
      %c0_4 = arith.constant 0 : index
      %14 = vector.load %arg5[%c0, %c0_4] : memref<512x128xf32, #tpu.memory_space<vmem>>, vector<512x128xf32>
      tpu.vector_store %arg5[%c0, %c0_4], %13 {strides = array<i32>} : memref<512x128xf32, #tpu.memory_space<vmem>>, vector<512x128xf32>,
    } else {
    }
    %c1_i32 = arith.constant 1 : i32
    %3 = arith.muli %arg0, %c1_i32 : i32
    %4 = arith.addi %3, %arg1 : i32
    %5 = arith.index_cast %4 : i32 to index
    %6 = memref.load %arg2[%5] : memref<1xi32, #tpu.memory_space<smem>>
    %7 = arith.cmpi eq, %6, %arg1 : i32
    %8 = arith.extui %7 : i1 to i32
    %c0_i32_1 = arith.constant 0 : i32
    %9 = arith.cmpi ne, %8, %c0_i32_1 : i32
    scf.if %9 {
      %c0 = arith.constant 0 : index
      %c0_4 = arith.constant 0 : index
      %13 = vector.load %arg3[%c0, %c0_4] : memref<512x8xf32, #tpu.memory_space<vmem>>, vector<512x1xf32>
      %14 = arith.fptosi %13 : vector<512x1xf32> to vector<512x1xi32>
      %c16_i32 = arith.constant 16 : i32
      %15 = arith.muli %arg1, %c16_i32 : i32
      %16 = vector.broadcast %15 : i32 to vector<512x1xi32>
      %17 = arith.subi %14, %16 : vector<512x1xi32>
      %18 = tpu.iota {dimensions = array<i32: 1>} : vector<512x16xi32>
      %19 = vector.broadcast %17 : vector<512x1xi32> to vector<512x16xi32>
      %20 = arith.cmpi eq, %18, %19 : vector<512x16xi32>
      %21 = arith.extui %20 : vector<512x16xi1> to vector<512x16xi32>
      %22 = arith.sitofp %21 : vector<512x16xi32> to vector<512x16xf32>
      %23 = arith.truncf %22 : vector<512x16xf32> to vector<512x16xbf16>
      %c0_5 = arith.constant 0 : index
      %c0_6 = arith.constant 0 : index
      %24 = vector.load %arg5[%c0_5, %c0_6] : memref<512x128xf32, #tpu.memory_space<vmem>>, vector<512x128xf32>
      %c0_7 = arith.constant 0 : index
      %c0_8 = arith.constant 0 : index
      %25 = vector.load %arg4[%c0_7, %c0_8] : memref<16x128xbf16, #tpu.memory_space<vmem>>, vector<16x128xbf16>
      %cst = arith.constant dense<0.000000e+00> : vector<512x128xf32>
      %26 = tpu.matmul %23, %25, %cst {dimension_numbers = #tpu.dot_dimension_numbers<[1], [0], [0], [1], [0, 0, 1, 1], [], []>} : vector<512x16xbf16>, vector<16x128xbf16>, vector<512x128xf32> -> vector<512x128xf32>
      %27 = arith.addf %24, %26 : vector<512x128xf32>
      %c0_9 = arith.constant 0 : index
      %c0_10 = arith.constant 0 : index
      %28 = vector.load %arg5[%c0_9, %c0_10] : memref<512x128xf32, #tpu.memory_space<vmem>>, vector<512x128xf32>
      tpu.vector_store %arg5[%c0_9, %c0_10], %27 {strides = array<i32>} : memref<512x128xf32, #tpu.memory_space<vmem>>, vector<512x128xf32>,
    } else {
    }
    %c0_i32_2 = arith.constant 0 : i32
    %10 = arith.cmpi eq, %arg1, %c0_i32_2 : i32
    %11 = arith.extui %10 : i1 to i32
    %c0_i32_3 = arith.constant 0 : i32
    %12 = arith.cmpi ne, %11, %c0_i32_3 : i32
    scf.if %12 {
      %c0 = arith.constant 0 : index
      %c0_4 = arith.constant 0 : index
      %13 = vector.load %arg5[%c0, %c0_4] : memref<512x128xf32, #tpu.memory_space<vmem>>, vector<512x128xf32>
      %c0_5 = arith.constant 0 : index
      %c1 = arith.constant 1 : index
      %14 = vector.load %arg3[%c0_5, %c1] : memref<512x8xf32, #tpu.memory_space<vmem>>, vector<512x1xf32>
      %c0_6 = arith.constant 0 : index
      %c2 = arith.constant 2 : index
      %15 = vector.load %arg3[%c0_6, %c2] : memref<512x8xf32, #tpu.memory_space<vmem>>, vector<512x1xf32>
      %c0_7 = arith.constant 0 : index
      %c3 = arith.constant 3 : index
      %16 = vector.load %arg3[%c0_7, %c3] : memref<512x8xf32, #tpu.memory_space<vmem>>, vector<512x1xf32>
      %17 = vector.extract_strided_slice %13 {offsets = [0, 0], sizes = [512, 32], strides = [1, 1]} : vector<512x128xf32> to vector<512x32xf32>
      %18 = vector.broadcast %14 : vector<512x1xf32> to vector<512x32xf32>
      %19 = arith.mulf %18, %17 : vector<512x32xf32>
      %20 = vector.extract_strided_slice %13 {offsets = [0, 32], sizes = [512, 32], strides = [1, 1]} : vector<512x128xf32> to vector<512x32xf32>
      %21 = vector.broadcast %15 : vector<512x1xf32> to vector<512x32xf32>
      %22 = arith.mulf %21, %20 : vector<512x32xf32>
      %23 = arith.addf %19, %22 : vector<512x32xf32>
      %24 = vector.extract_strided_slice %13 {offsets = [0, 64], sizes = [512, 32], strides = [1, 1]} : vector<512x128xf32> to vector<512x32xf32>
      %25 = vector.broadcast %16 : vector<512x1xf32> to vector<512x32xf32>
      %26 = arith.mulf %25, %24 : vector<512x32xf32>
      %27 = arith.addf %23, %26 : vector<512x32xf32>
      %c0_8 = arith.constant 0 : index
      %c0_9 = arith.constant 0 : index
      %28 = vector.load %arg5[%c0_8, %c0_9] : memref<512x128xf32, #tpu.memory_space<vmem>>, vector<512x32xf32>
      tpu.vector_store %arg5[%c0_8, %c0_9], %27 {strides = array<i32>} : memref<512x128xf32, #tpu.memory_space<vmem>>, vector<512x32xf32>,
    } else {
    }
    return
  }
  func.func @transform_0(%arg0: i32, %arg1: i32, %arg2: memref<1xi32, #tpu.memory_space<smem>>) -> (i32, i32) {
    %c0_i32 = arith.constant 0 : i32
    %c0_i32_0 = arith.constant 0 : i32
    return %arg0, %c0_i32 : i32, i32
  }
  func.func @transform_1(%arg0: i32, %arg1: i32, %arg2: memref<1xi32, #tpu.memory_space<smem>>) -> (i32, i32) {
    %c1_i32 = arith.constant 1 : i32
    %0 = arith.muli %arg0, %c1_i32 : i32
    %1 = arith.addi %0, %arg1 : i32
    %2 = arith.index_cast %1 : i32 to index
    %3 = memref.load %arg2[%2] : memref<1xi32, #tpu.memory_space<smem>>
    %c0_i32 = arith.constant 0 : i32
    %c0_i32_0 = arith.constant 0 : i32
    return %3, %c0_i32 : i32, i32
  }
  func.func @transform_2(%arg0: i32, %arg1: i32, %arg2: memref<1xi32, #tpu.memory_space<smem>>) -> (i32, i32) {
    %c0_i32 = arith.constant 0 : i32
    %c0_i32_0 = arith.constant 0 : i32
    return %arg0, %c0_i32 : i32, i32
  }
}

</mosaic_0001>

<bundles_post_ra>
// kernel: tpu_custom_call.1
= control target key start
LH: loop header
LB: loop body
LE: loop exit
PB: predicated region body
PF: predicated region fallthrough
CT: control target
= control target key end

     0   :  { %9 = vsyncpa [#allocation5], 0  ;;  %v3697_v0 = vmov 0.0   ;;  %s5656_s0 = inlined_call_operand.<no memory space> [shape: s32[1], index: 0, kind: input, shape index: {}]   ;;  %s5657_s1 = inlined_call_operand.vmem [shape: f32[512,8], index: 1, kind: input, shape index: {}]   ;;  %s5658_s2 = inlined_call_operand.vmem [shape: bf16[16,128], index: 2, kind: input, shape index: {}]   ;;  %s5659_s3 = inlined_call_operand.hbm [shape: f32[512,128], index: 3, kind: output, shape index: {}]  }
   0x1   :  { %s3196_s14 = sshll.u32 %s5656_s0, 1  ;;  %46 = vst [vmem:[#allocation4] sm:$0xff] %v3697_v0  ;;  %47 = vst [vmem:[#allocation4 + $0x8] sm:$0xff] %v3697_v0  ;;  %p3198_p1 = scmp.ne.s32.totalorder %s5656_s0, 0 }
   0x2   :  { %p3735_p0 = scmp.lt.s32.totalorder %s3196_s14, 1  ;;  %48 = vst [vmem:[#allocation4 + $0x10] sm:$0xff] %v3697_v0  ;;  %49 = vst [vmem:[#allocation4 + $0x18] sm:$0xff] %v3697_v0  ;;  %v148_v1 = vld [vmem:[%s5657_s1 + $0x100] sm:$0xff] (!%p3198_p1)  ;;  %v149_v3 = vld [vmem:[%s5657_s1 + $0x108] sm:$0xff] (!%p3198_p1)  ;;  %v3698_v4 = vmov (!%p3198_p1), 0  }
   0x3   :  { %50 = vst [vmem:[#allocation4 + $0x20] sm:$0xff] %v3697_v0  ;;  %51 = vst [vmem:[#allocation4 + $0x28] sm:$0xff] %v3697_v0  ;;  %v116_v2 = vld [vmem:[%s5657_s1] sm:$0xff] (!%p3198_p1)  ;;  %3537 = vset.pattern.permute.xlu1 (!%p3198_p1), %v3698_v4  ;;  %3536 = vset.pattern.permute.xlu0 (!%p3198_p1), %v3698_v4  ;;  %v3461_v5 = vtrunc.f32 (!%p3198_p1), %v148_v1  ;;  %v3463_v7 = vtrunc.f32 (!%p3198_p1), %v149_v3  ;;  %v117_v8 = vld [vmem:[%s5657_s1 + $0x8] sm:$0xff] (!%p3198_p1)  ;;  %vm800_vm4 = vcmask (!%p3198_p1), 130048  }
   0x4   :  { %52 = vst [vmem:[#allocation4 + $0x30] sm:$0xff] %v3697_v0  ;;  %53 = vst [vmem:[#allocation4 + $0x38] sm:$0xff] %v3697_v0  ;;  %s5964_s14 = smov (!%p3735_p0, %s3196_s14), 1  ;;  %v3397_v6 = vtrunc.f32 (!%p3198_p1), %v116_v2  ;;  %v3399_v9 = vtrunc.f32 (!%p3198_p1), %v117_v8  ;;  %v119_v10 = vld [vmem:[%s5657_s1 + $0x18] sm:$0xff] (!%p3198_p1)  ;;  %v118_v11 = vld [vmem:[%s5657_s1 + $0x10] sm:$0xff] (!%p3198_p1) }
   0x5   :  { %54 = vst [vmem:[#allocation4 + $0x40] sm:$0xff] %v3697_v0  ;;  %55 = vst [vmem:[#allocation4 + $0x48] sm:$0xff] %v3697_v0  ;;  %s3197_s20 = sshll.u32 %s5964_s14, 2  ;;  %v3462_v12 = vcvt.f32.s32 (!%p3198_p1), %v3461_v5  ;;  %v3464_v14 = vcvt.f32.s32 (!%p3198_p1), %v3463_v7  ;;  %v3403_v16 = vtrunc.f32 (!%p3198_p1), %v119_v10  ;;  %v3401_v17 = vtrunc.f32 (!%p3198_p1), %v118_v11  ;;  %v151_v18 = vld [vmem:[%s5657_s1 + $0x118] sm:$0xff] (!%p3198_p1)  ;;  %v150_v19 = vld [vmem:[%s5657_s1 + $0x110] sm:$0xff] (!%p3198_p1) }
   0x6   :  { %56 = vst [vmem:[#allocation4 + $0x50] sm:$0xff] %v3697_v0  ;;  %57 = vst [vmem:[#allocation4 + $0x58] sm:$0xff] %v3697_v0  ;;  %s3812_s23 = scalar_lea.vmem %s5658_s2, %s3197_s20  ;;  %v3398_v13 = vcvt.f32.s32 (!%p3198_p1), %v3397_v6  ;;  %v3400_v15 = vcvt.f32.s32 (!%p3198_p1), %v3399_v9  ;;  %v3467_v22 = vtrunc.f32 (!%p3198_p1), %v151_v18  ;;  %v3465_v23 = vtrunc.f32 (!%p3198_p1), %v150_v19  ;;  %v121_v24 = vld [vmem:[%s5657_s1 + $0x28] sm:$0xff] (!%p3198_p1)  ;;  %v120_v25 = vld [vmem:[%s5657_s1 + $0x20] sm:$0xff] (!%p3198_p1) }
   0x7   :  { %58 = vst [vmem:[#allocation4 + $0x60] sm:$0xff] %v3697_v0  ;;  %59 = vst [vmem:[#allocation4 + $0x68] sm:$0xff] %v3697_v0  ;;  %409 = vperm.xlu1 (!%p3198_p1), %3537, %v3462_v12   ;;  %v3404_v20 = vcvt.f32.s32 (!%p3198_p1), %v3403_v16  ;;  %v3402_v21 = vcvt.f32.s32 (!%p3198_p1), %v3401_v17  ;;  %v3407_v28 = vtrunc.f32 (!%p3198_p1), %v121_v24  ;;  %v3405_v29 = vtrunc.f32 (!%p3198_p1), %v120_v25  ;;  %v153_v30 = vld [vmem:[%s5657_s1 + $0x128] sm:$0xff] (!%p3198_p1)  ;;  %v152_v31 = vld [vmem:[%s5657_s1 + $0x120] sm:$0xff] (!%p3198_p1) }
   0x8   :  { %60 = vst [vmem:[#allocation4 + $0x70] sm:$0xff] %v3697_v0  ;;  %61 = vst [vmem:[#allocation4 + $0x78] sm:$0xff] %v3697_v0  ;;  %313 = vperm.xlu0 (!%p3198_p1), %3536, %v3398_v13   ;;  %v3468_v26 = vcvt.f32.s32 (!%p3198_p1), %v3467_v22  ;;  %v3466_v27 = vcvt.f32.s32 (!%p3198_p1), %v3465_v23  ;;  %v3471_v34 = vtrunc.f32 (!%p3198_p1), %v153_v30  ;;  %v3469_v35 = vtrunc.f32 (!%p3198_p1), %v152_v31  ;;  %v123_v36 = vld [vmem:[%s5657_s1 + $0x38] sm:$0xff] (!%p3198_p1)  ;;  %v122_v37 = vld [vmem:[%s5657_s1 + $0x30] sm:$0xff] (!%p3198_p1) }
   0x9   :  { %62 = vst [vmem:[#allocation4 + $0x80] sm:$0xff] %v3697_v0  ;;  %63 = vst [vmem:[#allocation4 + $0x88] sm:$0xff] %v3697_v0  ;;  %v3408_v32 = vcvt.f32.s32 (!%p3198_p1), %v3407_v28  ;;  %v3406_v33 = vcvt.f32.s32 (!%p3198_p1), %v3405_v29  ;;  %v3411_v40 = vtrunc.f32 (!%p3198_p1), %v123_v36  ;;  %v3409_v41 = vtrunc.f32 (!%p3198_p1), %v122_v37  ;;  %v155_v42 = vld [vmem:[%s5657_s1 + $0x138] sm:$0xff] (!%p3198_p1)  ;;  %v154_v43 = vld [vmem:[%s5657_s1 + $0x130] sm:$0xff] (!%p3198_p1) }
   0xa   :  { %64 = vst [vmem:[#allocation4 + $0x90] sm:$0xff] %v3697_v0  ;;  %65 = vst [vmem:[#allocation4 + $0x98] sm:$0xff] %v3697_v0  ;;  %v3472_v38 = vcvt.f32.s32 (!%p3198_p1), %v3471_v34  ;;  %v3470_v39 = vcvt.f32.s32 (!%p3198_p1), %v3469_v35  ;;  %v3538_v44 = vld [vmem:[%s3812_s23] sm:$0xff] (!%p3198_p1)   ;;  %v3475_v47 = vtrunc.f32 (!%p3198_p1), %v155_v42  ;;  %v3473_v48 = vtrunc.f32 (!%p3198_p1), %v154_v43  ;;  %v125_v49 = vld [vmem:[%s5657_s1 + $0x48] sm:$0xff] (!%p3198_p1) }
   0xb   :  { %66 = vst [vmem:[#allocation4 + $0xa0] sm:$0xff] %v3697_v0  ;;  %67 = vst [vmem:[#allocation4 + $0xa8] sm:$0xff] %v3697_v0  ;;  %412 = vperm.xlu1 (!%p3198_p1), %3537, %v3464_v14   ;;  %3329 = vmatprep.subr.bf16.mxu0 (!%p3198_p1), %v3538_v44  ;;  %v3412_v45 = vcvt.f32.s32 (!%p3198_p1), %v3411_v40  ;;  %v3410_v46 = vcvt.f32.s32 (!%p3198_p1), %v3409_v41  ;;  %v124_v50 = vld [vmem:[%s5657_s1 + $0x40] sm:$0xff] (!%p3198_p1)  ;;  %v3415_v53 = vtrunc.f32 (!%p3198_p1), %v125_v49  ;;  %v157_v55 = vld [vmem:[%s5657_s1 + $0x148] sm:$0xff] (!%p3198_p1) }
   0xc   :  { %68 = vst [vmem:[#allocation4 + $0xb0] sm:$0xff] %v3697_v0  ;;  %69 = vst [vmem:[#allocation4 + $0xb8] sm:$0xff] %v3697_v0  ;;  %316 = vperm.xlu0 (!%p3198_p1), %3536, %v3400_v15   ;;  %3395 = vmatprep.subr.bf16.mxu1 (!%p3198_p1), %v3538_v44  ;;  %v3476_v51 = vcvt.f32.s32 (!%p3198_p1), %v3475_v47  ;;  %v3474_v52 = vcvt.f32.s32 (!%p3198_p1), %v3473_v48  ;;  %v3413_v54 = vtrunc.f32 (!%p3198_p1), %v124_v50  ;;  %v156_v56 = vld [vmem:[%s5657_s1 + $0x140] sm:$0xff] (!%p3198_p1)  ;;  %v3479_v59 = vtrunc.f32 (!%p3198_p1), %v157_v55  ;;  %v127_v61 = vld [vmem:[%s5657_s1 + $0x58] sm:$0xff] (!%p3198_p1) }
   0xd   :  { %70 = vst [vmem:[#allocation4 + $0xc0] sm:$0xff] %v3697_v0  ;;  %71 = vst [vmem:[#allocation4 + $0xc8] sm:$0xff] %v3697_v0  ;;  %3330 = vmatpush3.bf16.msra.mxu0 (!%p3198_p1), %v3538_v44  ;;  %3396 = vmatpush3.bf16.msra.mxu1 (!%p3198_p1), %v3538_v44  ;;  %v3416_v57 = vcvt.f32.s32 (!%p3198_p1), %v3415_v53  ;;  %v3477_v60 = vtrunc.f32 (!%p3198_p1), %v156_v56  ;;  %v126_v62 = vld [vmem:[%s5657_s1 + $0x50] sm:$0xff] (!%p3198_p1)  ;;  %v3419_v1 = vtrunc.f32 (!%p3198_p1), %v127_v61  ;;  %v159_v3 = vld [vmem:[%s5657_s1 + $0x158] sm:$0xff] (!%p3198_p1) }
   0xe   :  { %72 = vst [vmem:[#allocation4 + $0xd0] sm:$0xff] %v3697_v0  ;;  %73 = vst [vmem:[#allocation4 + $0xd8] sm:$0xff] %v3697_v0  ;;  %v3414_v58 = vcvt.f32.s32 (!%p3198_p1), %v3413_v54  ;;  %v3480_v63 = vcvt.f32.s32 (!%p3198_p1), %v3479_v59  ;;  %v3417_v2 = vtrunc.f32 (!%p3198_p1), %v126_v62  ;;  %v158_v4 = vld [vmem:[%s5657_s1 + $0x150] sm:$0xff] (!%p3198_p1)  ;;  %v3483_v7 = vtrunc.f32 (!%p3198_p1), %v159_v3  ;;  %v129_v9 = vld [vmem:[%s5657_s1 + $0x68] sm:$0xff] (!%p3198_p1) }
   0xf   :  { %74 = vst [vmem:[#allocation4 + $0xe0] sm:$0xff] %v3697_v0  ;;  %75 = vst [vmem:[#allocation4 + $0xe8] sm:$0xff] %v3697_v0  ;;  %322 = vperm.xlu1 (!%p3198_p1), %3537, %v3404_v20   ;;  %v3420_v5 = vcvt.f32.s32 (!%p3198_p1), %v3419_v1  ;;  %v3481_v8 = vtrunc.f32 (!%p3198_p1), %v158_v4  ;;  %v128_v10 = vld [vmem:[%s5657_s1 + $0x60] sm:$0xff] (!%p3198_p1)  ;;  %v3423_v13 = vtrunc.f32 (!%p3198_p1), %v129_v9  ;;  %v161_v15 = vld [vmem:[%s5657_s1 + $0x168] sm:$0xff] (!%p3198_p1) }
  0x10   :  { %76 = vst [vmem:[#allocation4 + $0xf0] sm:$0xff] %v3697_v0  ;;  %77 = vst [vmem:[#allocation4 + $0xf8] sm:$0xff] %v3697_v0  ;;  %319 = vperm.xlu0 (!%p3198_p1), %3536, %v3402_v21   ;;  %v3418_v6 = vcvt.f32.s32 (!%p3198_p1), %v3417_v2  ;;  %v3484_v11 = vcvt.f32.s32 (!%p3198_p1), %v3483_v7  ;;  %v3421_v14 = vtrunc.f32 (!%p3198_p1), %v128_v10  ;;  %v160_v16 = vld [vmem:[%s5657_s1 + $0x160] sm:$0xff] (!%p3198_p1)  ;;  %v3487_v19 = vtrunc.f32 (!%p3198_p1), %v161_v15  ;;  %v131_v21 = vld [vmem:[%s5657_s1 + $0x78] sm:$0xff] (!%p3198_p1) }
  0x11   :  { %78 = vst [vmem:[#allocation4 + $0x100] sm:$0xff] %v3697_v0  ;;  %79 = vst [vmem:[#allocation4 + $0x108] sm:$0xff] %v3697_v0  ;;  %v3482_v12 = vcvt.f32.s32 (!%p3198_p1), %v3481_v8  ;;  %v3424_v17 = vcvt.f32.s32 (!%p3198_p1), %v3423_v13  ;;  %v3485_v20 = vtrunc.f32 (!%p3198_p1), %v160_v16  ;;  %v130_v22 = vld [vmem:[%s5657_s1 + $0x70] sm:$0xff] (!%p3198_p1)  ;;  %v3427_v25 = vtrunc.f32 (!%p3198_p1), %v131_v21  ;;  %v132_v34 = vld [vmem:[%s5657_s1 + $0x80] sm:$0xff] (!%p3198_p1) }
  0x12   :  { %80 = vst [vmem:[#allocation4 + $0x110] sm:$0xff] %v3697_v0  ;;  %81 = vst [vmem:[#allocation4 + $0x118] sm:$0xff] %v3697_v0  ;;  %v3422_v18 = vcvt.f32.s32 (!%p3198_p1), %v3421_v14  ;;  %v3488_v23 = vcvt.f32.s32 (!%p3198_p1), %v3487_v19  ;;  %v162_v28 = vld [vmem:[%s5657_s1 + $0x170] sm:$0xff] (!%p3198_p1)  ;;  %v164_v40 = vld [vmem:[%s5657_s1 + $0x180] sm:$0xff] (!%p3198_p1) }
  0x13   :  { %82 = vst [vmem:[#allocation4 + $0x120] sm:$0xff] %v3697_v0  ;;  %83 = vst [vmem:[#allocation4 + $0x128] sm:$0xff] %v3697_v0  ;;  %418 = vperm.xlu1 (!%p3198_p1), %3537, %v3468_v26   ;;  %v3486_v24 = vcvt.f32.s32 (!%p3198_p1), %v3485_v20  ;;  %v3425_v26 = vtrunc.f32 (!%p3198_p1), %v130_v22  ;;  %v3428_v29 = vcvt.f32.s32 (!%p3198_p1), %v3427_v25  ;;  %v3493_v44 = vtrunc.f32 (!%p3198_p1), %v164_v40 }
  0x14   :  { %84 = vst [vmem:[#allocation4 + $0x130] sm:$0xff] %v3697_v0  ;;  %85 = vst [vmem:[#allocation4 + $0x138] sm:$0xff] %v3697_v0  ;;  %415 = vperm.xlu0 (!%p3198_p1), %3536, %v3466_v27   ;;  %v163_v27 = vld [vmem:[%s5657_s1 + $0x178] sm:$0xff] (!%p3198_p1) }
  0x15   :  { %86 = vst [vmem:[#allocation4 + $0x140] sm:$0xff] %v3697_v0  ;;  %87 = vst [vmem:[#allocation4 + $0x148] sm:$0xff] %v3697_v0  ;;  %v3426_v30 = vcvt.f32.s32 (!%p3198_p1), %v3425_v26  ;;  %v3491_v31 = vtrunc.f32 (!%p3198_p1), %v163_v27  ;;  %v3494_v48 = vcvt.f32.s32 (!%p3198_p1), %v3493_v44 }
  0x16   :  { %88 = vst [vmem:[#allocation4 + $0x150] sm:$0xff] %v3697_v0  ;;  %89 = vst [vmem:[#allocation4 + $0x158] sm:$0xff] %v3697_v0 }
  0x17   :  { %90 = vst [vmem:[#allocation4 + $0x160] sm:$0xff] %v3697_v0  ;;  %91 = vst [vmem:[#allocation4 + $0x168] sm:$0xff] %v3697_v0  ;;  %328 = vperm.xlu1 (!%p3198_p1), %3537, %v3408_v32   ;;  %v3489_v32 = vtrunc.f32 (!%p3198_p1), %v162_v28  ;;  %v3492_v35 = vcvt.f32.s32 (!%p3198_p1), %v3491_v31 }
  0x18   :  { %92 = vst [vmem:[#allocation4 + $0x170] sm:$0xff] %v3697_v0  ;;  %93 = vst [vmem:[#allocation4 + $0x178] sm:$0xff] %v3697_v0  ;;  %325 = vperm.xlu0 (!%p3198_p1), %3536, %v3406_v33   ;;  %v133_v33 = vld [vmem:[%s5657_s1 + $0x88] sm:$0xff] (!%p3198_p1) }
  0x19   :  { %94 = vst [vmem:[#allocation4 + $0x180] sm:$0xff] %v3697_v0  ;;  %95 = vst [vmem:[#allocation4 + $0x188] sm:$0xff] %v3697_v0  ;;  %v3490_v36 = vcvt.f32.s32 (!%p3198_p1), %v3489_v32  ;;  %v3431_v37 = vtrunc.f32 (!%p3198_p1), %v133_v33 }
  0x1a   :  { %96 = vst [vmem:[#allocation4 + $0x190] sm:$0xff] %v3697_v0  ;;  %97 = vst [vmem:[#allocation4 + $0x198] sm:$0xff] %v3697_v0  ;;  %115 = sbr.rel (%p3198_p1) target bundleno = 482 (0x1e2), region = 17 }
  0x1b   :  { %98 = vst [vmem:[#allocation4 + $0x1a0] sm:$0xff] %v3697_v0  ;;  %99 = vst [vmem:[#allocation4 + $0x1a8] sm:$0xff] %v3697_v0  ;;  %424 = vperm.xlu1 (!%p3198_p1), %3537, %v3472_v38   ;;  %v3429_v38 = vtrunc.f32 (!%p3198_p1), %v132_v34  ;;  %v3432_v41 = vcvt.f32.s32 (!%p3198_p1), %v3431_v37 }
  0x1c   :  { %100 = vst [vmem:[#allocation4 + $0x1b0] sm:$0xff] %v3697_v0  ;;  %101 = vst [vmem:[#allocation4 + $0x1b8] sm:$0xff] %v3697_v0  ;;  %421 = vperm.xlu0 (!%p3198_p1), %3536, %v3470_v39   ;;  %v165_v39 = vld [vmem:[%s5657_s1 + $0x188] sm:$0xff] (!%p3198_p1) }
  0x1d   :  { %102 = vst [vmem:[#allocation4 + $0x1c0] sm:$0xff] %v3697_v0  ;;  %103 = vst [vmem:[#allocation4 + $0x1c8] sm:$0xff] %v3697_v0  ;;  %v3430_v42 = vcvt.f32.s32 (!%p3198_p1), %v3429_v38  ;;  %v3495_v43 = vtrunc.f32 (!%p3198_p1), %v165_v39 }
  0x1e   :  { %104 = vst [vmem:[#allocation4 + $0x1d0] sm:$0xff] %v3697_v0  ;;  %105 = vst [vmem:[#allocation4 + $0x1d8] sm:$0xff] %v3697_v0 }
  0x1f   :  { %106 = vst [vmem:[#allocation4 + $0x1e0] sm:$0xff] %v3697_v0  ;;  %107 = vst [vmem:[#allocation4 + $0x1e8] sm:$0xff] %v3697_v0  ;;  %334 = vperm.xlu1 (!%p3198_p1), %3537, %v3412_v45   ;;  %v135_v45 = vld [vmem:[%s5657_s1 + $0x98] sm:$0xff] (!%p3198_p1)  ;;  %v3496_v47 = vcvt.f32.s32 (!%p3198_p1), %v3495_v43 }
  0x20   :  { %108 = vst [vmem:[#allocation4 + $0x1f0] sm:$0xff] %v3697_v0  ;;  %109 = vst [vmem:[#allocation4 + $0x1f8] sm:$0xff] %v3697_v0  ;;  %331 = vperm.xlu0 (!%p3198_p1), %3536, %v3410_v46   ;;  %v3478_v0 = vcvt.f32.s32 (!%p3198_p1), %v3477_v60  ;;  %v134_v46 = vld [vmem:[%s5657_s1 + $0x90] sm:$0xff] (!%p3198_p1)  ;;  %v3435_v49 = vtrunc.f32 (!%p3198_p1), %v135_v45 }
  0x21   :  { %v3433_v50 = vtrunc.f32 %v134_v46 }
  0x22   :  { %v3436_v53 = vcvt.f32.s32 %v3435_v49 }
  0x23   :  { %430 = vperm.xlu1 %3537, %v3476_v51   ;;  %v167_v51 = vld [vmem:[%s5657_s1 + $0x198] sm:$0xff]  ;;  %v3434_v54 = vcvt.f32.s32 %v3433_v50 }
  0x24   :  { %427 = vperm.xlu0 %3536, %v3474_v52   ;;  %v166_v52 = vld [vmem:[%s5657_s1 + $0x190] sm:$0xff]  ;;  %v3499_v55 = vtrunc.f32 %v167_v51 }
  0x25   :  { %v3497_v56 = vtrunc.f32 %v166_v52 }
  0x26   :  { %v3500_v59 = vcvt.f32.s32 %v3499_v55 }
  0x27   :  { %340 = vperm.xlu1 %3537, %v3416_v57   ;;  %v137_v57 = vld [vmem:[%s5657_s1 + $0xa8] sm:$0xff]  ;;  %v3498_v60 = vcvt.f32.s32 %v3497_v56 }
  0x28   :  { %337 = vperm.xlu0 %3536, %v3414_v58   ;;  %v136_v58 = vld [vmem:[%s5657_s1 + $0xa0] sm:$0xff]  ;;  %v3439_v61 = vtrunc.f32 %v137_v57 }
  0x29   :  { %v3437_v62 = vtrunc.f32 %v136_v58 }
  0x2a   :  { %v3440_v1 = vcvt.f32.s32 %v3439_v61 }
  0x2b   :  { %436 = vperm.xlu1 %3537, %v3480_v63   ;;  %v169_v63 = vld [vmem:[%s5657_s1 + $0x1a8] sm:$0xff]  ;;  %v3438_v2 = vcvt.f32.s32 %v3437_v62 }
  0x2c   :  { %433 = vperm.xlu0 %3536, %v3478_v0   ;;  %v168_v0 = vld [vmem:[%s5657_s1 + $0x1a0] sm:$0xff]  ;;  %v3503_v3 = vtrunc.f32 %v169_v63 }
  0x2d   :  { %v3501_v4 = vtrunc.f32 %v168_v0 }
  0x2e   :  { %v3504_v7 = vcvt.f32.s32 %v3503_v3  ;;  %v310_v3 = vlaneseq }
  0x2f   :  { %346 = vperm.xlu1 %3537, %v3420_v5   ;;  %v139_v5 = vld [vmem:[%s5657_s1 + $0xb8] sm:$0xff]  ;;  %v3502_v8 = vcvt.f32.s32 %v3501_v4 }
  0x30   :  { %343 = vperm.xlu0 %3536, %v3418_v6   ;;  %v138_v6 = vld [vmem:[%s5657_s1 + $0xb0] sm:$0xff]  ;;  %v3443_v9 = vtrunc.f32 %v139_v5  ;;  %v4010_v4 = vand.u32 127, %v310_v3 }
  0x31   :  { %v3441_v10 = vtrunc.f32 %v138_v6 }
  0x32   :  { %v3444_v13 = vcvt.f32.s32 %v3443_v9  ;;  %v3699_v9 = vmov 0.0  }
  0x33   :  { %442 = vperm.xlu1 %3537, %v3484_v11   ;;  %v171_v11 = vld [vmem:[%s5657_s1 + $0x1b8] sm:$0xff]  ;;  %v3442_v14 = vcvt.f32.s32 %v3441_v10 }
  0x34   :  { %439 = vperm.xlu0 %3536, %v3482_v12   ;;  %v170_v12 = vld [vmem:[%s5657_s1 + $0x1b0] sm:$0xff]  ;;  %v3507_v15 = vtrunc.f32 %v171_v11 }
  0x35   :  { %v3505_v16 = vtrunc.f32 %v170_v12 }
  0x36   :  { %v3508_v19 = vcvt.f32.s32 %v3507_v15 }
  0x37   :  { %352 = vperm.xlu1 %3537, %v3424_v17   ;;  %v141_v17 = vld [vmem:[%s5657_s1 + $0xc8] sm:$0xff]  ;;  %v3506_v20 = vcvt.f32.s32 %v3505_v16 }
  0x38   :  { %349 = vperm.xlu0 %3536, %v3422_v18   ;;  %v140_v18 = vld [vmem:[%s5657_s1 + $0xc0] sm:$0xff]  ;;  %v3447_v21 = vtrunc.f32 %v141_v17 }
  0x39   :  { %v3445_v22 = vtrunc.f32 %v140_v18 }
  0x3a   :  { %v3448_v25 = vcvt.f32.s32 %v3447_v21 }
  0x3b   :  { %448 = vperm.xlu1 %3537, %v3488_v23   ;;  %v173_v23 = vld [vmem:[%s5657_s1 + $0x1c8] sm:$0xff]  ;;  %v3446_v26 = vcvt.f32.s32 %v3445_v22 }
  0x3c   :  { %445 = vperm.xlu0 %3536, %v3486_v24   ;;  %v172_v24 = vld [vmem:[%s5657_s1 + $0x1c0] sm:$0xff]  ;;  %v3511_v27 = vtrunc.f32 %v173_v23 }
  0x3d   :  { %v3509_v28 = vtrunc.f32 %v172_v24 }
  0x3e   :  { %v3512_v31 = vcvt.f32.s32 %v3511_v27 }
  0x3f   :  { %358 = vperm.xlu1 %3537, %v3428_v29   ;;  %v143_v29 = vld [vmem:[%s5657_s1 + $0xd8] sm:$0xff]  ;;  %v3510_v32 = vcvt.f32.s32 %v3509_v28 }
  0x40   :  { %355 = vperm.xlu0 %3536, %v3426_v30   ;;  %v142_v30 = vld [vmem:[%s5657_s1 + $0xd0] sm:$0xff]  ;;  %v3451_v33 = vtrunc.f32 %v143_v29 }
  0x41   :  { %v3449_v34 = vtrunc.f32 %v142_v30 }
  0x42   :  { %v3452_v37 = vcvt.f32.s32 %v3451_v33 }
  0x43   :  { %454 = vperm.xlu1 %3537, %v3492_v35   ;;  %v175_v35 = vld [vmem:[%s5657_s1 + $0x1d8] sm:$0xff]  ;;  %v3450_v38 = vcvt.f32.s32 %v3449_v34 }
  0x44   :  { %451 = vperm.xlu0 %3536, %v3490_v36   ;;  %v174_v36 = vld [vmem:[%s5657_s1 + $0x1d0] sm:$0xff]  ;;  %v3515_v39 = vtrunc.f32 %v175_v35 }
  0x45   :  { %v3513_v40 = vtrunc.f32 %v174_v36 }
  0x46   :  { %v3516_v43 = vcvt.f32.s32 %v3515_v39 }
  0x47   :  { %364 = vperm.xlu1 %3537, %v3432_v41   ;;  %v145_v41 = vld [vmem:[%s5657_s1 + $0xe8] sm:$0xff]  ;;  %v3514_v44 = vcvt.f32.s32 %v3513_v40 }
  0x48   :  { %361 = vperm.xlu0 %3536, %v3430_v42   ;;  %v144_v42 = vld [vmem:[%s5657_s1 + $0xe0] sm:$0xff]  ;;  %v3455_v45 = vtrunc.f32 %v145_v41 }
  0x49   :  { %v3453_v46 = vtrunc.f32 %v144_v42 }
  0x4a   :  { %v3456_v49 = vcvt.f32.s32 %v3455_v45 }
  0x4b   :  { %460 = vperm.xlu1 %3537, %v3496_v47   ;;  %v177_v47 = vld [vmem:[%s5657_s1 + $0x1e8] sm:$0xff]  ;;  %v3454_v50 = vcvt.f32.s32 %v3453_v46 }
  0x4c   :  { %457 = vperm.xlu0 %3536, %v3494_v48   ;;  %v176_v48 = vld [vmem:[%s5657_s1 + $0x1e0] sm:$0xff]  ;;  %v3519_v51 = vtrunc.f32 %v177_v47 }
  0x4d   :  { %v3517_v52 = vtrunc.f32 %v176_v48 }
  0x4e   :  { %v3520_v55 = vcvt.f32.s32 %v3519_v51 }
  0x4f   :  { %370 = vperm.xlu1 %3537, %v3436_v53   ;;  %v147_v53 = vld [vmem:[%s5657_s1 + $0xf8] sm:$0xff]  ;;  %v3518_v56 = vcvt.f32.s32 %v3517_v52 }
  0x50   :  { %367 = vperm.xlu0 %3536, %v3434_v54   ;;  %v146_v54 = vld [vmem:[%s5657_s1 + $0xf0] sm:$0xff]  ;;  %v3459_v57 = vtrunc.f32 %v147_v53 }
  0x51   :  { %v3457_v58 = vtrunc.f32 %v146_v54 }
  0x52   :  { %v3460_v61 = vcvt.f32.s32 %v3459_v57 }
  0x53   :  { %466 = vperm.xlu1 %3537, %v3500_v59   ;;  %v179_v59 = vld [vmem:[%s5657_s1 + $0x1f8] sm:$0xff]  ;;  %v3458_v62 = vcvt.f32.s32 %v3457_v58 }
  0x54   :  { %463 = vperm.xlu0 %3536, %v3498_v60   ;;  %v178_v60 = vld [vmem:[%s5657_s1 + $0x1f0] sm:$0xff]  ;;  %v3523_v63 = vtrunc.f32 %v179_v59 }
  0x55   :  { %v3521_v0 = vtrunc.f32 %v178_v60 }
  0x57   :  { %376 = vperm.xlu1 %3537, %v3440_v1   ;;  %v3524_v1 = vcvt.f32.s32 %v3523_v63 }
  0x58   :  { %373 = vperm.xlu0 %3536, %v3438_v2   ;;  %v3522_v2 = vcvt.f32.s32 %v3521_v0 }
  0x5b   :  { %472 = vperm.xlu1 %3537, %v3504_v7  }
  0x5c   :  { %469 = vperm.xlu0 %3536, %v3502_v8  }
  0x5f   :  { %382 = vperm.xlu1 %3537, %v3444_v13  }
  0x60   :  { %379 = vperm.xlu0 %3536, %v3442_v14  }
  0x63   :  { %478 = vperm.xlu1 %3537, %v3508_v19  }
  0x64   :  { %475 = vperm.xlu0 %3536, %v3506_v20  }
  0x67   :  { %388 = vperm.xlu1 %3537, %v3448_v25  }
  0x68   :  { %385 = vperm.xlu0 %3536, %v3446_v26  }
  0x6b   :  { %484 = vperm.xlu1 %3537, %v3512_v31  }
  0x6c   :  { %481 = vperm.xlu0 %3536, %v3510_v32  }
  0x6f   :  { %394 = vperm.xlu1 %3537, %v3452_v37  }
  0x70   :  { %391 = vperm.xlu0 %3536, %v3450_v38  }
  0x73   :  { %490 = vperm.xlu1 %3537, %v3516_v43  }
  0x74   :  { %487 = vperm.xlu0 %3536, %v3514_v44  }
  0x77   :  { %400 = vperm.xlu1 %3537, %v3456_v49  }
  0x78   :  { %397 = vperm.xlu0 %3536, %v3454_v50  }
  0x7b   :  { %496 = vperm.xlu1 %3537, %v3520_v55  }
  0x7c   :  { %493 = vperm.xlu0 %3536, %v3518_v56  }
  0x7f   :  { %406 = vperm.xlu1 %3537, %v3460_v61  }
  0x80   :  { %403 = vperm.xlu0 %3536, %v3458_v62  }
  0x83   :  { %502 = vperm.xlu1 %3537, %v3524_v1  }
  0x84   :  { %499 = vperm.xlu0 %3536, %v3522_v2  }
  0x86   :  { %v410_v5 = vpop.permute.xlu1 %409 }
  0x87   :  { %v314_v6 = vpop.permute.xlu0 %313  ;;  %vm536_vm0 = vcmp.eq.s32.totalorder %v4010_v4, %v410_v5 }
  0x88   :  { %vm504_vm1 = vcmp.eq.s32.totalorder %v4010_v4, %v314_v6  ;;  %v3231_v10 = vsel %vm536_vm0, 1.0, %v3699_v9 }
  0x89   :  { %v3199_v11 = vsel %vm504_vm1, 1.0, %v3699_v9 }
  0x8a   :  { %v413_v7 = vpop.permute.xlu1 %412 }
  0x8b   :  { %v317_v8 = vpop.permute.xlu0 %316  ;;  %vm537_vm2 = vcmp.eq.s32.totalorder %v4010_v4, %v413_v7 }
  0x8c   :  { %vm505_vm3 = vcmp.eq.s32.totalorder %v4010_v4, %v317_v8  ;;  %v3232_v12 = vsel %vm537_vm2, 1.0, %v3699_v9 }
  0x8d   :  { %v3200_v13 = vsel %vm505_vm3, 1.0, %v3699_v9  ;;  %v712_v15 = vpack.c.bf16 %v3232_v12, %v3231_v10 }
  0x8e   :  { %v696_v14 = vpack.c.bf16 %v3200_v13, %v3199_v11  ;;  %v323_v16 = vpop.permute.xlu1 %322 }
  0x8f   :  { %v320_v17 = vpop.permute.xlu0 %319  ;;  %vm507_vm5 = vcmp.eq.s32.totalorder %v4010_v4, %v323_v16  ;;  %3363 = vmatprep.mubr.msk.bf16.mxu1 %vm800_vm4, %v712_v15 }
  0x90   :  { %vm506_vm6 = vcmp.eq.s32.totalorder %v4010_v4, %v320_v17  ;;  %3331 = vmatprep.mubr.msk.bf16.mxu0 %vm800_vm4, %v696_v14  ;;  %v3202_v18 = vsel %vm507_vm5, 1.0, %v3699_v9 }
  0x91   :  { %v3201_v19 = vsel %vm506_vm6, 1.0, %v3699_v9 }
  0x92   :  { %v697_v20 = vpack.c.bf16 %v3202_v18, %v3201_v19  ;;  %v419_v21 = vpop.permute.xlu1 %418 }
  0x93   :  { %v416_v22 = vpop.permute.xlu0 %415  ;;  %vm539_vm7 = vcmp.eq.s32.totalorder %v4010_v4, %v419_v21 }
  0x94   :  { %vm538_vm8 = vcmp.eq.s32.totalorder %v4010_v4, %v416_v22  ;;  %3332 = vmatmul.mubr.msk.bf16.vlgmr.msra.gmra.mrb[0].mxu0 %vm800_vm4, %v697_v20  ;;  %v3234_v23 = vsel %vm539_vm7, 1.0, %v3699_v9 }
  0x95   :  { %v3233_v24 = vsel %vm538_vm8, 1.0, %v3699_v9 }
  0x96   :  { %v713_v25 = vpack.c.bf16 %v3234_v23, %v3233_v24  ;;  %v329_v26 = vpop.permute.xlu1 %328 }
  0x97   :  { %v326_v27 = vpop.permute.xlu0 %325  ;;  %vm509_vm9 = vcmp.eq.s32.totalorder %v4010_v4, %v329_v26 }
  0x98   :  { %vm508_vm10 = vcmp.eq.s32.totalorder %v4010_v4, %v326_v27  ;;  %3364 = vmatmul.mubr.msk.bf16.vlgmr.msra.gmra.mrb[0].mxu1 %vm800_vm4, %v713_v25  ;;  %v3204_v28 = vsel %vm509_vm9, 1.0, %v3699_v9 }
  0x99   :  { %v3203_v29 = vsel %vm508_vm10, 1.0, %v3699_v9 }
  0x9a   :  { %v698_v30 = vpack.c.bf16 %v3204_v28, %v3203_v29  ;;  %v425_v31 = vpop.permute.xlu1 %424 }
  0x9b   :  { %v422_v32 = vpop.permute.xlu0 %421  ;;  %vm541_vm11 = vcmp.eq.s32.totalorder %v4010_v4, %v425_v31 }
  0x9c   :  { %vm540_vm12 = vcmp.eq.s32.totalorder %v4010_v4, %v422_v32  ;;  %3335 = vmatprep.mubr.msk.bf16.mxu0 %vm800_vm4, %v698_v30  ;;  %v3236_v33 = vsel %vm541_vm11, 1.0, %v3699_v9 }
  0x9d   :  { %v3235_v34 = vsel %vm540_vm12, 1.0, %v3699_v9 }
  0x9e   :  { %v714_v35 = vpack.c.bf16 %v3236_v33, %v3235_v34  ;;  %v335_v36 = vpop.permute.xlu1 %334 }
  0x9f   :  { %v332_v37 = vpop.permute.xlu0 %331  ;;  %vm511_vm13 = vcmp.eq.s32.totalorder %v4010_v4, %v335_v36 }
  0xa0   :  { %vm510_vm14 = vcmp.eq.s32.totalorder %v4010_v4, %v332_v37  ;;  %3367 = vmatprep.mubr.msk.bf16.mxu1 %vm800_vm4, %v714_v35  ;;  %v3206_v38 = vsel %vm511_vm13, 1.0, %v3699_v9 }
  0xa1   :  { %v3205_v39 = vsel %vm510_vm14, 1.0, %v3699_v9 }
  0xa2   :  { %v699_v40 = vpack.c.bf16 %v3206_v38, %v3205_v39  ;;  %v431_v41 = vpop.permute.xlu1 %430 }
  0xa3   :  { %v428_v42 = vpop.permute.xlu0 %427  ;;  %vm543_vm15 = vcmp.eq.s32.totalorder %v4010_v4, %v431_v41 }
  0xa4   :  { %vm542_vm0 = vcmp.eq.s32.totalorder %v4010_v4, %v428_v42  ;;  %3336 = vmatmul.mubr.msk.bf16.gmra.mrb[4].mxu0 %vm800_vm4, %v699_v40  ;;  %v3238_v43 = vsel %vm543_vm15, 1.0, %v3699_v9 }
  0xa5   :  { %v3237_v44 = vsel %vm542_vm0, 1.0, %v3699_v9 }
  0xa6   :  { %v715_v45 = vpack.c.bf16 %v3238_v43, %v3237_v44  ;;  %v341_v46 = vpop.permute.xlu1 %340 }
  0xa7   :  { %v338_v47 = vpop.permute.xlu0 %337  ;;  %vm513_vm1 = vcmp.eq.s32.totalorder %v4010_v4, %v341_v46 }
  0xa8   :  { %vm512_vm2 = vcmp.eq.s32.totalorder %v4010_v4, %v338_v47  ;;  %3368 = vmatmul.mubr.msk.bf16.gmra.mrb[4].mxu1 %vm800_vm4, %v715_v45  ;;  %v3208_v48 = vsel %vm513_vm1, 1.0, %v3699_v9 }
  0xa9   :  { %v3207_v49 = vsel %vm512_vm2, 1.0, %v3699_v9 }
  0xaa   :  { %v700_v50 = vpack.c.bf16 %v3208_v48, %v3207_v49  ;;  %v437_v51 = vpop.permute.xlu1 %436 }
  0xab   :  { %v434_v52 = vpop.permute.xlu0 %433  ;;  %vm545_vm3 = vcmp.eq.s32.totalorder %v4010_v4, %v437_v51 }
  0xac   :  { %vm544_vm5 = vcmp.eq.s32.totalorder %v4010_v4, %v434_v52  ;;  %3339 = vmatprep.mubr.msk.bf16.mxu0 %vm800_vm4, %v700_v50  ;;  %v3240_v53 = vsel %vm545_vm3, 1.0, %v3699_v9 }
  0xad   :  { %v3239_v54 = vsel %vm544_vm5, 1.0, %v3699_v9 }
  0xae   :  { %v716_v55 = vpack.c.bf16 %v3240_v53, %v3239_v54  ;;  %v347_v56 = vpop.permute.xlu1 %346 }
  0xaf   :  { %v344_v57 = vpop.permute.xlu0 %343  ;;  %vm515_vm6 = vcmp.eq.s32.totalorder %v4010_v4, %v347_v56 }
  0xb0   :  { %vm514_vm7 = vcmp.eq.s32.totalorder %v4010_v4, %v344_v57  ;;  %3371 = vmatprep.mubr.msk.bf16.mxu1 %vm800_vm4, %v716_v55  ;;  %v3210_v58 = vsel %vm515_vm6, 1.0, %v3699_v9 }
  0xb1   :  { %v3209_v59 = vsel %vm514_vm7, 1.0, %v3699_v9 }
  0xb2   :  { %v701_v60 = vpack.c.bf16 %v3210_v58, %v3209_v59  ;;  %v443_v61 = vpop.permute.xlu1 %442 }
  0xb3   :  { %v440_v62 = vpop.permute.xlu0 %439  ;;  %vm547_vm8 = vcmp.eq.s32.totalorder %v4010_v4, %v443_v61 }
  0xb4   :  { %vm546_vm9 = vcmp.eq.s32.totalorder %v4010_v4, %v440_v62  ;;  %3340 = vmatmul.mubr.msk.bf16.gmra.mrb[8].mxu0 %vm800_vm4, %v701_v60  ;;  %v3242_v63 = vsel %vm547_vm8, 1.0, %v3699_v9 }
  0xb5   :  { %v3241_v0 = vsel %vm546_vm9, 1.0, %v3699_v9 }
  0xb6   :  { %v717_v1 = vpack.c.bf16 %v3242_v63, %v3241_v0  ;;  %v353_v2 = vpop.permute.xlu1 %352 }
  0xb7   :  { %v350_v3 = vpop.permute.xlu0 %349  ;;  %vm517_vm10 = vcmp.eq.s32.totalorder %v4010_v4, %v353_v2 }
  0xb8   :  { %vm516_vm11 = vcmp.eq.s32.totalorder %v4010_v4, %v350_v3  ;;  %3372 = vmatmul.mubr.msk.bf16.gmra.mrb[8].mxu1 %vm800_vm4, %v717_v1  ;;  %v3212_v5 = vsel %vm517_vm10, 1.0, %v3699_v9 }
  0xb9   :  { %v3211_v6 = vsel %vm516_vm11, 1.0, %v3699_v9 }
  0xba   :  { %v702_v7 = vpack.c.bf16 %v3212_v5, %v3211_v6  ;;  %v449_v8 = vpop.permute.xlu1 %448 }
  0xbb   :  { %v446_v10 = vpop.permute.xlu0 %445  ;;  %vm549_vm12 = vcmp.eq.s32.totalorder %v4010_v4, %v449_v8 }
  0xbc   :  { %vm548_vm13 = vcmp.eq.s32.totalorder %v4010_v4, %v446_v10  ;;  %3343 = vmatprep.mubr.msk.bf16.mxu0 %vm800_vm4, %v702_v7  ;;  %v3244_v11 = vsel %vm549_vm12, 1.0, %v3699_v9 }
  0xbd   :  { %v3243_v12 = vsel %vm548_vm13, 1.0, %v3699_v9 }
  0xbe   :  { %v718_v13 = vpack.c.bf16 %v3244_v11, %v3243_v12  ;;  %v359_v14 = vpop.permute.xlu1 %358 }
  0xbf   :  { %v356_v15 = vpop.permute.xlu0 %355  ;;  %vm519_vm14 = vcmp.eq.s32.totalorder %v4010_v4, %v359_v14 }
  0xc0   :  { %vm518_vm15 = vcmp.eq.s32.totalorder %v4010_v4, %v356_v15  ;;  %3375 = vmatprep.mubr.msk.bf16.mxu1 %vm800_vm4, %v718_v13  ;;  %v3214_v16 = vsel %vm519_vm14, 1.0, %v3699_v9 }
  0xc1   :  { %v3213_v17 = vsel %vm518_vm15, 1.0, %v3699_v9 }
  0xc2   :  { %v703_v18 = vpack.c.bf16 %v3214_v16, %v3213_v17  ;;  %v455_v19 = vpop.permute.xlu1 %454 }
  0xc3   :  { %v452_v20 = vpop.permute.xlu0 %451  ;;  %vm551_vm0 = vcmp.eq.s32.totalorder %v4010_v4, %v455_v19 }
  0xc4   :  { %vm550_vm1 = vcmp.eq.s32.totalorder %v4010_v4, %v452_v20  ;;  %3344 = vmatmul.mubr.msk.bf16.gmra.mrb[12].mxu0 %vm800_vm4, %v703_v18  ;;  %v3246_v21 = vsel %vm551_vm0, 1.0, %v3699_v9 }
  0xc5   :  { %v3245_v22 = vsel %vm550_vm1, 1.0, %v3699_v9 }
  0xc6   :  { %v719_v23 = vpack.c.bf16 %v3246_v21, %v3245_v22  ;;  %v365_v24 = vpop.permute.xlu1 %364 }
  0xc7   :  { %v362_v25 = vpop.permute.xlu0 %361  ;;  %vm521_vm2 = vcmp.eq.s32.totalorder %v4010_v4, %v365_v24 }
  0xc8   :  { %vm520_vm3 = vcmp.eq.s32.totalorder %v4010_v4, %v362_v25  ;;  %3376 = vmatmul.mubr.msk.bf16.gmra.mrb[12].mxu1 %vm800_vm4, %v719_v23  ;;  %v3216_v26 = vsel %vm521_vm2, 1.0, %v3699_v9 }
  0xc9   :  { %v3215_v27 = vsel %vm520_vm3, 1.0, %v3699_v9 }
  0xca   :  { %v704_v28 = vpack.c.bf16 %v3216_v26, %v3215_v27  ;;  %v461_v29 = vpop.permute.xlu1 %460 }
  0xcb   :  { %v458_v30 = vpop.permute.xlu0 %457  ;;  %vm553_vm5 = vcmp.eq.s32.totalorder %v4010_v4, %v461_v29 }
  0xcc   :  { %vm552_vm6 = vcmp.eq.s32.totalorder %v4010_v4, %v458_v30  ;;  %3347 = vmatprep.mubr.msk.bf16.mxu0 %vm800_vm4, %v704_v28  ;;  %v3248_v31 = vsel %vm553_vm5, 1.0, %v3699_v9 }
  0xcd   :  { %v3247_v32 = vsel %vm552_vm6, 1.0, %v3699_v9 }
  0xce   :  { %v720_v33 = vpack.c.bf16 %v3248_v31, %v3247_v32  ;;  %v371_v34 = vpop.permute.xlu1 %370 }
  0xcf   :  { %v368_v35 = vpop.permute.xlu0 %367  ;;  %vm523_vm7 = vcmp.eq.s32.totalorder %v4010_v4, %v371_v34 }
  0xd0   :  { %vm522_vm8 = vcmp.eq.s32.totalorder %v4010_v4, %v368_v35  ;;  %3379 = vmatprep.mubr.msk.bf16.mxu1 %vm800_vm4, %v720_v33  ;;  %v3218_v36 = vsel %vm523_vm7, 1.0, %v3699_v9 }
  0xd1   :  { %v3217_v37 = vsel %vm522_vm8, 1.0, %v3699_v9 }
  0xd2   :  { %v705_v38 = vpack.c.bf16 %v3218_v36, %v3217_v37  ;;  %v467_v39 = vpop.permute.xlu1 %466 }
  0xd3   :  { %v464_v40 = vpop.permute.xlu0 %463  ;;  %vm555_vm9 = vcmp.eq.s32.totalorder %v4010_v4, %v467_v39 }
  0xd4   :  { %vm554_vm10 = vcmp.eq.s32.totalorder %v4010_v4, %v464_v40  ;;  %3348 = vmatmul.mubr.msk.bf16.gmra.mrb[16].mxu0 %vm800_vm4, %v705_v38  ;;  %v3250_v41 = vsel %vm555_vm9, 1.0, %v3699_v9 }
  0xd5   :  { %v3249_v42 = vsel %vm554_vm10, 1.0, %v3699_v9 }
  0xd6   :  { %v721_v43 = vpack.c.bf16 %v3250_v41, %v3249_v42  ;;  %v377_v44 = vpop.permute.xlu1 %376  ;;  %v730_v42 = vld [vmem:[#allocation4 + $0x10] sm:$0xff] }
  0xd7   :  { %v374_v45 = vpop.permute.xlu0 %373  ;;  %vm525_vm11 = vcmp.eq.s32.totalorder %v4010_v4, %v377_v44 }
  0xd8   :  { %vm524_vm12 = vcmp.eq.s32.totalorder %v4010_v4, %v374_v45  ;;  %3380 = vmatmul.mubr.msk.bf16.gmra.mrb[16].mxu1 %vm800_vm4, %v721_v43  ;;  %v3220_v46 = vsel %vm525_vm11, 1.0, %v3699_v9  ;;  %v728_v43 = vld [vmem:[#allocation4] sm:$0xff]  ;;  %v731_v45 = vld [vmem:[#allocation4 + $0x18] sm:$0xff] }
  0xd9   :  { %v3219_v47 = vsel %vm524_vm12, 1.0, %v3699_v9 }
  0xda   :  { %v706_v48 = vpack.c.bf16 %v3220_v46, %v3219_v47  ;;  %v473_v49 = vpop.permute.xlu1 %472 }
  0xdb   :  { %v470_v50 = vpop.permute.xlu0 %469  ;;  %vm557_vm13 = vcmp.eq.s32.totalorder %v4010_v4, %v473_v49 }
  0xdc   :  { %vm556_vm14 = vcmp.eq.s32.totalorder %v4010_v4, %v470_v50  ;;  %3351 = vmatprep.mubr.msk.bf16.mxu0 %vm800_vm4, %v706_v48  ;;  %v3252_v51 = vsel %vm557_vm13, 1.0, %v3699_v9  ;;  %v729_v48 = vld [vmem:[#allocation4 + $0x8] sm:$0xff] }
  0xdd   :  { %v3251_v52 = vsel %vm556_vm14, 1.0, %v3699_v9 }
  0xde   :  { %v722_v53 = vpack.c.bf16 %v3252_v51, %v3251_v52  ;;  %v383_v54 = vpop.permute.xlu1 %382  ;;  %v762_v51 = vld [vmem:[#allocation4 + $0x110] sm:$0xff] }
  0xdf   :  { %v380_v55 = vpop.permute.xlu0 %379  ;;  %vm527_vm15 = vcmp.eq.s32.totalorder %v4010_v4, %v383_v54 }
  0xe0   :  { %vm526_vm0 = vcmp.eq.s32.totalorder %v4010_v4, %v380_v55  ;;  %3383 = vmatprep.mubr.msk.bf16.mxu1 %vm800_vm4, %v722_v53  ;;  %v3222_v56 = vsel %vm527_vm15, 1.0, %v3699_v9  ;;  %v760_v53 = vld [vmem:[#allocation4 + $0x100] sm:$0xff]  ;;  %v763_v55 = vld [vmem:[#allocation4 + $0x118] sm:$0xff] }
  0xe1   :  { %v3221_v57 = vsel %vm526_vm0, 1.0, %v3699_v9 }
  0xe2   :  { %v707_v58 = vpack.c.bf16 %v3222_v56, %v3221_v57  ;;  %v479_v59 = vpop.permute.xlu1 %478 }
  0xe3   :  { %v476_v60 = vpop.permute.xlu0 %475  ;;  %vm559_vm1 = vcmp.eq.s32.totalorder %v4010_v4, %v479_v59 }
  0xe4   :  { %vm558_vm2 = vcmp.eq.s32.totalorder %v4010_v4, %v476_v60  ;;  %3352 = vmatmul.mubr.msk.bf16.gmra.mrb[20].mxu0 %vm800_vm4, %v707_v58  ;;  %v3254_v61 = vsel %vm559_vm1, 1.0, %v3699_v9  ;;  %v761_v58 = vld [vmem:[#allocation4 + $0x108] sm:$0xff] }
  0xe5   :  { %v3253_v62 = vsel %vm558_vm2, 1.0, %v3699_v9 }
  0xe6   :  { %v723_v63 = vpack.c.bf16 %v3254_v61, %v3253_v62  ;;  %v389_v0 = vpop.permute.xlu1 %388 }
  0xe7   :  { %v386_v1 = vpop.permute.xlu0 %385  ;;  %vm529_vm3 = vcmp.eq.s32.totalorder %v4010_v4, %v389_v0  ;;  %v734_v0 = vld [vmem:[#allocation4 + $0x30] sm:$0xff] }
  0xe8   :  { %vm528_vm5 = vcmp.eq.s32.totalorder %v4010_v4, %v386_v1  ;;  %3384 = vmatmul.mubr.msk.bf16.gmra.mrb[20].mxu1 %vm800_vm4, %v723_v63  ;;  %v3224_v2 = vsel %vm529_vm3, 1.0, %v3699_v9  ;;  %v732_v1 = vld [vmem:[#allocation4 + $0x20] sm:$0xff] }
  0xe9   :  { %v3223_v3 = vsel %vm528_vm5, 1.0, %v3699_v9 }
  0xea   :  { %v708_v5 = vpack.c.bf16 %v3224_v2, %v3223_v3  ;;  %v485_v6 = vpop.permute.xlu1 %484  ;;  %v735_v3 = vld [vmem:[#allocation4 + $0x38] sm:$0xff] }
  0xeb   :  { %v482_v7 = vpop.permute.xlu0 %481  ;;  %vm561_vm6 = vcmp.eq.s32.totalorder %v4010_v4, %v485_v6 }
  0xec   :  { %vm560_vm7 = vcmp.eq.s32.totalorder %v4010_v4, %v482_v7  ;;  %3355 = vmatprep.mubr.msk.bf16.mxu0 %vm800_vm4, %v708_v5  ;;  %v3256_v8 = vsel %vm561_vm6, 1.0, %v3699_v9  ;;  %v733_v7 = vld [vmem:[#allocation4 + $0x28] sm:$0xff] }
  0xed   :  { %v3255_v10 = vsel %vm560_vm7, 1.0, %v3699_v9 }
  0xee   :  { %v724_v11 = vpack.c.bf16 %v3256_v8, %v3255_v10  ;;  %v395_v12 = vpop.permute.xlu1 %394 }
  0xef   :  { %v392_v13 = vpop.permute.xlu0 %391  ;;  %vm531_vm8 = vcmp.eq.s32.totalorder %v4010_v4, %v395_v12 }
  0xf0   :  { %vm530_vm9 = vcmp.eq.s32.totalorder %v4010_v4, %v392_v13  ;;  %3387 = vmatprep.mubr.msk.bf16.mxu1 %vm800_vm4, %v724_v11  ;;  %v3226_v14 = vsel %vm531_vm8, 1.0, %v3699_v9  ;;  %v766_v11 = vld [vmem:[#allocation4 + $0x130] sm:$0xff] }
  0xf1   :  { %v3225_v15 = vsel %vm530_vm9, 1.0, %v3699_v9 }
  0xf2   :  { %v709_v16 = vpack.c.bf16 %v3226_v14, %v3225_v15  ;;  %v491_v17 = vpop.permute.xlu1 %490  ;;  %v764_v14 = vld [vmem:[#allocation4 + $0x120] sm:$0xff] }
  0xf3   :  { %v488_v18 = vpop.permute.xlu0 %487  ;;  %vm563_vm10 = vcmp.eq.s32.totalorder %v4010_v4, %v491_v17  ;;  %v767_v17 = vld [vmem:[#allocation4 + $0x138] sm:$0xff] }
  0xf4   :  { %vm562_vm11 = vcmp.eq.s32.totalorder %v4010_v4, %v488_v18  ;;  %3356 = vmatmul.mubr.msk.bf16.gmra.mrb[24].mxu0 %vm800_vm4, %v709_v16  ;;  %v3258_v19 = vsel %vm563_vm10, 1.0, %v3699_v9 }
  0xf5   :  { %v3257_v20 = vsel %vm562_vm11, 1.0, %v3699_v9 }
  0xf6   :  { %v725_v21 = vpack.c.bf16 %v3258_v19, %v3257_v20  ;;  %v401_v22 = vpop.permute.xlu1 %400  ;;  %v765_v20 = vld [vmem:[#allocation4 + $0x128] sm:$0xff] }
  0xf7   :  { %v398_v23 = vpop.permute.xlu0 %397  ;;  %vm533_vm12 = vcmp.eq.s32.totalorder %v4010_v4, %v401_v22 }
  0xf8   :  { %vm532_vm13 = vcmp.eq.s32.totalorder %v4010_v4, %v398_v23  ;;  %3388 = vmatmul.mubr.msk.bf16.gmra.mrb[24].mxu1 %vm800_vm4, %v725_v21  ;;  %v3228_v24 = vsel %vm533_vm12, 1.0, %v3699_v9 }
  0xf9   :  { %v3227_v25 = vsel %vm532_vm13, 1.0, %v3699_v9 }
  0xfa   :  { %v710_v26 = vpack.c.bf16 %v3228_v24, %v3227_v25  ;;  %v497_v27 = vpop.permute.xlu1 %496 }
  0xfb   :  { %v494_v28 = vpop.permute.xlu0 %493  ;;  %vm565_vm14 = vcmp.eq.s32.totalorder %v4010_v4, %v497_v27  ;;  %v736_v27 = vld [vmem:[#allocation4 + $0x40] sm:$0xff] }
  0xfc   :  { %vm564_vm15 = vcmp.eq.s32.totalorder %v4010_v4, %v494_v28  ;;  %3359 = vmatprep.mubr.msk.bf16.mxu0 %vm800_vm4, %v710_v26  ;;  %v3260_v29 = vsel %vm565_vm14, 1.0, %v3699_v9  ;;  %v738_v26 = vld [vmem:[#allocation4 + $0x50] sm:$0xff] }
  0xfd   :  { %v3259_v30 = vsel %vm564_vm15, 1.0, %v3699_v9 }
  0xfe   :  { %v726_v31 = vpack.c.bf16 %v3260_v29, %v3259_v30  ;;  %v407_v32 = vpop.permute.xlu1 %406  ;;  %v739_v29 = vld [vmem:[#allocation4 + $0x58] sm:$0xff] }
  0xff   :  { %v404_v33 = vpop.permute.xlu0 %403  ;;  %vm535_vm0 = vcmp.eq.s32.totalorder %v4010_v4, %v407_v32  ;;  %v737_v32 = vld [vmem:[#allocation4 + $0x48] sm:$0xff] }
 0x100   :  { %vm534_vm1 = vcmp.eq.s32.totalorder %v4010_v4, %v404_v33  ;;  %3391 = vmatprep.mubr.msk.bf16.mxu1 %vm800_vm4, %v726_v31  ;;  %v3230_v34 = vsel %vm535_vm0, 1.0, %v3699_v9 }
 0x101   :  { %v3229_v35 = vsel %vm534_vm1, 1.0, %v3699_v9 }
 0x102   :  { %v711_v36 = vpack.c.bf16 %v3230_v34, %v3229_v35  ;;  %v503_v37 = vpop.permute.xlu1 %502  ;;  %v770_v35 = vld [vmem:[#allocation4 + $0x150] sm:$0xff] }
 0x103   :  { %v500_v38 = vpop.permute.xlu0 %499  ;;  %vm567_vm2 = vcmp.eq.s32.totalorder %v4010_v4, %v503_v37 }
 0x104   :  { %vm566_vm3 = vcmp.eq.s32.totalorder %v4010_v4, %v500_v38  ;;  %3360 = vmatmul.mubr.msk.bf16.gmra.mrb[28].mxu0 %vm800_vm4, %v711_v36  ;;  %v3262_v39 = vsel %vm567_vm2, 1.0, %v3699_v9  ;;  %v768_v38 = vld [vmem:[#allocation4 + $0x140] sm:$0xff] }
 0x105   :  { %v3261_v40 = vsel %vm566_vm3, 1.0, %v3699_v9 }
 0x106   :  { %v727_v41 = vpack.c.bf16 %v3262_v39, %v3261_v40 }
 0x108   :  { %3392 = vmatmul.mubr.msk.bf16.gmra.mrb[28].mxu1 %vm800_vm4, %v727_v41  ;;  %v771_v41 = vld [vmem:[#allocation4 + $0x158] sm:$0xff] }
 0x167   :  { %v3333_v44 = vpop.f32.mrb[0].mxu0 }
 0x168   :  { %v1188_v46 = vadd.f32 %v3333_v44, %v730_v42  ;;  %v931_v47 = vpop.f32.mrb[1].mxu0  ;;  %v769_v44 = vld [vmem:[#allocation4 + $0x148] sm:$0xff] }
 0x169   :  { %v1186_v49 = vadd.f32 %v931_v47, %v728_v43  ;;  %v3334_v50 = vpop.f32.mrb[2].mxu0 }
 0x16a   :  { %1252 = vst [vmem:[#allocation4 + $0x10] sm:$0xff] %v1188_v46  ;;  %v1189_v4 = vadd.f32 %v3334_v50, %v731_v45  ;;  %v934_v52 = vpop.f32.mrb[3].mxu0  ;;  %v742_v50 = vld [vmem:[#allocation4 + $0x70] sm:$0xff] }
 0x16b   :  { %1250 = vst [vmem:[#allocation4] sm:$0xff] %v1186_v49  ;;  %v1187_v54 = vadd.f32 %v934_v52, %v729_v48  ;;  %v3365_v9 = vpop.f32.mrb[0].mxu1  ;;  %v743_v52 = vld [vmem:[#allocation4 + $0x78] sm:$0xff] }
 0x16c   :  { %1253 = vst [vmem:[#allocation4 + $0x18] sm:$0xff] %v1189_v4  ;;  %v1220_v56 = vadd.f32 %v3365_v9, %v762_v51  ;;  %v1059_v57 = vpop.f32.mrb[1].mxu1  ;;  %v740_v51 = vld [vmem:[#allocation4 + $0x60] sm:$0xff]  ;;  %v741_v9 = vld [vmem:[#allocation4 + $0x68] sm:$0xff] }
 0x16d   :  { %1251 = vst [vmem:[#allocation4 + $0x8] sm:$0xff] %v1187_v54  ;;  %v1218_v59 = vadd.f32 %v1059_v57, %v760_v53  ;;  %v3366_v60 = vpop.f32.mrb[2].mxu1  ;;  %v774_v57 = vld [vmem:[#allocation4 + $0x170] sm:$0xff] }
 0x16e   :  { %1284 = vst [vmem:[#allocation4 + $0x110] sm:$0xff] %v1220_v56  ;;  %v1221_v61 = vadd.f32 %v3366_v60, %v763_v55  ;;  %v1062_v62 = vpop.f32.mrb[3].mxu1  ;;  %v772_v60 = vld [vmem:[#allocation4 + $0x160] sm:$0xff] }
 0x16f   :  { %1282 = vst [vmem:[#allocation4 + $0x100] sm:$0xff] %v1218_v59  ;;  %v1219_v63 = vadd.f32 %v1062_v62, %v761_v58 }
 0x170   :  { %1285 = vst [vmem:[#allocation4 + $0x118] sm:$0xff] %v1221_v61 }
 0x171   :  { %1283 = vst [vmem:[#allocation4 + $0x108] sm:$0xff] %v1219_v63  ;;  %v775_v63 = vld [vmem:[#allocation4 + $0x178] sm:$0xff] }
 0x177   :  { %v3337_v2 = vpop.f32.mrb[4].mxu0 }
 0x178   :  { %v1192_v5 = vadd.f32 %v3337_v2, %v734_v0  ;;  %v947_v6 = vpop.f32.mrb[5].mxu0  ;;  %v773_v2 = vld [vmem:[#allocation4 + $0x168] sm:$0xff] }
 0x179   :  { %v1190_v8 = vadd.f32 %v947_v6, %v732_v1  ;;  %v3338_v10 = vpop.f32.mrb[6].mxu0 }
 0x17a   :  { %1256 = vst [vmem:[#allocation4 + $0x30] sm:$0xff] %v1192_v5  ;;  %v1193_v12 = vadd.f32 %v3338_v10, %v735_v3  ;;  %v950_v13 = vpop.f32.mrb[7].mxu0  ;;  %v746_v10 = vld [vmem:[#allocation4 + $0x90] sm:$0xff] }
 0x17b   :  { %1254 = vst [vmem:[#allocation4 + $0x20] sm:$0xff] %v1190_v8  ;;  %v1191_v15 = vadd.f32 %v950_v13, %v733_v7  ;;  %v3369_v16 = vpop.f32.mrb[4].mxu1  ;;  %v747_v13 = vld [vmem:[#allocation4 + $0x98] sm:$0xff] }
 0x17c   :  { %1257 = vst [vmem:[#allocation4 + $0x38] sm:$0xff] %v1193_v12  ;;  %v1224_v18 = vadd.f32 %v3369_v16, %v766_v11  ;;  %v1075_v19 = vpop.f32.mrb[5].mxu1  ;;  %v744_v11 = vld [vmem:[#allocation4 + $0x80] sm:$0xff]  ;;  %v745_v16 = vld [vmem:[#allocation4 + $0x88] sm:$0xff] }
 0x17d   :  { %1255 = vst [vmem:[#allocation4 + $0x28] sm:$0xff] %v1191_v15  ;;  %v1222_v21 = vadd.f32 %v1075_v19, %v764_v14  ;;  %v3370_v22 = vpop.f32.mrb[6].mxu1  ;;  %v778_v19 = vld [vmem:[#allocation4 + $0x190] sm:$0xff] }
 0x17e   :  { %1288 = vst [vmem:[#allocation4 + $0x130] sm:$0xff] %v1224_v18  ;;  %v1225_v23 = vadd.f32 %v3370_v22, %v767_v17  ;;  %v1078_v24 = vpop.f32.mrb[7].mxu1  ;;  %v776_v22 = vld [vmem:[#allocation4 + $0x180] sm:$0xff] }
 0x17f   :  { %1286 = vst [vmem:[#allocation4 + $0x120] sm:$0xff] %v1222_v21  ;;  %v1223_v25 = vadd.f32 %v1078_v24, %v765_v20 }
 0x180   :  { %1289 = vst [vmem:[#allocation4 + $0x138] sm:$0xff] %v1225_v23 }
 0x181   :  { %1287 = vst [vmem:[#allocation4 + $0x128] sm:$0xff] %v1223_v25  ;;  %v779_v25 = vld [vmem:[#allocation4 + $0x198] sm:$0xff] }
 0x187   :  { %v3341_v28 = vpop.f32.mrb[8].mxu0 }
 0x188   :  { %v1196_v30 = vadd.f32 %v3341_v28, %v738_v26  ;;  %v963_v31 = vpop.f32.mrb[9].mxu0  ;;  %v777_v28 = vld [vmem:[#allocation4 + $0x188] sm:$0xff] }
 0x189   :  { %v1194_v33 = vadd.f32 %v963_v31, %v736_v27  ;;  %v3342_v34 = vpop.f32.mrb[10].mxu0 }
 0x18a   :  { %1260 = vst [vmem:[#allocation4 + $0x50] sm:$0xff] %v1196_v30  ;;  %v1197_v36 = vadd.f32 %v3342_v34, %v739_v29  ;;  %v966_v37 = vpop.f32.mrb[11].mxu0  ;;  %v750_v34 = vld [vmem:[#allocation4 + $0xb0] sm:$0xff] }
 0x18b   :  { %1258 = vst [vmem:[#allocation4 + $0x40] sm:$0xff] %v1194_v33  ;;  %v1195_v39 = vadd.f32 %v966_v37, %v737_v32  ;;  %v3373_v40 = vpop.f32.mrb[8].mxu1  ;;  %v751_v37 = vld [vmem:[#allocation4 + $0xb8] sm:$0xff] }
 0x18c   :  { %1261 = vst [vmem:[#allocation4 + $0x58] sm:$0xff] %v1197_v36  ;;  %v1228_v42 = vadd.f32 %v3373_v40, %v770_v35  ;;  %v1091_v43 = vpop.f32.mrb[9].mxu1  ;;  %v748_v35 = vld [vmem:[#allocation4 + $0xa0] sm:$0xff]  ;;  %v749_v40 = vld [vmem:[#allocation4 + $0xa8] sm:$0xff] }
 0x18d   :  { %1259 = vst [vmem:[#allocation4 + $0x48] sm:$0xff] %v1195_v39  ;;  %v1226_v45 = vadd.f32 %v1091_v43, %v768_v38  ;;  %v3374_v46 = vpop.f32.mrb[10].mxu1  ;;  %v782_v43 = vld [vmem:[#allocation4 + $0x1b0] sm:$0xff] }
 0x18e   :  { %1292 = vst [vmem:[#allocation4 + $0x150] sm:$0xff] %v1228_v42  ;;  %v1229_v47 = vadd.f32 %v3374_v46, %v771_v41  ;;  %v1094_v48 = vpop.f32.mrb[11].mxu1  ;;  %v780_v46 = vld [vmem:[#allocation4 + $0x1a0] sm:$0xff] }
 0x18f   :  { %1290 = vst [vmem:[#allocation4 + $0x140] sm:$0xff] %v1226_v45  ;;  %v1227_v49 = vadd.f32 %v1094_v48, %v769_v44 }
 0x190   :  { %1293 = vst [vmem:[#allocation4 + $0x158] sm:$0xff] %v1229_v47 }
 0x191   :  { %1291 = vst [vmem:[#allocation4 + $0x148] sm:$0xff] %v1227_v49  ;;  %v783_v49 = vld [vmem:[#allocation4 + $0x1b8] sm:$0xff] }
 0x197   :  { %v3345_v4 = vpop.f32.mrb[12].mxu0 }
 0x198   :  { %v1200_v53 = vadd.f32 %v3345_v4, %v742_v50  ;;  %v979_v54 = vpop.f32.mrb[13].mxu0  ;;  %v781_v4 = vld [vmem:[#allocation4 + $0x1a8] sm:$0xff] }
 0x199   :  { %v1198_v55 = vadd.f32 %v979_v54, %v740_v51  ;;  %v3346_v56 = vpop.f32.mrb[14].mxu0 }
 0x19a   :  { %1264 = vst [vmem:[#allocation4 + $0x70] sm:$0xff] %v1200_v53  ;;  %v1201_v58 = vadd.f32 %v3346_v56, %v743_v52  ;;  %v982_v59 = vpop.f32.mrb[15].mxu0  ;;  %v754_v56 = vld [vmem:[#allocation4 + $0xd0] sm:$0xff] }
 0x19b   :  { %1262 = vst [vmem:[#allocation4 + $0x60] sm:$0xff] %v1198_v55  ;;  %v1199_v61 = vadd.f32 %v982_v59, %v741_v9  ;;  %v3377_v62 = vpop.f32.mrb[12].mxu1  ;;  %v755_v59 = vld [vmem:[#allocation4 + $0xd8] sm:$0xff] }
 0x19c   :  { %1265 = vst [vmem:[#allocation4 + $0x78] sm:$0xff] %v1201_v58  ;;  %v1232_v0 = vadd.f32 %v3377_v62, %v774_v57  ;;  %v1107_v1 = vpop.f32.mrb[13].mxu1  ;;  %v752_v57 = vld [vmem:[#allocation4 + $0xc0] sm:$0xff]  ;;  %v753_v62 = vld [vmem:[#allocation4 + $0xc8] sm:$0xff] }
 0x19d   :  { %1263 = vst [vmem:[#allocation4 + $0x68] sm:$0xff] %v1199_v61  ;;  %v1230_v3 = vadd.f32 %v1107_v1, %v772_v60  ;;  %v3378_v5 = vpop.f32.mrb[14].mxu1  ;;  %v786_v1 = vld [vmem:[#allocation4 + $0x1d0] sm:$0xff] }
 0x19e   :  { %1296 = vst [vmem:[#allocation4 + $0x170] sm:$0xff] %v1232_v0  ;;  %v1233_v6 = vadd.f32 %v3378_v5, %v775_v63  ;;  %v1110_v7 = vpop.f32.mrb[15].mxu1  ;;  %v784_v5 = vld [vmem:[#allocation4 + $0x1c0] sm:$0xff] }
 0x19f   :  { %1294 = vst [vmem:[#allocation4 + $0x160] sm:$0xff] %v1230_v3  ;;  %v1231_v8 = vadd.f32 %v1110_v7, %v773_v2 }
 0x1a0   :  { %1297 = vst [vmem:[#allocation4 + $0x178] sm:$0xff] %v1233_v6 }
 0x1a1   :  { %1295 = vst [vmem:[#allocation4 + $0x168] sm:$0xff] %v1231_v8  ;;  %v787_v8 = vld [vmem:[#allocation4 + $0x1d8] sm:$0xff] }
 0x1a7   :  { %v3349_v12 = vpop.f32.mrb[16].mxu0 }
 0x1a8   :  { %v1204_v14 = vadd.f32 %v3349_v12, %v746_v10  ;;  %v995_v15 = vpop.f32.mrb[17].mxu0  ;;  %v785_v12 = vld [vmem:[#allocation4 + $0x1c8] sm:$0xff] }
 0x1a9   :  { %v1202_v17 = vadd.f32 %v995_v15, %v744_v11  ;;  %v3350_v18 = vpop.f32.mrb[18].mxu0 }
 0x1aa   :  { %1268 = vst [vmem:[#allocation4 + $0x90] sm:$0xff] %v1204_v14  ;;  %v1205_v20 = vadd.f32 %v3350_v18, %v747_v13  ;;  %v998_v21 = vpop.f32.mrb[19].mxu0  ;;  %v758_v18 = vld [vmem:[#allocation4 + $0xf0] sm:$0xff] }
 0x1ab   :  { %1266 = vst [vmem:[#allocation4 + $0x80] sm:$0xff] %v1202_v17  ;;  %v1203_v23 = vadd.f32 %v998_v21, %v745_v16  ;;  %v3381_v24 = vpop.f32.mrb[16].mxu1  ;;  %v759_v21 = vld [vmem:[#allocation4 + $0xf8] sm:$0xff] }
 0x1ac   :  { %1269 = vst [vmem:[#allocation4 + $0x98] sm:$0xff] %v1205_v20  ;;  %v1236_v26 = vadd.f32 %v3381_v24, %v778_v19  ;;  %v1123_v27 = vpop.f32.mrb[17].mxu1  ;;  %v756_v19 = vld [vmem:[#allocation4 + $0xe0] sm:$0xff]  ;;  %v757_v24 = vld [vmem:[#allocation4 + $0xe8] sm:$0xff] }
 0x1ad   :  { %1267 = vst [vmem:[#allocation4 + $0x88] sm:$0xff] %v1203_v23  ;;  %v1234_v29 = vadd.f32 %v1123_v27, %v776_v22  ;;  %v3382_v30 = vpop.f32.mrb[18].mxu1  ;;  %v790_v27 = vld [vmem:[#allocation4 + $0x1f0] sm:$0xff] }
 0x1ae   :  { %1300 = vst [vmem:[#allocation4 + $0x190] sm:$0xff] %v1236_v26  ;;  %v1237_v31 = vadd.f32 %v3382_v30, %v779_v25  ;;  %v1126_v32 = vpop.f32.mrb[19].mxu1  ;;  %v788_v30 = vld [vmem:[#allocation4 + $0x1e0] sm:$0xff] }
 0x1af   :  { %1298 = vst [vmem:[#allocation4 + $0x180] sm:$0xff] %v1234_v29  ;;  %v1235_v33 = vadd.f32 %v1126_v32, %v777_v28 }
 0x1b0   :  { %1301 = vst [vmem:[#allocation4 + $0x198] sm:$0xff] %v1237_v31 }
 0x1b1   :  { %1299 = vst [vmem:[#allocation4 + $0x188] sm:$0xff] %v1235_v33  ;;  %v791_v33 = vld [vmem:[#allocation4 + $0x1f8] sm:$0xff] }
 0x1b7   :  { %v3353_v36 = vpop.f32.mrb[20].mxu0 }
 0x1b8   :  { %v1208_v38 = vadd.f32 %v3353_v36, %v750_v34  ;;  %v1011_v39 = vpop.f32.mrb[21].mxu0  ;;  %v789_v36 = vld [vmem:[#allocation4 + $0x1e8] sm:$0xff] }
 0x1b9   :  { %v1206_v41 = vadd.f32 %v1011_v39, %v748_v35  ;;  %v3354_v42 = vpop.f32.mrb[22].mxu0 }
 0x1ba   :  { %1272 = vst [vmem:[#allocation4 + $0xb0] sm:$0xff] %v1208_v38  ;;  %v1209_v44 = vadd.f32 %v3354_v42, %v751_v37  ;;  %v1014_v45 = vpop.f32.mrb[23].mxu0 }
 0x1bb   :  { %1270 = vst [vmem:[#allocation4 + $0xa0] sm:$0xff] %v1206_v41  ;;  %v1207_v47 = vadd.f32 %v1014_v45, %v749_v40  ;;  %v3385_v48 = vpop.f32.mrb[20].mxu1 }
 0x1bc   :  { %1273 = vst [vmem:[#allocation4 + $0xb8] sm:$0xff] %v1209_v44  ;;  %v1240_v50 = vadd.f32 %v3385_v48, %v782_v43  ;;  %v1139_v51 = vpop.f32.mrb[21].mxu1 }
 0x1bd   :  { %1271 = vst [vmem:[#allocation4 + $0xa8] sm:$0xff] %v1207_v47  ;;  %v1238_v52 = vadd.f32 %v1139_v51, %v780_v46  ;;  %v3386_v53 = vpop.f32.mrb[22].mxu1 }
 0x1be   :  { %1304 = vst [vmem:[#allocation4 + $0x1b0] sm:$0xff] %v1240_v50  ;;  %v1241_v54 = vadd.f32 %v3386_v53, %v783_v49  ;;  %v1142_v9 = vpop.f32.mrb[23].mxu1 }
 0x1bf   :  { %1302 = vst [vmem:[#allocation4 + $0x1a0] sm:$0xff] %v1238_v52  ;;  %v1239_v55 = vadd.f32 %v1142_v9, %v781_v4 }
 0x1c0   :  { %1305 = vst [vmem:[#allocation4 + $0x1b8] sm:$0xff] %v1241_v54 }
 0x1c1   :  { %1303 = vst [vmem:[#allocation4 + $0x1a8] sm:$0xff] %v1239_v55 }
 0x1c7   :  { %v3357_v58 = vpop.f32.mrb[24].mxu0 }
 0x1c8   :  { %v1212_v60 = vadd.f32 %v3357_v58, %v754_v56  ;;  %v1027_v61 = vpop.f32.mrb[25].mxu0 }
 0x1c9   :  { %v1210_v63 = vadd.f32 %v1027_v61, %v752_v57  ;;  %v3358_v0 = vpop.f32.mrb[26].mxu0 }
 0x1ca   :  { %1276 = vst [vmem:[#allocation4 + $0xd0] sm:$0xff] %v1212_v60  ;;  %v1213_v2 = vadd.f32 %v3358_v0, %v755_v59  ;;  %v1030_v3 = vpop.f32.mrb[27].mxu0 }
 0x1cb   :  { %1274 = vst [vmem:[#allocation4 + $0xc0] sm:$0xff] %v1210_v63  ;;  %v1211_v6 = vadd.f32 %v1030_v3, %v753_v62  ;;  %v3389_v7 = vpop.f32.mrb[24].mxu1 }
 0x1cc   :  { %1277 = vst [vmem:[#allocation4 + $0xd8] sm:$0xff] %v1213_v2  ;;  %v1244_v10 = vadd.f32 %v3389_v7, %v786_v1  ;;  %v1155_v11 = vpop.f32.mrb[25].mxu1 }
 0x1cd   :  { %1275 = vst [vmem:[#allocation4 + $0xc8] sm:$0xff] %v1211_v6  ;;  %v1242_v13 = vadd.f32 %v1155_v11, %v784_v5  ;;  %v3390_v14 = vpop.f32.mrb[26].mxu1 }
 0x1ce   :  { %1308 = vst [vmem:[#allocation4 + $0x1d0] sm:$0xff] %v1244_v10  ;;  %v1245_v15 = vadd.f32 %v3390_v14, %v787_v8  ;;  %v1158_v16 = vpop.f32.mrb[27].mxu1 }
 0x1cf   :  { %1306 = vst [vmem:[#allocation4 + $0x1c0] sm:$0xff] %v1242_v13  ;;  %v1243_v17 = vadd.f32 %v1158_v16, %v785_v12 }
 0x1d0   :  { %1309 = vst [vmem:[#allocation4 + $0x1d8] sm:$0xff] %v1245_v15 }
 0x1d1   :  { %1307 = vst [vmem:[#allocation4 + $0x1c8] sm:$0xff] %v1243_v17 }
 0x1d7   :  { %v3361_v20 = vpop.f32.mrb[28].mxu0 }
 0x1d8   :  { %v1216_v22 = vadd.f32 %v3361_v20, %v758_v18  ;;  %v1043_v23 = vpop.f32.mrb[29].mxu0 }
 0x1d9   :  { %v1214_v25 = vadd.f32 %v1043_v23, %v756_v19  ;;  %v3362_v26 = vpop.f32.mrb[30].mxu0 }
 0x1da   :  { %1280 = vst [vmem:[#allocation4 + $0xf0] sm:$0xff] %v1216_v22  ;;  %v1217_v28 = vadd.f32 %v3362_v26, %v759_v21  ;;  %v1046_v29 = vpop.f32.mrb[31].mxu0 }
 0x1db   :  { %1278 = vst [vmem:[#allocation4 + $0xe0] sm:$0xff] %v1214_v25  ;;  %v1215_v31 = vadd.f32 %v1046_v29, %v757_v24  ;;  %v3393_v32 = vpop.f32.mrb[28].mxu1 }
 0x1dc   :  { %1281 = vst [vmem:[#allocation4 + $0xf8] sm:$0xff] %v1217_v28  ;;  %v1248_v34 = vadd.f32 %v3393_v32, %v790_v27  ;;  %v1171_v35 = vpop.f32.mrb[29].mxu1 }
 0x1dd   :  { %1279 = vst [vmem:[#allocation4 + $0xe8] sm:$0xff] %v1215_v31  ;;  %v1246_v37 = vadd.f32 %v1171_v35, %v788_v30  ;;  %v3394_v38 = vpop.f32.mrb[30].mxu1 }
 0x1de   :  { %1312 = vst [vmem:[#allocation4 + $0x1f0] sm:$0xff] %v1248_v34  ;;  %v1249_v39 = vadd.f32 %v3394_v38, %v791_v33  ;;  %v1174_v40 = vpop.f32.mrb[31].mxu1 }
 0x1df   :  { %1310 = vst [vmem:[#allocation4 + $0x1e0] sm:$0xff] %v1246_v37  ;;  %v1247_v41 = vadd.f32 %v1174_v40, %v789_v36 }
 0x1e0   :  { %1313 = vst [vmem:[#allocation4 + $0x1f8] sm:$0xff] %v1249_v39 }
 0x1e1   :  { %1311 = vst [vmem:[#allocation4 + $0x1e8] sm:$0xff] %v1247_v41 }
 0x1e2 PF:  { %v4175_v42 = vld [vmem:[%s5657_s1 + $0x10] sm:$0xff]  ;;  %v4180_v43 = vld [vmem:[%s5657_s1] sm:$0xff]  ;;  %v3700_v44 = vmov 1   ;;  %v4187_v45 = vld [vmem:[%s5657_s1 + $0x18] sm:$0xff]  ;;  %s3703_s21 = smov 96   ;;  %s3704_s5 = smov 64  }
 0x1e3   :  { %3540 = vset.pattern.permute.xlu1 %v3700_v44  ;;  %3539 = vset.pattern.permute.xlu0 %v3700_v44  ;;  %v4192_v46 = vld [vmem:[%s5657_s1 + $0x8] sm:$0xff]  ;;  %v4204_v48 = vld [vmem:[%s5657_s1 + $0x20] sm:$0xff]  ;;  %v4211_v49 = vld [vmem:[%s5657_s1 + $0x38] sm:$0xff]  ;;  %vm3109_vm4 = vcmask 261120  }
 0x1e4   :  { %1457 = vperm.xlu1 %3540, %v4175_v42   ;;  %1447 = vperm.xlu0 %3539, %v4180_v43   ;;  %v4199_v47 = vld [vmem:[%s5657_s1 + $0x28] sm:$0xff]  ;;  %v4216_v50 = vld [vmem:[%s5657_s1 + $0x30] sm:$0xff]  ;;  %v4228_v4 = vld [vmem:[%s5657_s1 + $0x40] sm:$0xff] }
 0x1e5   :  { %v4223_v51 = vld [vmem:[%s5657_s1 + $0x48] sm:$0xff]  ;;  %v4235_v52 = vld [vmem:[%s5657_s1 + $0x58] sm:$0xff]  ;;  %v4240_v53 = vld [vmem:[%s5657_s1 + $0x50] sm:$0xff] }
 0x1e6   :  { %v4247_v54 = vld [vmem:[%s5657_s1 + $0x68] sm:$0xff]  ;;  %v4252_v9 = vld [vmem:[%s5657_s1 + $0x60] sm:$0xff]  ;;  %v4259_v55 = vld [vmem:[%s5657_s1 + $0x78] sm:$0xff] }
 0x1e7   :  { %v4264_v56 = vld [vmem:[%s5657_s1 + $0x70] sm:$0xff]  ;;  %v4271_v57 = vld [vmem:[%s5657_s1 + $0x88] sm:$0xff]  ;;  %v4276_v58 = vld [vmem:[%s5657_s1 + $0x80] sm:$0xff] }
 0x1e8   :  { %1462 = vperm.xlu1 %3540, %v4187_v45   ;;  %1452 = vperm.xlu0 %3539, %v4192_v46   ;;  %v4283_v59 = vld [vmem:[%s5657_s1 + $0x98] sm:$0xff]  ;;  %v4288_v60 = vld [vmem:[%s5657_s1 + $0x90] sm:$0xff]  ;;  %v4295_v61 = vld [vmem:[%s5657_s1 + $0xa8] sm:$0xff] }
 0x1e9   :  { %v4300_v62 = vld [vmem:[%s5657_s1 + $0xa0] sm:$0xff]  ;;  %v4307_v63 = vld [vmem:[%s5657_s1 + $0xb8] sm:$0xff]  ;;  %v4312_v0 = vld [vmem:[%s5657_s1 + $0xb0] sm:$0xff] }
 0x1ea   :  { %v4319_v1 = vld [vmem:[%s5657_s1 + $0xc8] sm:$0xff]  ;;  %v4324_v2 = vld [vmem:[%s5657_s1 + $0xc0] sm:$0xff]  ;;  %v4331_v3 = vld [vmem:[%s5657_s1 + $0xd8] sm:$0xff] }
 0x1eb   :  { %v4336_v5 = vld [vmem:[%s5657_s1 + $0xd0] sm:$0xff]  ;;  %v4343_v6 = vld [vmem:[%s5657_s1 + $0xe8] sm:$0xff]  ;;  %v4348_v7 = vld [vmem:[%s5657_s1 + $0xe0] sm:$0xff] }
 0x1ec   :  { %1472 = vperm.xlu1 %3540, %v4199_v47   ;;  %1467 = vperm.xlu0 %3539, %v4204_v48   ;;  %v4355_v8 = vld [vmem:[%s5657_s1 + $0xf8] sm:$0xff]  ;;  %v4360_v10 = vld [vmem:[%s5657_s1 + $0xf0] sm:$0xff]  ;;  %v4367_v11 = vld [vmem:[%s5657_s1 + $0x108] sm:$0xff] }
 0x1ed   :  { %v4372_v12 = vld [vmem:[%s5657_s1 + $0x100] sm:$0xff]  ;;  %v4379_v13 = vld [vmem:[%s5657_s1 + $0x118] sm:$0xff]  ;;  %v4384_v14 = vld [vmem:[%s5657_s1 + $0x110] sm:$0xff] }
 0x1ee   :  { %v4391_v15 = vld [vmem:[%s5657_s1 + $0x128] sm:$0xff]  ;;  %v4396_v16 = vld [vmem:[%s5657_s1 + $0x120] sm:$0xff]  ;;  %v4403_v17 = vld [vmem:[%s5657_s1 + $0x138] sm:$0xff] }
 0x1ef   :  { %v4408_v18 = vld [vmem:[%s5657_s1 + $0x130] sm:$0xff]  ;;  %v4415_v19 = vld [vmem:[%s5657_s1 + $0x148] sm:$0xff]  ;;  %v4420_v20 = vld [vmem:[%s5657_s1 + $0x140] sm:$0xff] }
 0x1f0   :  { %1482 = vperm.xlu1 %3540, %v4211_v49   ;;  %1477 = vperm.xlu0 %3539, %v4216_v50   ;;  %v4427_v21 = vld [vmem:[%s5657_s1 + $0x158] sm:$0xff]  ;;  %v4432_v22 = vld [vmem:[%s5657_s1 + $0x150] sm:$0xff]  ;;  %v4439_v23 = vld [vmem:[%s5657_s1 + $0x168] sm:$0xff] }
 0x1f1   :  { %v4444_v24 = vld [vmem:[%s5657_s1 + $0x160] sm:$0xff]  ;;  %v4451_v25 = vld [vmem:[%s5657_s1 + $0x178] sm:$0xff]  ;;  %v4456_v26 = vld [vmem:[%s5657_s1 + $0x170] sm:$0xff] }
 0x1f2   :  { %v4463_v27 = vld [vmem:[%s5657_s1 + $0x188] sm:$0xff]  ;;  %v4468_v28 = vld [vmem:[%s5657_s1 + $0x180] sm:$0xff]  ;;  %v4475_v29 = vld [vmem:[%s5657_s1 + $0x198] sm:$0xff] }
 0x1f3   :  { %v4480_v30 = vld [vmem:[%s5657_s1 + $0x190] sm:$0xff]  ;;  %v4487_v31 = vld [vmem:[%s5657_s1 + $0x1a8] sm:$0xff]  ;;  %v4492_v32 = vld [vmem:[%s5657_s1 + $0x1a0] sm:$0xff] }
 0x1f4   :  { %1492 = vperm.xlu1 %3540, %v4223_v51   ;;  %1487 = vperm.xlu0 %3539, %v4228_v4   ;;  %v4499_v33 = vld [vmem:[%s5657_s1 + $0x1b8] sm:$0xff]  ;;  %v4504_v34 = vld [vmem:[%s5657_s1 + $0x1b0] sm:$0xff]  ;;  %v4511_v35 = vld [vmem:[%s5657_s1 + $0x1c8] sm:$0xff] }
 0x1f5   :  { %5677 = vst [vmem:[#allocation7_spill] sm:$0xff] %v4511_v35  ;;  %v4516_v36 = vld [vmem:[%s5657_s1 + $0x1c0] sm:$0xff]  ;;  %v4523_v37 = vld [vmem:[%s5657_s1 + $0x1d8] sm:$0xff]  ;;  %v4528_v38 = vld [vmem:[%s5657_s1 + $0x1d0] sm:$0xff] }
 0x1f6   :  { %5678 = vst [vmem:[#allocation8_spill] sm:$0xff] %v4523_v37  ;;  %5679 = vst [vmem:[#allocation9_spill] sm:$0xff] %v4528_v38  ;;  %v4535_v39 = vld [vmem:[%s5657_s1 + $0x1e8] sm:$0xff]  ;;  %v4540_v40 = vld [vmem:[%s5657_s1 + $0x1e0] sm:$0xff] }
 0x1f7   :  { %5680 = vst [vmem:[#allocation10_spill] sm:$0xff] %v4535_v39  ;;  %5681 = vst [vmem:[#allocation11_spill] sm:$0xff] %v4540_v40  ;;  %v4547_v41 = vld [vmem:[%s5657_s1 + $0x1f8] sm:$0xff]  ;;  %v4552_v44 = vld [vmem:[%s5657_s1 + $0x1f0] sm:$0xff] }
 0x1f8   :  { %1502 = vperm.xlu1 %3540, %v4235_v52   ;;  %1497 = vperm.xlu0 %3539, %v4240_v53   ;;  %5682 = vst [vmem:[#allocation12_spill] sm:$0xff] %v4547_v41 }
 0x1fc   :  { %1512 = vperm.xlu1 %3540, %v4247_v54   ;;  %1507 = vperm.xlu0 %3539, %v4252_v9  }
 0x200   :  { %1522 = vperm.xlu1 %3540, %v4259_v55   ;;  %1517 = vperm.xlu0 %3539, %v4264_v56  }
 0x204   :  { %1532 = vperm.xlu1 %3540, %v4271_v57   ;;  %1527 = vperm.xlu0 %3539, %v4276_v58  }
 0x208   :  { %1542 = vperm.xlu1 %3540, %v4283_v59   ;;  %1537 = vperm.xlu0 %3539, %v4288_v60  }
 0x20c   :  { %1552 = vperm.xlu1 %3540, %v4295_v61   ;;  %1547 = vperm.xlu0 %3539, %v4300_v62  }
 0x210   :  { %1562 = vperm.xlu1 %3540, %v4307_v63   ;;  %1557 = vperm.xlu0 %3539, %v4312_v0  }
 0x214   :  { %1572 = vperm.xlu1 %3540, %v4319_v1   ;;  %1567 = vperm.xlu0 %3539, %v4324_v2  }
 0x218   :  { %1582 = vperm.xlu1 %3540, %v4331_v3   ;;  %1577 = vperm.xlu0 %3539, %v4336_v5  }
 0x21c   :  { %1592 = vperm.xlu1 %3540, %v4343_v6   ;;  %1587 = vperm.xlu0 %3539, %v4348_v7  }
 0x220   :  { %1602 = vperm.xlu1 %3540, %v4355_v8   ;;  %1597 = vperm.xlu0 %3539, %v4360_v10  }
 0x224   :  { %1612 = vperm.xlu1 %3540, %v4367_v11   ;;  %1607 = vperm.xlu0 %3539, %v4372_v12  }
 0x228   :  { %1622 = vperm.xlu1 %3540, %v4379_v13   ;;  %1617 = vperm.xlu0 %3539, %v4384_v14  }
 0x22c   :  { %1632 = vperm.xlu1 %3540, %v4391_v15   ;;  %1627 = vperm.xlu0 %3539, %v4396_v16  }
 0x230   :  { %1642 = vperm.xlu1 %3540, %v4403_v17   ;;  %1637 = vperm.xlu0 %3539, %v4408_v18  }
 0x234   :  { %1652 = vperm.xlu1 %3540, %v4415_v19   ;;  %1647 = vperm.xlu0 %3539, %v4420_v20  }
 0x238   :  { %1662 = vperm.xlu1 %3540, %v4427_v21   ;;  %1657 = vperm.xlu0 %3539, %v4432_v22  }
 0x23c   :  { %1672 = vperm.xlu1 %3540, %v4439_v23   ;;  %1667 = vperm.xlu0 %3539, %v4444_v24  }
 0x240   :  { %1682 = vperm.xlu1 %3540, %v4451_v25   ;;  %1677 = vperm.xlu0 %3539, %v4456_v26  }
 0x244   :  { %1692 = vperm.xlu1 %3540, %v4463_v27   ;;  %1687 = vperm.xlu0 %3539, %v4468_v28  }
 0x248   :  { %1702 = vperm.xlu1 %3540, %v4475_v29   ;;  %1697 = vperm.xlu0 %3539, %v4480_v30  }
 0x24c   :  { %1712 = vperm.xlu1 %3540, %v4487_v31   ;;  %1707 = vperm.xlu0 %3539, %v4492_v32  }
 0x250   :  { %1722 = vperm.xlu1 %3540, %v4499_v33   ;;  %1717 = vperm.xlu0 %3539, %v4504_v34  }
 0x254   :  { %1732 = vperm.xlu1 %3540, %v4511_v35   ;;  %1727 = vperm.xlu0 %3539, %v4516_v36  }
 0x258   :  { %1742 = vperm.xlu1 %3540, %v4523_v37   ;;  %1737 = vperm.xlu0 %3539, %v4528_v38  }
 0x25c   :  { %1752 = vperm.xlu1 %3540, %v4535_v39   ;;  %1747 = vperm.xlu0 %3539, %v4540_v40   ;;  %v3701_v39 = vmov 2  }
 0x260   :  { %1762 = vperm.xlu1 %3540, %v4547_v41   ;;  %1757 = vperm.xlu0 %3539, %v4552_v44  }
 0x263   :  { %v4556_v37 = vpop.permute.xlu1 %1457  ;;  %v4558_v38 = vpop.permute.xlu0 %1447 }
 0x264   :  { %5683 = vst [vmem:[#allocation13_spill] sm:$0xff] %v4556_v37  ;;  %5684 = vst [vmem:[#allocation14_spill] sm:$0xff] %v4558_v38  ;;  %3542 = vset.pattern.permute.xlu1 %v3701_v39  ;;  %3541 = vset.pattern.permute.xlu0 %v3701_v39 }
 0x265   :  { %1834 = vperm.xlu1 %3542, %v4192_v46   ;;  %1830 = vperm.xlu0 %3541, %v4180_v43  }
 0x267   :  { %v4562_v40 = vpop.permute.xlu1 %1462  ;;  %v4564_v35 = vpop.permute.xlu0 %1452 }
 0x268   :  { %5685 = vst [vmem:[#allocation15_spill] sm:$0xff] %v4562_v40  ;;  %5686 = vst [vmem:[#allocation16_spill] sm:$0xff] %v4564_v35 }
 0x269   :  { %1838 = vperm.xlu1 %3542, %v4175_v42   ;;  %1842 = vperm.xlu0 %3541, %v4187_v45  }
 0x26b   :  { %v4568_v41 = vpop.permute.xlu1 %1472  ;;  %v4570_v37 = vpop.permute.xlu0 %1467 }
 0x26c   :  { %5687 = vst [vmem:[#allocation17_spill] sm:$0xff] %v4568_v41  ;;  %5688 = vst [vmem:[#allocation18_spill] sm:$0xff] %v4570_v37 }
 0x26d   :  { %1846 = vperm.xlu1 %3542, %v4204_v48   ;;  %1850 = vperm.xlu0 %3541, %v4199_v47  }
 0x26f   :  { %v4574_v39 = vpop.permute.xlu1 %1482  ;;  %v4576_v46 = vpop.permute.xlu0 %1477 }
 0x270   :  { %5689 = vst [vmem:[#allocation19_spill] sm:$0xff] %v4574_v39  ;;  %5690 = vst [vmem:[#allocation20_spill] sm:$0xff] %v4576_v46 }
 0x271   :  { %1854 = vperm.xlu1 %3542, %v4216_v50   ;;  %1858 = vperm.xlu0 %3541, %v4211_v49  }
 0x273   :  { %v4580_v43 = vpop.permute.xlu1 %1492  ;;  %v4582_v42 = vpop.permute.xlu0 %1487 }
 0x274   :  { %5691 = vst [vmem:[#allocation21_spill] sm:$0xff] %v4580_v43  ;;  %5692 = vst [vmem:[#allocation22_spill] sm:$0xff] %v4582_v42 }
 0x275   :  { %1862 = vperm.xlu1 %3542, %v4228_v4   ;;  %1866 = vperm.xlu0 %3541, %v4223_v51  }
 0x277   :  { %v4586_v45 = vpop.permute.xlu1 %1502  ;;  %v4588_v48 = vpop.permute.xlu0 %1497 }
 0x278   :  { %5693 = vst [vmem:[#allocation23_spill] sm:$0xff] %v4586_v45  ;;  %5694 = vst [vmem:[#allocation24_spill] sm:$0xff] %v4588_v48 }
 0x279   :  { %1870 = vperm.xlu1 %3542, %v4240_v53   ;;  %1874 = vperm.xlu0 %3541, %v4235_v52  }
 0x27b   :  { %v4592_v47 = vpop.permute.xlu1 %1512  ;;  %v4594_v50 = vpop.permute.xlu0 %1507 }
 0x27c   :  { %5695 = vst [vmem:[#allocation25_spill] sm:$0xff] %v4592_v47  ;;  %5696 = vst [vmem:[#allocation26_spill] sm:$0xff] %v4594_v50 }
 0x27d   :  { %1878 = vperm.xlu1 %3542, %v4252_v9   ;;  %1882 = vperm.xlu0 %3541, %v4247_v54  }
 0x27f   :  { %v4598_v49 = vpop.permute.xlu1 %1522  ;;  %v4600_v4 = vpop.permute.xlu0 %1517 }
 0x280   :  { %5697 = vst [vmem:[#allocation27_spill] sm:$0xff] %v4598_v49  ;;  %5698 = vst [vmem:[#allocation28_spill] sm:$0xff] %v4600_v4 }
 0x281   :  { %1886 = vperm.xlu1 %3542, %v4264_v56   ;;  %1890 = vperm.xlu0 %3541, %v4259_v55  }
 0x283   :  { %v4604_v51 = vpop.permute.xlu1 %1532  ;;  %v4606_v53 = vpop.permute.xlu0 %1527 }
 0x284   :  { %5699 = vst [vmem:[#allocation29_spill] sm:$0xff] %v4604_v51  ;;  %5700 = vst [vmem:[#allocation30_spill] sm:$0xff] %v4606_v53 }
 0x285   :  { %1894 = vperm.xlu1 %3542, %v4276_v58   ;;  %1898 = vperm.xlu0 %3541, %v4271_v57  }
 0x287   :  { %v4610_v52 = vpop.permute.xlu1 %1542  ;;  %v4612_v9 = vpop.permute.xlu0 %1537 }
 0x288   :  { %5701 = vst [vmem:[#allocation31_spill] sm:$0xff] %v4610_v52  ;;  %5702 = vst [vmem:[#allocation32_spill] sm:$0xff] %v4612_v9 }
 0x289   :  { %1902 = vperm.xlu1 %3542, %v4288_v60   ;;  %1906 = vperm.xlu0 %3541, %v4283_v59  }
 0x28b   :  { %v4616_v54 = vpop.permute.xlu1 %1552  ;;  %v4618_v56 = vpop.permute.xlu0 %1547 }
 0x28c   :  { %5703 = vst [vmem:[#allocation33_spill] sm:$0xff] %v4616_v54  ;;  %5704 = vst [vmem:[#allocation34_spill] sm:$0xff] %v4618_v56 }
 0x28d   :  { %1910 = vperm.xlu1 %3542, %v4300_v62   ;;  %1914 = vperm.xlu0 %3541, %v4295_v61  }
 0x28f   :  { %v4622_v55 = vpop.permute.xlu1 %1562  ;;  %v4624_v58 = vpop.permute.xlu0 %1557 }
 0x290   :  { %5705 = vst [vmem:[#allocation35_spill] sm:$0xff] %v4622_v55  ;;  %5706 = vst [vmem:[#allocation36_spill] sm:$0xff] %v4624_v58 }
 0x291   :  { %1918 = vperm.xlu1 %3542, %v4312_v0   ;;  %1922 = vperm.xlu0 %3541, %v4307_v63  }
 0x293   :  { %v4628_v57 = vpop.permute.xlu1 %1572  ;;  %v4630_v60 = vpop.permute.xlu0 %1567 }
 0x294   :  { %5707 = vst [vmem:[#allocation37_spill] sm:$0xff] %v4628_v57  ;;  %5708 = vst [vmem:[#allocation38_spill] sm:$0xff] %v4630_v60 }
 0x295   :  { %1926 = vperm.xlu1 %3542, %v4324_v2   ;;  %1930 = vperm.xlu0 %3541, %v4319_v1  }
 0x297   :  { %v4634_v59 = vpop.permute.xlu1 %1582  ;;  %v4636_v62 = vpop.permute.xlu0 %1577 }
 0x298   :  { %5709 = vst [vmem:[#allocation39_spill] sm:$0xff] %v4634_v59  ;;  %5710 = vst [vmem:[#allocation40_spill] sm:$0xff] %v4636_v62 }
 0x299   :  { %1934 = vperm.xlu1 %3542, %v4336_v5   ;;  %1938 = vperm.xlu0 %3541, %v4331_v3  }
 0x29b   :  { %v4640_v61 = vpop.permute.xlu1 %1592  ;;  %v4642_v0 = vpop.permute.xlu0 %1587 }
 0x29c   :  { %5711 = vst [vmem:[#allocation41_spill] sm:$0xff] %v4640_v61  ;;  %5712 = vst [vmem:[#allocation42_spill] sm:$0xff] %v4642_v0 }
 0x29d   :  { %1942 = vperm.xlu1 %3542, %v4348_v7   ;;  %1946 = vperm.xlu0 %3541, %v4343_v6  }
 0x29f   :  { %v4646_v63 = vpop.permute.xlu1 %1602  ;;  %v4648_v2 = vpop.permute.xlu0 %1597 }
 0x2a0   :  { %5713 = vst [vmem:[#allocation43_spill] sm:$0xff] %v4646_v63  ;;  %5714 = vst [vmem:[#allocation44_spill] sm:$0xff] %v4648_v2 }
 0x2a1   :  { %1950 = vperm.xlu1 %3542, %v4360_v10   ;;  %1954 = vperm.xlu0 %3541, %v4355_v8  }
 0x2a3   :  { %v4652_v1 = vpop.permute.xlu1 %1612  ;;  %v4654_v5 = vpop.permute.xlu0 %1607 }
 0x2a4   :  { %5715 = vst [vmem:[#allocation45_spill] sm:$0xff] %v4652_v1  ;;  %5716 = vst [vmem:[#allocation46_spill] sm:$0xff] %v4654_v5 }
 0x2a5   :  { %1958 = vperm.xlu1 %3542, %v4372_v12   ;;  %1962 = vperm.xlu0 %3541, %v4367_v11  }
 0x2a7   :  { %v4658_v3 = vpop.permute.xlu1 %1622  ;;  %v4660_v7 = vpop.permute.xlu0 %1617 }
 0x2a8   :  { %5717 = vst [vmem:[#allocation47_spill] sm:$0xff] %v4658_v3  ;;  %5718 = vst [vmem:[#allocation48_spill] sm:$0xff] %v4660_v7 }
 0x2a9   :  { %1966 = vperm.xlu1 %3542, %v4384_v14   ;;  %1970 = vperm.xlu0 %3541, %v4379_v13  }
 0x2ab   :  { %v4664_v6 = vpop.permute.xlu1 %1632  ;;  %v4666_v10 = vpop.permute.xlu0 %1627 }
 0x2ac   :  { %5719 = vst [vmem:[#allocation49_spill] sm:$0xff] %v4664_v6  ;;  %5720 = vst [vmem:[#allocation50_spill] sm:$0xff] %v4666_v10 }
 0x2ad   :  { %1974 = vperm.xlu1 %3542, %v4396_v16   ;;  %1978 = vperm.xlu0 %3541, %v4391_v15  }
 0x2af   :  { %v4670_v8 = vpop.permute.xlu1 %1642  ;;  %v4672_v12 = vpop.permute.xlu0 %1637 }
 0x2b0   :  { %5721 = vst [vmem:[#allocation51_spill] sm:$0xff] %v4670_v8  ;;  %5722 = vst [vmem:[#allocation52_spill] sm:$0xff] %v4672_v12 }
 0x2b1   :  { %1982 = vperm.xlu1 %3542, %v4408_v18   ;;  %1986 = vperm.xlu0 %3541, %v4403_v17  }
 0x2b3   :  { %v4676_v11 = vpop.permute.xlu1 %1652  ;;  %v4678_v14 = vpop.permute.xlu0 %1647 }
 0x2b4   :  { %5723 = vst [vmem:[#allocation53_spill] sm:$0xff] %v4676_v11  ;;  %5724 = vst [vmem:[#allocation54_spill] sm:$0xff] %v4678_v14 }
 0x2b5   :  { %1990 = vperm.xlu1 %3542, %v4420_v20   ;;  %1994 = vperm.xlu0 %3541, %v4415_v19  }
 0x2b7   :  { %v4682_v13 = vpop.permute.xlu1 %1662  ;;  %v4684_v16 = vpop.permute.xlu0 %1657 }
 0x2b8   :  { %5725 = vst [vmem:[#allocation55_spill] sm:$0xff] %v4682_v13  ;;  %5726 = vst [vmem:[#allocation56_spill] sm:$0xff] %v4684_v16 }
 0x2b9   :  { %1998 = vperm.xlu1 %3542, %v4432_v22   ;;  %2002 = vperm.xlu0 %3541, %v4427_v21  }
 0x2bb   :  { %v4688_v15 = vpop.permute.xlu1 %1672  ;;  %v4690_v18 = vpop.permute.xlu0 %1667 }
 0x2bc   :  { %5727 = vst [vmem:[#allocation57_spill] sm:$0xff] %v4688_v15  ;;  %5728 = vst [vmem:[#allocation58_spill] sm:$0xff] %v4690_v18 }
 0x2bd   :  { %2006 = vperm.xlu1 %3542, %v4444_v24   ;;  %2010 = vperm.xlu0 %3541, %v4439_v23  }
 0x2bf   :  { %v4694_v17 = vpop.permute.xlu1 %1682  ;;  %v4696_v20 = vpop.permute.xlu0 %1677 }
 0x2c0   :  { %5729 = vst [vmem:[#allocation59_spill] sm:$0xff] %v4694_v17  ;;  %5730 = vst [vmem:[#allocation60_spill] sm:$0xff] %v4696_v20 }
 0x2c1   :  { %2014 = vperm.xlu1 %3542, %v4456_v26   ;;  %2018 = vperm.xlu0 %3541, %v4451_v25  }
 0x2c3   :  { %v4700_v19 = vpop.permute.xlu1 %1692  ;;  %v4702_v22 = vpop.permute.xlu0 %1687 }
 0x2c4   :  { %5731 = vst [vmem:[#allocation61_spill] sm:$0xff] %v4700_v19  ;;  %5732 = vst [vmem:[#allocation62_spill] sm:$0xff] %v4702_v22 }
 0x2c5   :  { %2022 = vperm.xlu1 %3542, %v4468_v28   ;;  %2026 = vperm.xlu0 %3541, %v4463_v27  }
 0x2c7   :  { %v4706_v21 = vpop.permute.xlu1 %1702  ;;  %v4708_v24 = vpop.permute.xlu0 %1697 }
 0x2c8   :  { %5733 = vst [vmem:[#allocation63_spill] sm:$0xff] %v4706_v21  ;;  %5734 = vst [vmem:[#allocation64_spill] sm:$0xff] %v4708_v24 }
 0x2c9   :  { %2030 = vperm.xlu1 %3542, %v4480_v30   ;;  %2034 = vperm.xlu0 %3541, %v4475_v29   ;;  %v5741_v29 = vld [vmem:[#allocation7_spill] sm:$0xff] }
 0x2cb   :  { %v4712_v23 = vpop.permute.xlu1 %1712  ;;  %v4714_v26 = vpop.permute.xlu0 %1707 }
 0x2cc   :  { %5735 = vst [vmem:[#allocation65_spill] sm:$0xff] %v4712_v23  ;;  %5736 = vst [vmem:[#allocation66_spill] sm:$0xff] %v4714_v26 }
 0x2cd   :  { %2038 = vperm.xlu1 %3542, %v4492_v32   ;;  %2042 = vperm.xlu0 %3541, %v4487_v31   ;;  %v5744_v31 = vld [vmem:[#allocation9_spill] sm:$0xff] }
 0x2cf   :  { %v4718_v25 = vpop.permute.xlu1 %1722  ;;  %v4720_v28 = vpop.permute.xlu0 %1717 }
 0x2d0   :  { %5737 = vst [vmem:[#allocation67_spill] sm:$0xff] %v4718_v25  ;;  %5738 = vst [vmem:[#allocation68_spill] sm:$0xff] %v4720_v28  ;;  %v5745_v25 = vld [vmem:[#allocation8_spill] sm:$0xff] }
 0x2d1   :  { %2046 = vperm.xlu1 %3542, %v4504_v34   ;;  %2050 = vperm.xlu0 %3541, %v4499_v33   ;;  %v5748_v33 = vld [vmem:[#allocation11_spill] sm:$0xff] }
 0x2d3   :  { %v4724_v27 = vpop.permute.xlu1 %1732  ;;  %v4726_v30 = vpop.permute.xlu0 %1727 }
 0x2d4   :  { %5739 = vst [vmem:[#allocation69_spill] sm:$0xff] %v4724_v27  ;;  %5740 = vst [vmem:[#allocation70_spill] sm:$0xff] %v4726_v30  ;;  %v5749_v27 = vld [vmem:[#allocation10_spill] sm:$0xff] }
 0x2d5   :  { %2054 = vperm.xlu1 %3542, %v4516_v36   ;;  %2058 = vperm.xlu0 %3541, %v5741_v29   ;;  %v5752_v29 = vld [vmem:[#allocation12_spill] sm:$0xff] }
 0x2d7   :  { %v4730_v23 = vpop.permute.xlu1 %1742  ;;  %v4732_v32 = vpop.permute.xlu0 %1737 }
 0x2d8   :  { %5742 = vst [vmem:[#allocation7_spill] sm:$0xff] %v4730_v23  ;;  %5743 = vst [vmem:[#allocation71_spill] sm:$0xff] %v4732_v32  ;;  %v4748_v23 = vld [vmem:[#allocation4] sm:$0xff]  ;;  %v3702_v32 = vmov 3  }
 0x2d9   :  { %2062 = vperm.xlu1 %3542, %v5744_v31   ;;  %2066 = vperm.xlu0 %3541, %v5745_v25   ;;  %v4750_v31 = vld [vmem:[#allocation4 + $0x8] sm:$0xff] }
 0x2db   :  { %v4736_v28 = vpop.permute.xlu1 %1752  ;;  %v4738_v34 = vpop.permute.xlu0 %1747 }
 0x2dc   :  { %5746 = vst [vmem:[#allocation9_spill] sm:$0xff] %v4736_v28  ;;  %5747 = vst [vmem:[#allocation8_spill] sm:$0xff] %v4738_v34 }
 0x2dd   :  { %2070 = vperm.xlu1 %3542, %v5748_v33   ;;  %2074 = vperm.xlu0 %3541, %v5749_v27   ;;  %v4758_v27 = vld [vmem:[#allocation4 + $0x18] sm:$0xff] }
 0x2df   :  { %v4742_v30 = vpop.permute.xlu1 %1762  ;;  %v4744_v36 = vpop.permute.xlu0 %1757 }
 0x2e0   :  { %5750 = vst [vmem:[#allocation11_spill] sm:$0xff] %v4742_v30  ;;  %5751 = vst [vmem:[#allocation10_spill] sm:$0xff] %v4744_v36 }
 0x2e1   :  { %2078 = vperm.xlu1 %3542, %v4552_v44   ;;  %2082 = vperm.xlu0 %3541, %v5752_v29   ;;  %v4756_v44 = vld [vmem:[#allocation4 + $0x10] sm:$0xff] }
 0x2e4   :  { %v1835_v25 = vpop.permute.xlu1 %1834  ;;  %v1831_v28 = vpop.permute.xlu0 %1830 }
 0x2e5   :  { %v2086_v34 = vmul.f32 %v1835_v25, %v4750_v31  ;;  %v2085_v33 = vmul.f32 %v1831_v28, %v4748_v23  ;;  %3543 = vset.pattern.permute.xlu1 %v3702_v32  ;;  %3544 = vset.pattern.permute.xlu0 %v3702_v32  ;;  %v4764_v28 = vld [vmem:[#allocation4 + $0x28] sm:$0xff]  ;;  %v4766_v32 = vld [vmem:[#allocation4 + $0x20] sm:$0xff] }
 0x2e7   :  { %2215 = vrot.lane.b32.xlu0 %v2086_v34, %s3703_s21  ;;  %2213 = vrot.lane.b32.xlu1 %v2085_v33, %s3703_s21 }
 0x2e8   :  { %v1839_v29 = vpop.permute.xlu1 %1838  ;;  %v1843_v30 = vpop.permute.xlu0 %1842 }
 0x2e9   :  { %v2087_v36 = vmul.f32 %v1839_v29, %v4756_v44  ;;  %v2088_v25 = vmul.f32 %v1843_v30, %v4758_v27  ;;  %v4772_v29 = vld [vmem:[#allocation4 + $0x38] sm:$0xff]  ;;  %v4774_v30 = vld [vmem:[#allocation4 + $0x30] sm:$0xff] }
 0x2eb   :  { %2219 = vrot.lane.b32.xlu0 %v2088_v25, %s3703_s21  ;;  %2217 = vrot.lane.b32.xlu1 %v2087_v36, %s3703_s21 }
 0x2ec   :  { %v1847_v34 = vpop.permute.xlu1 %1846  ;;  %v1851_v33 = vpop.permute.xlu0 %1850 }
 0x2ed   :  { %v2089_v21 = vmul.f32 %v1847_v34, %v4766_v32  ;;  %v2090_v26 = vmul.f32 %v1851_v33, %v4764_v28  ;;  %v4780_v34 = vld [vmem:[#allocation4 + $0x48] sm:$0xff]  ;;  %v4782_v33 = vld [vmem:[#allocation4 + $0x40] sm:$0xff] }
 0x2ef   :  { %2223 = vrot.lane.b32.xlu0 %v2090_v26, %s3703_s21  ;;  %2221 = vrot.lane.b32.xlu1 %v2089_v21, %s3703_s21 }
 0x2f0   :  { %v1855_v25 = vpop.permute.xlu1 %1854  ;;  %v1859_v36 = vpop.permute.xlu0 %1858 }
 0x2f1   :  { %v2091_v19 = vmul.f32 %v1855_v25, %v4774_v30  ;;  %v2092_v24 = vmul.f32 %v1859_v36, %v4772_v29  ;;  %v4788_v25 = vld [vmem:[#allocation4 + $0x58] sm:$0xff]  ;;  %v4790_v36 = vld [vmem:[#allocation4 + $0x50] sm:$0xff] }
 0x2f3   :  { %2227 = vrot.lane.b32.xlu0 %v2092_v24, %s3703_s21  ;;  %2225 = vrot.lane.b32.xlu1 %v2091_v19, %s3703_s21 }
 0x2f4   :  { %v1863_v26 = vpop.permute.xlu1 %1862  ;;  %v1867_v21 = vpop.permute.xlu0 %1866 }
 0x2f5   :  { %v2093_v17 = vmul.f32 %v1863_v26, %v4782_v33  ;;  %v2094_v22 = vmul.f32 %v1867_v21, %v4780_v34  ;;  %v4796_v26 = vld [vmem:[#allocation4 + $0x68] sm:$0xff]  ;;  %v4798_v21 = vld [vmem:[#allocation4 + $0x60] sm:$0xff] }
 0x2f7   :  { %2231 = vrot.lane.b32.xlu0 %v2094_v22, %s3703_s21  ;;  %2229 = vrot.lane.b32.xlu1 %v2093_v17, %s3703_s21 }
 0x2f8   :  { %v1871_v24 = vpop.permute.xlu1 %1870  ;;  %v1875_v19 = vpop.permute.xlu0 %1874 }
 0x2f9   :  { %v2095_v15 = vmul.f32 %v1871_v24, %v4790_v36  ;;  %v2096_v20 = vmul.f32 %v1875_v19, %v4788_v25  ;;  %v4804_v24 = vld [vmem:[#allocation4 + $0x78] sm:$0xff]  ;;  %v4806_v19 = vld [vmem:[#allocation4 + $0x70] sm:$0xff] }
 0x2fb   :  { %2235 = vrot.lane.b32.xlu0 %v2096_v20, %s3703_s21  ;;  %2233 = vrot.lane.b32.xlu1 %v2095_v15, %s3703_s21 }
 0x2fc   :  { %v1879_v22 = vpop.permute.xlu1 %1878  ;;  %v1883_v17 = vpop.permute.xlu0 %1882 }
 0x2fd   :  { %v2097_v13 = vmul.f32 %v1879_v22, %v4798_v21  ;;  %v2098_v18 = vmul.f32 %v1883_v17, %v4796_v26  ;;  %v4812_v22 = vld [vmem:[#allocation4 + $0x88] sm:$0xff]  ;;  %v4814_v17 = vld [vmem:[#allocation4 + $0x80] sm:$0xff] }
 0x2ff   :  { %2239 = vrot.lane.b32.xlu0 %v2098_v18, %s3703_s21  ;;  %2237 = vrot.lane.b32.xlu1 %v2097_v13, %s3703_s21 }
 0x300   :  { %v1887_v20 = vpop.permute.xlu1 %1886  ;;  %v1891_v15 = vpop.permute.xlu0 %1890 }
 0x301   :  { %v2099_v11 = vmul.f32 %v1887_v20, %v4806_v19  ;;  %v2100_v16 = vmul.f32 %v1891_v15, %v4804_v24  ;;  %v4820_v20 = vld [vmem:[#allocation4 + $0x98] sm:$0xff]  ;;  %v4822_v15 = vld [vmem:[#allocation4 + $0x90] sm:$0xff] }
 0x303   :  { %2243 = vrot.lane.b32.xlu0 %v2100_v16, %s3703_s21  ;;  %2241 = vrot.lane.b32.xlu1 %v2099_v11, %s3703_s21 }
 0x304   :  { %v1895_v18 = vpop.permute.xlu1 %1894  ;;  %v1899_v13 = vpop.permute.xlu0 %1898 }
 0x305   :  { %v2101_v8 = vmul.f32 %v1895_v18, %v4814_v17  ;;  %v2102_v14 = vmul.f32 %v1899_v13, %v4812_v22  ;;  %v4828_v18 = vld [vmem:[#allocation4 + $0xa8] sm:$0xff]  ;;  %v4830_v13 = vld [vmem:[#allocation4 + $0xa0] sm:$0xff] }
 0x307   :  { %2247 = vrot.lane.b32.xlu0 %v2102_v14, %s3703_s21  ;;  %2245 = vrot.lane.b32.xlu1 %v2101_v8, %s3703_s21 }
 0x308   :  { %v1903_v16 = vpop.permute.xlu1 %1902  ;;  %v1907_v11 = vpop.permute.xlu0 %1906 }
 0x309   :  { %v2103_v6 = vmul.f32 %v1903_v16, %v4822_v15  ;;  %v2104_v12 = vmul.f32 %v1907_v11, %v4820_v20  ;;  %v4836_v16 = vld [vmem:[#allocation4 + $0xb8] sm:$0xff]  ;;  %v4838_v11 = vld [vmem:[#allocation4 + $0xb0] sm:$0xff] }
 0x30b   :  { %2251 = vrot.lane.b32.xlu0 %v2104_v12, %s3703_s21  ;;  %2249 = vrot.lane.b32.xlu1 %v2103_v6, %s3703_s21 }
 0x30c   :  { %v1911_v14 = vpop.permute.xlu1 %1910  ;;  %v1915_v8 = vpop.permute.xlu0 %1914 }
 0x30d   :  { %v2105_v3 = vmul.f32 %v1911_v14, %v4830_v13  ;;  %v2106_v10 = vmul.f32 %v1915_v8, %v4828_v18  ;;  %v4844_v14 = vld [vmem:[#allocation4 + $0xc8] sm:$0xff]  ;;  %v4846_v8 = vld [vmem:[#allocation4 + $0xc0] sm:$0xff] }
 0x30f   :  { %2255 = vrot.lane.b32.xlu0 %v2106_v10, %s3703_s21  ;;  %2253 = vrot.lane.b32.xlu1 %v2105_v3, %s3703_s21 }
 0x310   :  { %v1919_v12 = vpop.permute.xlu1 %1918  ;;  %v1923_v6 = vpop.permute.xlu0 %1922 }
 0x311   :  { %v2107_v1 = vmul.f32 %v1919_v12, %v4838_v11  ;;  %v2108_v7 = vmul.f32 %v1923_v6, %v4836_v16  ;;  %v4852_v12 = vld [vmem:[#allocation4 + $0xd8] sm:$0xff]  ;;  %v4854_v6 = vld [vmem:[#allocation4 + $0xd0] sm:$0xff] }
 0x313   :  { %2259 = vrot.lane.b32.xlu0 %v2108_v7, %s3703_s21  ;;  %2257 = vrot.lane.b32.xlu1 %v2107_v1, %s3703_s21 }
 0x314   :  { %v1927_v10 = vpop.permute.xlu1 %1926  ;;  %v1931_v3 = vpop.permute.xlu0 %1930 }
 0x315   :  { %v2109_v63 = vmul.f32 %v1927_v10, %v4846_v8  ;;  %v2110_v5 = vmul.f32 %v1931_v3, %v4844_v14  ;;  %v4860_v10 = vld [vmem:[#allocation4 + $0xe8] sm:$0xff]  ;;  %v4862_v3 = vld [vmem:[#allocation4 + $0xe0] sm:$0xff] }
 0x317   :  { %2263 = vrot.lane.b32.xlu0 %v2110_v5, %s3703_s21  ;;  %2261 = vrot.lane.b32.xlu1 %v2109_v63, %s3703_s21 }
 0x318   :  { %v1935_v7 = vpop.permute.xlu1 %1934  ;;  %v1939_v1 = vpop.permute.xlu0 %1938 }
 0x319   :  { %v2111_v61 = vmul.f32 %v1935_v7, %v4854_v6  ;;  %v2112_v2 = vmul.f32 %v1939_v1, %v4852_v12  ;;  %v4868_v7 = vld [vmem:[#allocation4 + $0xf8] sm:$0xff]  ;;  %v4870_v1 = vld [vmem:[#allocation4 + $0xf0] sm:$0xff] }
 0x31b   :  { %2267 = vrot.lane.b32.xlu0 %v2112_v2, %s3703_s21  ;;  %2265 = vrot.lane.b32.xlu1 %v2111_v61, %s3703_s21 }
 0x31c   :  { %v1943_v5 = vpop.permute.xlu1 %1942  ;;  %v1947_v63 = vpop.permute.xlu0 %1946 }
 0x31d   :  { %v2113_v59 = vmul.f32 %v1943_v5, %v4862_v3  ;;  %v2114_v0 = vmul.f32 %v1947_v63, %v4860_v10  ;;  %v4876_v5 = vld [vmem:[#allocation4 + $0x108] sm:$0xff]  ;;  %v4878_v63 = vld [vmem:[#allocation4 + $0x100] sm:$0xff] }
 0x31f   :  { %2271 = vrot.lane.b32.xlu0 %v2114_v0, %s3703_s21  ;;  %2269 = vrot.lane.b32.xlu1 %v2113_v59, %s3703_s21 }
 0x320   :  { %v1951_v2 = vpop.permute.xlu1 %1950  ;;  %v1955_v61 = vpop.permute.xlu0 %1954 }
 0x321   :  { %v2115_v57 = vmul.f32 %v1951_v2, %v4870_v1  ;;  %v2116_v62 = vmul.f32 %v1955_v61, %v4868_v7  ;;  %v4884_v2 = vld [vmem:[#allocation4 + $0x118] sm:$0xff]  ;;  %v4886_v61 = vld [vmem:[#allocation4 + $0x110] sm:$0xff] }
 0x323   :  { %2275 = vrot.lane.b32.xlu0 %v2116_v62, %s3703_s21  ;;  %2273 = vrot.lane.b32.xlu1 %v2115_v57, %s3703_s21 }
 0x324   :  { %v1959_v0 = vpop.permute.xlu1 %1958  ;;  %v1963_v59 = vpop.permute.xlu0 %1962 }
 0x325   :  { %v2117_v55 = vmul.f32 %v1959_v0, %v4878_v63  ;;  %v2118_v60 = vmul.f32 %v1963_v59, %v4876_v5  ;;  %v4892_v0 = vld [vmem:[#allocation4 + $0x128] sm:$0xff]  ;;  %v4894_v59 = vld [vmem:[#allocation4 + $0x120] sm:$0xff] }
 0x327   :  { %2279 = vrot.lane.b32.xlu0 %v2118_v60, %s3703_s21  ;;  %2277 = vrot.lane.b32.xlu1 %v2117_v55, %s3703_s21 }
 0x328   :  { %v1967_v62 = vpop.permute.xlu1 %1966  ;;  %v1971_v57 = vpop.permute.xlu0 %1970 }
 0x329   :  { %v2119_v54 = vmul.f32 %v1967_v62, %v4886_v61  ;;  %v2120_v58 = vmul.f32 %v1971_v57, %v4884_v2  ;;  %v4900_v62 = vld [vmem:[#allocation4 + $0x138] sm:$0xff]  ;;  %v4902_v57 = vld [vmem:[#allocation4 + $0x130] sm:$0xff] }
 0x32b   :  { %2283 = vrot.lane.b32.xlu0 %v2120_v58, %s3703_s21  ;;  %2281 = vrot.lane.b32.xlu1 %v2119_v54, %s3703_s21 }
 0x32c   :  { %v1975_v60 = vpop.permute.xlu1 %1974  ;;  %v1979_v55 = vpop.permute.xlu0 %1978 }
 0x32d   :  { %v2121_v52 = vmul.f32 %v1975_v60, %v4894_v59  ;;  %v2122_v56 = vmul.f32 %v1979_v55, %v4892_v0  ;;  %v4908_v60 = vld [vmem:[#allocation4 + $0x148] sm:$0xff]  ;;  %v4910_v55 = vld [vmem:[#allocation4 + $0x140] sm:$0xff] }
 0x32f   :  { %2287 = vrot.lane.b32.xlu0 %v2122_v56, %s3703_s21  ;;  %2285 = vrot.lane.b32.xlu1 %v2121_v52, %s3703_s21 }
 0x330   :  { %v1983_v58 = vpop.permute.xlu1 %1982  ;;  %v1987_v54 = vpop.permute.xlu0 %1986 }
 0x331   :  { %v2123_v51 = vmul.f32 %v1983_v58, %v4902_v57  ;;  %v2124_v9 = vmul.f32 %v1987_v54, %v4900_v62  ;;  %v4916_v58 = vld [vmem:[#allocation4 + $0x158] sm:$0xff]  ;;  %v4918_v54 = vld [vmem:[#allocation4 + $0x150] sm:$0xff] }
 0x333   :  { %2291 = vrot.lane.b32.xlu0 %v2124_v9, %s3703_s21  ;;  %2289 = vrot.lane.b32.xlu1 %v2123_v51, %s3703_s21 }
 0x334   :  { %v1991_v56 = vpop.permute.xlu1 %1990  ;;  %v1995_v52 = vpop.permute.xlu0 %1994 }
 0x335   :  { %v2125_v49 = vmul.f32 %v1991_v56, %v4910_v55  ;;  %v2126_v53 = vmul.f32 %v1995_v52, %v4908_v60  ;;  %v4924_v56 = vld [vmem:[#allocation4 + $0x168] sm:$0xff]  ;;  %v4926_v52 = vld [vmem:[#allocation4 + $0x160] sm:$0xff] }
 0x337   :  { %2295 = vrot.lane.b32.xlu0 %v2126_v53, %s3703_s21  ;;  %2293 = vrot.lane.b32.xlu1 %v2125_v49, %s3703_s21 }
 0x338   :  { %v1999_v9 = vpop.permute.xlu1 %1998  ;;  %v2003_v51 = vpop.permute.xlu0 %2002 }
 0x339   :  { %v2127_v47 = vmul.f32 %v1999_v9, %v4918_v54  ;;  %v2128_v4 = vmul.f32 %v2003_v51, %v4916_v58  ;;  %v4932_v9 = vld [vmem:[#allocation4 + $0x178] sm:$0xff]  ;;  %v4934_v51 = vld [vmem:[#allocation4 + $0x170] sm:$0xff] }
 0x33b   :  { %2299 = vrot.lane.b32.xlu0 %v2128_v4, %s3703_s21  ;;  %2297 = vrot.lane.b32.xlu1 %v2127_v47, %s3703_s21 }
 0x33c   :  { %v2007_v53 = vpop.permute.xlu1 %2006  ;;  %v2011_v49 = vpop.permute.xlu0 %2010 }
 0x33d   :  { %v2129_v45 = vmul.f32 %v2007_v53, %v4926_v52  ;;  %v2130_v50 = vmul.f32 %v2011_v49, %v4924_v56  ;;  %v4940_v53 = vld [vmem:[#allocation4 + $0x188] sm:$0xff]  ;;  %v4942_v49 = vld [vmem:[#allocation4 + $0x180] sm:$0xff] }
 0x33f   :  { %2303 = vrot.lane.b32.xlu0 %v2130_v50, %s3703_s21  ;;  %2301 = vrot.lane.b32.xlu1 %v2129_v45, %s3703_s21 }
 0x340   :  { %v2015_v4 = vpop.permute.xlu1 %2014  ;;  %v2019_v47 = vpop.permute.xlu0 %2018 }
 0x341   :  { %v2131_v43 = vmul.f32 %v2015_v4, %v4934_v51  ;;  %v2132_v48 = vmul.f32 %v2019_v47, %v4932_v9  ;;  %v4948_v4 = vld [vmem:[#allocation4 + $0x198] sm:$0xff]  ;;  %v4950_v47 = vld [vmem:[#allocation4 + $0x190] sm:$0xff] }
 0x342   :  { %5753 = vst [vmem:[#allocation12_spill] sm:$0xff] %v4948_v4 }
 0x343   :  { %2307 = vrot.lane.b32.xlu0 %v2132_v48, %s3703_s21  ;;  %2305 = vrot.lane.b32.xlu1 %v2131_v43, %s3703_s21 }
 0x344   :  { %v2023_v50 = vpop.permute.xlu1 %2022  ;;  %v2027_v45 = vpop.permute.xlu0 %2026 }
 0x345   :  { %v2133_v39 = vmul.f32 %v2023_v50, %v4942_v49  ;;  %v2134_v42 = vmul.f32 %v2027_v45, %v4940_v53  ;;  %v4956_v50 = vld [vmem:[#allocation4 + $0x1a8] sm:$0xff]  ;;  %v4958_v45 = vld [vmem:[#allocation4 + $0x1a0] sm:$0xff] }
 0x346   :  { %5754 = vst [vmem:[#allocation72_spill] sm:$0xff] %v4956_v50 }
 0x347   :  { %2311 = vrot.lane.b32.xlu0 %v2134_v42, %s3703_s21  ;;  %2309 = vrot.lane.b32.xlu1 %v2133_v39, %s3703_s21 }
 0x348   :  { %v2031_v48 = vpop.permute.xlu1 %2030  ;;  %v2035_v43 = vpop.permute.xlu0 %2034 }
 0x349   :  { %v2135_v41 = vmul.f32 %v2031_v48, %v4950_v47  ;;  %v2136_v46 = vmul.f32 %v2035_v43, %v4948_v4  ;;  %v4964_v48 = vld [vmem:[#allocation4 + $0x1b8] sm:$0xff]  ;;  %v4966_v43 = vld [vmem:[#allocation4 + $0x1b0] sm:$0xff] }
 0x34a   :  { %5755 = vst [vmem:[#allocation73_spill] sm:$0xff] %v4964_v48  ;;  %5756 = vst [vmem:[#allocation74_spill] sm:$0xff] %v4966_v43 }
 0x34b   :  { %2315 = vrot.lane.b32.xlu0 %v2136_v46, %s3703_s21  ;;  %2313 = vrot.lane.b32.xlu1 %v2135_v41, %s3703_s21 }
 0x34c   :  { %v2039_v42 = vpop.permute.xlu1 %2038  ;;  %v2043_v39 = vpop.permute.xlu0 %2042 }
 0x34d   :  { %v2137_v40 = vmul.f32 %v2039_v42, %v4958_v45  ;;  %v2138_v37 = vmul.f32 %v2043_v39, %v4956_v50  ;;  %v4972_v42 = vld [vmem:[#allocation4 + $0x1c8] sm:$0xff]  ;;  %v4974_v39 = vld [vmem:[#allocation4 + $0x1c0] sm:$0xff] }
 0x34e   :  { %5757 = vst [vmem:[#allocation75_spill] sm:$0xff] %v4972_v42  ;;  %5758 = vst [vmem:[#allocation76_spill] sm:$0xff] %v4974_v39 }
 0x34f   :  { %2319 = vrot.lane.b32.xlu0 %v2138_v37, %s3703_s21  ;;  %2317 = vrot.lane.b32.xlu1 %v2137_v40, %s3703_s21 }
 0x350   :  { %v2047_v46 = vpop.permute.xlu1 %2046  ;;  %v2051_v41 = vpop.permute.xlu0 %2050 }
 0x351   :  { %v2139_v35 = vmul.f32 %v2047_v46, %v4966_v43  ;;  %v2140_v38 = vmul.f32 %v2051_v41, %v4964_v48  ;;  %v4980_v46 = vld [vmem:[#allocation4 + $0x1d8] sm:$0xff]  ;;  %v4982_v41 = vld [vmem:[#allocation4 + $0x1d0] sm:$0xff] }
 0x352   :  { %5759 = vst [vmem:[#allocation77_spill] sm:$0xff] %v4980_v46  ;;  %5760 = vst [vmem:[#allocation78_spill] sm:$0xff] %v4982_v41 }
 0x353   :  { %2323 = vrot.lane.b32.xlu0 %v2140_v38, %s3703_s21  ;;  %2321 = vrot.lane.b32.xlu1 %v2139_v35, %s3703_s21 }
 0x354   :  { %v2055_v37 = vpop.permute.xlu1 %2054  ;;  %v2059_v40 = vpop.permute.xlu0 %2058 }
 0x355   :  { %v2141_v50 = vmul.f32 %v2055_v37, %v4974_v39  ;;  %v2142_v4 = vmul.f32 %v2059_v40, %v4972_v42  ;;  %v4988_v37 = vld [vmem:[#allocation4 + $0x1e8] sm:$0xff]  ;;  %v4990_v40 = vld [vmem:[#allocation4 + $0x1e0] sm:$0xff] }
 0x356   :  { %5761 = vst [vmem:[#allocation79_spill] sm:$0xff] %v4988_v37 }
 0x357   :  { %2327 = vrot.lane.b32.xlu0 %v2142_v4, %s3703_s21  ;;  %2325 = vrot.lane.b32.xlu1 %v2141_v50, %s3703_s21 }
 0x358   :  { %v2063_v38 = vpop.permute.xlu1 %2062  ;;  %v2067_v35 = vpop.permute.xlu0 %2066 }
 0x359   :  { %v2143_v48 = vmul.f32 %v2063_v38, %v4982_v41  ;;  %v2144_v43 = vmul.f32 %v2067_v35, %v4980_v46  ;;  %v4996_v38 = vld [vmem:[#allocation4 + $0x1f8] sm:$0xff]  ;;  %v4998_v35 = vld [vmem:[#allocation4 + $0x1f0] sm:$0xff] }
 0x35a   :  { %5762 = vst [vmem:[#allocation80_spill] sm:$0xff] %v4996_v38 }
 0x35b   :  { %2331 = vrot.lane.b32.xlu0 %v2144_v43, %s3703_s21  ;;  %2329 = vrot.lane.b32.xlu1 %v2143_v48, %s3703_s21 }
 0x35c   :  { %v2071_v4 = vpop.permute.xlu1 %2070  ;;  %v2075_v50 = vpop.permute.xlu0 %2074 }
 0x35d   :  { %v2145_v42 = vmul.f32 %v2071_v4, %v4990_v40  ;;  %v2146_v39 = vmul.f32 %v2075_v50, %v4988_v37  ;;  %v3608_v37 = vld [vmem:[%s5657_s1 + $0x1f8] sm:$0xff] }
 0x35f   :  { %2335 = vrot.lane.b32.xlu0 %v2146_v39, %s3703_s21  ;;  %2333 = vrot.lane.b32.xlu1 %v2145_v42, %s3703_s21  ;;  %v3545_v42 = vld [vmem:[%s5657_s1 + $0x8] sm:$0xff]  ;;  %v3546_v39 = vld [vmem:[%s5657_s1] sm:$0xff] }
 0x360   :  { %v2079_v43 = vpop.permute.xlu1 %2078  ;;  %v2083_v48 = vpop.permute.xlu0 %2082 }
 0x361   :  { %v2147_v46 = vmul.f32 %v2079_v43, %v4998_v35  ;;  %v2148_v41 = vmul.f32 %v2083_v48, %v4996_v38 }
 0x363   :  { %2339 = vrot.lane.b32.xlu0 %v2148_v41, %s3703_s21  ;;  %2337 = vrot.lane.b32.xlu1 %v2147_v46, %s3703_s21  ;;  %v3547_v46 = vld [vmem:[%s5657_s1 + $0x20] sm:$0xff]  ;;  %v3548_v41 = vld [vmem:[%s5657_s1 + $0x10] sm:$0xff] }
 0x364   :  { %v5004_v4 = vpop.permute.xlu0 %2215  ;;  %v5006_v50 = vpop.permute.xlu1 %2213 }
 0x365   :  { %5763 = vst [vmem:[#allocation81_spill] sm:$0xff] %v5004_v4 }
 0x367   :  { %2474 = vperm.xlu0 %3544, %v3545_v42   ;;  %2470 = vperm.xlu1 %3543, %v3546_v39   ;;  %v3549_v39 = vld [vmem:[%s5657_s1 + $0x30] sm:$0xff] }
 0x368   :  { %v5014_v43 = vpop.permute.xlu0 %2219  ;;  %v5016_v48 = vpop.permute.xlu1 %2217 }
 0x369   :  { %5764 = vst [vmem:[#allocation82_spill] sm:$0xff] %v5014_v43  ;;  %5765 = vst [vmem:[#allocation83_spill] sm:$0xff] %v5016_v48  ;;  %v3550_v43 = vld [vmem:[%s5657_s1 + $0x18] sm:$0xff] }
 0x36b   :  { %2486 = vperm.xlu0 %3544, %v3547_v46   ;;  %2478 = vperm.xlu1 %3543, %v3548_v41   ;;  %v3551_v41 = vld [vmem:[%s5657_s1 + $0x40] sm:$0xff] }
 0x36c   :  { %v5024_v42 = vpop.permute.xlu0 %2223  ;;  %v5026_v4 = vpop.permute.xlu1 %2221 }
 0x36d   :  { %5766 = vst [vmem:[#allocation84_spill] sm:$0xff] %v5024_v42  ;;  %5767 = vst [vmem:[#allocation85_spill] sm:$0xff] %v5026_v4  ;;  %v3552_v42 = vld [vmem:[%s5657_s1 + $0x28] sm:$0xff] }
 0x36f   :  { %2494 = vperm.xlu0 %3544, %v3549_v39   ;;  %2482 = vperm.xlu1 %3543, %v3550_v43   ;;  %v3553_v43 = vld [vmem:[%s5657_s1 + $0x50] sm:$0xff] }
 0x370   :  { %v5034_v46 = vpop.permute.xlu0 %2227  ;;  %v5036_v38 = vpop.permute.xlu1 %2225 }
 0x371   :  { %5768 = vst [vmem:[#allocation86_spill] sm:$0xff] %v5034_v46  ;;  %5769 = vst [vmem:[#allocation87_spill] sm:$0xff] %v5036_v38  ;;  %v3554_v46 = vld [vmem:[%s5657_s1 + $0x38] sm:$0xff] }
 0x373   :  { %2502 = vperm.xlu0 %3544, %v3551_v41   ;;  %2490 = vperm.xlu1 %3543, %v3552_v42   ;;  %v3555_v42 = vld [vmem:[%s5657_s1 + $0x60] sm:$0xff] }
 0x374   :  { %v5044_v39 = vpop.permute.xlu0 %2231  ;;  %v5046_v4 = vpop.permute.xlu1 %2229 }
 0x375   :  { %5770 = vst [vmem:[#allocation88_spill] sm:$0xff] %v5044_v39  ;;  %5771 = vst [vmem:[#allocation89_spill] sm:$0xff] %v5046_v4  ;;  %v3556_v39 = vld [vmem:[%s5657_s1 + $0x48] sm:$0xff] }
 0x377   :  { %2510 = vperm.xlu0 %3544, %v3553_v43   ;;  %2498 = vperm.xlu1 %3543, %v3554_v46   ;;  %v3557_v46 = vld [vmem:[%s5657_s1 + $0x70] sm:$0xff] }
 0x378   :  { %v5054_v41 = vpop.permute.xlu0 %2235  ;;  %v5056_v38 = vpop.permute.xlu1 %2233 }
 0x379   :  { %5772 = vst [vmem:[#allocation90_spill] sm:$0xff] %v5054_v41  ;;  %5773 = vst [vmem:[#allocation91_spill] sm:$0xff] %v5056_v38  ;;  %v3558_v41 = vld [vmem:[%s5657_s1 + $0x58] sm:$0xff] }
 0x37b   :  { %2518 = vperm.xlu0 %3544, %v3555_v42   ;;  %2506 = vperm.xlu1 %3543, %v3556_v39   ;;  %v3559_v39 = vld [vmem:[%s5657_s1 + $0x80] sm:$0xff] }
 0x37c   :  { %v5064_v43 = vpop.permute.xlu0 %2239  ;;  %v5066_v4 = vpop.permute.xlu1 %2237 }
 0x37d   :  { %5774 = vst [vmem:[#allocation92_spill] sm:$0xff] %v5064_v43  ;;  %5775 = vst [vmem:[#allocation93_spill] sm:$0xff] %v5066_v4  ;;  %v3560_v43 = vld [vmem:[%s5657_s1 + $0x68] sm:$0xff] }
 0x37f   :  { %2526 = vperm.xlu0 %3544, %v3557_v46   ;;  %2514 = vperm.xlu1 %3543, %v3558_v41   ;;  %v3561_v41 = vld [vmem:[%s5657_s1 + $0x90] sm:$0xff] }
 0x380   :  { %v5074_v42 = vpop.permute.xlu0 %2243  ;;  %v5076_v38 = vpop.permute.xlu1 %2241 }
 0x381   :  { %5776 = vst [vmem:[#allocation94_spill] sm:$0xff] %v5074_v42  ;;  %5777 = vst [vmem:[#allocation95_spill] sm:$0xff] %v5076_v38  ;;  %v3562_v42 = vld [vmem:[%s5657_s1 + $0x78] sm:$0xff] }
 0x383   :  { %2534 = vperm.xlu0 %3544, %v3559_v39   ;;  %2522 = vperm.xlu1 %3543, %v3560_v43   ;;  %v3563_v43 = vld [vmem:[%s5657_s1 + $0xa0] sm:$0xff] }
 0x384   :  { %v5084_v46 = vpop.permute.xlu0 %2247  ;;  %v5086_v4 = vpop.permute.xlu1 %2245 }
 0x385   :  { %5778 = vst [vmem:[#allocation96_spill] sm:$0xff] %v5084_v46  ;;  %5779 = vst [vmem:[#allocation97_spill] sm:$0xff] %v5086_v4  ;;  %v3564_v46 = vld [vmem:[%s5657_s1 + $0x88] sm:$0xff] }
 0x387   :  { %2542 = vperm.xlu0 %3544, %v3561_v41   ;;  %2530 = vperm.xlu1 %3543, %v3562_v42   ;;  %v3565_v42 = vld [vmem:[%s5657_s1 + $0xb0] sm:$0xff] }
 0x388   :  { %v5094_v39 = vpop.permute.xlu0 %2251  ;;  %v5096_v38 = vpop.permute.xlu1 %2249 }
 0x389   :  { %5780 = vst [vmem:[#allocation98_spill] sm:$0xff] %v5094_v39  ;;  %5781 = vst [vmem:[#allocation99_spill] sm:$0xff] %v5096_v38  ;;  %v3566_v39 = vld [vmem:[%s5657_s1 + $0x98] sm:$0xff] }
 0x38b   :  { %2550 = vperm.xlu0 %3544, %v3563_v43   ;;  %2538 = vperm.xlu1 %3543, %v3564_v46   ;;  %v3567_v46 = vld [vmem:[%s5657_s1 + $0xc0] sm:$0xff] }
 0x38c   :  { %v5104_v41 = vpop.permute.xlu0 %2255  ;;  %v5106_v4 = vpop.permute.xlu1 %2253 }
 0x38d   :  { %5782 = vst [vmem:[#allocation100_spill] sm:$0xff] %v5104_v41  ;;  %5783 = vst [vmem:[#allocation101_spill] sm:$0xff] %v5106_v4  ;;  %v3568_v41 = vld [vmem:[%s5657_s1 + $0xa8] sm:$0xff] }
 0x38f   :  { %2558 = vperm.xlu0 %3544, %v3565_v42   ;;  %2546 = vperm.xlu1 %3543, %v3566_v39   ;;  %v3569_v39 = vld [vmem:[%s5657_s1 + $0xd0] sm:$0xff] }
 0x390   :  { %v5114_v43 = vpop.permute.xlu0 %2259  ;;  %v5116_v38 = vpop.permute.xlu1 %2257 }
 0x391   :  { %5784 = vst [vmem:[#allocation102_spill] sm:$0xff] %v5114_v43  ;;  %5785 = vst [vmem:[#allocation103_spill] sm:$0xff] %v5116_v38  ;;  %v3570_v43 = vld [vmem:[%s5657_s1 + $0xb8] sm:$0xff] }
 0x393   :  { %2566 = vperm.xlu0 %3544, %v3567_v46   ;;  %2554 = vperm.xlu1 %3543, %v3568_v41   ;;  %v3571_v41 = vld [vmem:[%s5657_s1 + $0xe0] sm:$0xff] }
 0x394   :  { %v5124_v42 = vpop.permute.xlu0 %2263  ;;  %v5126_v4 = vpop.permute.xlu1 %2261 }
 0x395   :  { %5786 = vst [vmem:[#allocation104_spill] sm:$0xff] %v5124_v42  ;;  %5787 = vst [vmem:[#allocation105_spill] sm:$0xff] %v5126_v4  ;;  %v3572_v42 = vld [vmem:[%s5657_s1 + $0xc8] sm:$0xff] }
 0x397   :  { %2574 = vperm.xlu0 %3544, %v3569_v39   ;;  %2562 = vperm.xlu1 %3543, %v3570_v43   ;;  %v3573_v43 = vld [vmem:[%s5657_s1 + $0xf0] sm:$0xff] }
 0x398   :  { %v5134_v46 = vpop.permute.xlu0 %2267  ;;  %v5136_v38 = vpop.permute.xlu1 %2265 }
 0x399   :  { %5788 = vst [vmem:[#allocation106_spill] sm:$0xff] %v5134_v46  ;;  %5789 = vst [vmem:[#allocation107_spill] sm:$0xff] %v5136_v38  ;;  %v3574_v46 = vld [vmem:[%s5657_s1 + $0xd8] sm:$0xff] }
 0x39b   :  { %2582 = vperm.xlu0 %3544, %v3571_v41   ;;  %2570 = vperm.xlu1 %3543, %v3572_v42   ;;  %v3575_v42 = vld [vmem:[%s5657_s1 + $0x100] sm:$0xff] }
 0x39c   :  { %v5144_v39 = vpop.permute.xlu0 %2271  ;;  %v5146_v4 = vpop.permute.xlu1 %2269 }
 0x39d   :  { %5790 = vst [vmem:[#allocation108_spill] sm:$0xff] %v5144_v39  ;;  %5791 = vst [vmem:[#allocation109_spill] sm:$0xff] %v5146_v4  ;;  %v3576_v39 = vld [vmem:[%s5657_s1 + $0xe8] sm:$0xff] }
 0x39f   :  { %2590 = vperm.xlu0 %3544, %v3573_v43   ;;  %2578 = vperm.xlu1 %3543, %v3574_v46   ;;  %v3577_v46 = vld [vmem:[%s5657_s1 + $0x110] sm:$0xff] }
 0x3a0   :  { %v5154_v41 = vpop.permute.xlu0 %2275  ;;  %v5156_v38 = vpop.permute.xlu1 %2273 }
 0x3a1   :  { %5792 = vst [vmem:[#allocation110_spill] sm:$0xff] %v5154_v41  ;;  %5793 = vst [vmem:[#allocation111_spill] sm:$0xff] %v5156_v38  ;;  %v3578_v41 = vld [vmem:[%s5657_s1 + $0xf8] sm:$0xff] }
 0x3a3   :  { %2598 = vperm.xlu0 %3544, %v3575_v42   ;;  %2586 = vperm.xlu1 %3543, %v3576_v39   ;;  %v3579_v39 = vld [vmem:[%s5657_s1 + $0x120] sm:$0xff] }
 0x3a4   :  { %v5164_v43 = vpop.permute.xlu0 %2279  ;;  %v5166_v4 = vpop.permute.xlu1 %2277 }
 0x3a5   :  { %5794 = vst [vmem:[#allocation112_spill] sm:$0xff] %v5164_v43  ;;  %5795 = vst [vmem:[#allocation113_spill] sm:$0xff] %v5166_v4  ;;  %v3580_v43 = vld [vmem:[%s5657_s1 + $0x108] sm:$0xff] }
 0x3a7   :  { %2606 = vperm.xlu0 %3544, %v3577_v46   ;;  %2594 = vperm.xlu1 %3543, %v3578_v41   ;;  %v3581_v41 = vld [vmem:[%s5657_s1 + $0x130] sm:$0xff] }
 0x3a8   :  { %v5174_v42 = vpop.permute.xlu0 %2283  ;;  %v5176_v38 = vpop.permute.xlu1 %2281 }
 0x3a9   :  { %5796 = vst [vmem:[#allocation114_spill] sm:$0xff] %v5174_v42  ;;  %5797 = vst [vmem:[#allocation115_spill] sm:$0xff] %v5176_v38  ;;  %v3582_v42 = vld [vmem:[%s5657_s1 + $0x118] sm:$0xff] }
 0x3ab   :  { %2614 = vperm.xlu0 %3544, %v3579_v39   ;;  %2602 = vperm.xlu1 %3543, %v3580_v43   ;;  %v3583_v43 = vld [vmem:[%s5657_s1 + $0x140] sm:$0xff] }
 0x3ac   :  { %v5184_v46 = vpop.permute.xlu0 %2287  ;;  %v5186_v4 = vpop.permute.xlu1 %2285 }
 0x3ad   :  { %5798 = vst [vmem:[#allocation116_spill] sm:$0xff] %v5184_v46  ;;  %5799 = vst [vmem:[#allocation117_spill] sm:$0xff] %v5186_v4  ;;  %v3584_v46 = vld [vmem:[%s5657_s1 + $0x128] sm:$0xff] }
 0x3af   :  { %2622 = vperm.xlu0 %3544, %v3581_v41   ;;  %2610 = vperm.xlu1 %3543, %v3582_v42   ;;  %v3585_v42 = vld [vmem:[%s5657_s1 + $0x150] sm:$0xff] }
 0x3b0   :  { %v5194_v39 = vpop.permute.xlu0 %2291  ;;  %v5196_v38 = vpop.permute.xlu1 %2289 }
 0x3b1   :  { %5800 = vst [vmem:[#allocation118_spill] sm:$0xff] %v5194_v39  ;;  %5801 = vst [vmem:[#allocation119_spill] sm:$0xff] %v5196_v38  ;;  %v3586_v39 = vld [vmem:[%s5657_s1 + $0x138] sm:$0xff] }
 0x3b3   :  { %2630 = vperm.xlu0 %3544, %v3583_v43   ;;  %2618 = vperm.xlu1 %3543, %v3584_v46   ;;  %v3587_v46 = vld [vmem:[%s5657_s1 + $0x160] sm:$0xff] }
 0x3b4   :  { %v5204_v41 = vpop.permute.xlu0 %2295  ;;  %v5206_v4 = vpop.permute.xlu1 %2293 }
 0x3b5   :  { %5802 = vst [vmem:[#allocation120_spill] sm:$0xff] %v5204_v41  ;;  %5803 = vst [vmem:[#allocation121_spill] sm:$0xff] %v5206_v4  ;;  %v3588_v41 = vld [vmem:[%s5657_s1 + $0x148] sm:$0xff] }
 0x3b7   :  { %2638 = vperm.xlu0 %3544, %v3585_v42   ;;  %2626 = vperm.xlu1 %3543, %v3586_v39   ;;  %v3589_v39 = vld [vmem:[%s5657_s1 + $0x170] sm:$0xff] }
 0x3b8   :  { %v5214_v43 = vpop.permute.xlu0 %2299  ;;  %v5216_v38 = vpop.permute.xlu1 %2297 }
 0x3b9   :  { %5804 = vst [vmem:[#allocation122_spill] sm:$0xff] %v5214_v43  ;;  %5805 = vst [vmem:[#allocation123_spill] sm:$0xff] %v5216_v38  ;;  %v3590_v43 = vld [vmem:[%s5657_s1 + $0x158] sm:$0xff] }
 0x3bb   :  { %2646 = vperm.xlu0 %3544, %v3587_v46   ;;  %2634 = vperm.xlu1 %3543, %v3588_v41   ;;  %v3591_v41 = vld [vmem:[%s5657_s1 + $0x180] sm:$0xff] }
 0x3bc   :  { %v5224_v42 = vpop.permute.xlu0 %2303  ;;  %v5226_v4 = vpop.permute.xlu1 %2301 }
 0x3bd   :  { %5806 = vst [vmem:[#allocation124_spill] sm:$0xff] %v5224_v42  ;;  %5807 = vst [vmem:[#allocation125_spill] sm:$0xff] %v5226_v4  ;;  %v3592_v42 = vld [vmem:[%s5657_s1 + $0x168] sm:$0xff] }
 0x3bf   :  { %2654 = vperm.xlu0 %3544, %v3589_v39   ;;  %2642 = vperm.xlu1 %3543, %v3590_v43   ;;  %v3593_v43 = vld [vmem:[%s5657_s1 + $0x190] sm:$0xff] }
 0x3c0   :  { %v5234_v46 = vpop.permute.xlu0 %2307  ;;  %v5236_v38 = vpop.permute.xlu1 %2305 }
 0x3c1   :  { %5808 = vst [vmem:[#allocation126_spill] sm:$0xff] %v5234_v46  ;;  %5809 = vst [vmem:[#allocation127_spill] sm:$0xff] %v5236_v38  ;;  %v3594_v46 = vld [vmem:[%s5657_s1 + $0x178] sm:$0xff] }
 0x3c3   :  { %2662 = vperm.xlu0 %3544, %v3591_v41   ;;  %2650 = vperm.xlu1 %3543, %v3592_v42   ;;  %v3595_v42 = vld [vmem:[%s5657_s1 + $0x1a0] sm:$0xff] }
 0x3c4   :  { %v5244_v39 = vpop.permute.xlu0 %2311  ;;  %v5246_v4 = vpop.permute.xlu1 %2309 }
 0x3c5   :  { %5810 = vst [vmem:[#allocation128_spill] sm:$0xff] %v5244_v39  ;;  %5811 = vst [vmem:[#allocation129_spill] sm:$0xff] %v5246_v4  ;;  %v3596_v39 = vld [vmem:[%s5657_s1 + $0x188] sm:$0xff] }
 0x3c7   :  { %2670 = vperm.xlu0 %3544, %v3593_v43   ;;  %2658 = vperm.xlu1 %3543, %v3594_v46   ;;  %v3597_v46 = vld [vmem:[%s5657_s1 + $0x1b0] sm:$0xff] }
 0x3c8   :  { %v5254_v41 = vpop.permute.xlu0 %2315  ;;  %v5256_v38 = vpop.permute.xlu1 %2313 }
 0x3c9   :  { %5812 = vst [vmem:[#allocation130_spill] sm:$0xff] %v5254_v41  ;;  %5813 = vst [vmem:[#allocation131_spill] sm:$0xff] %v5256_v38  ;;  %v3598_v41 = vld [vmem:[%s5657_s1 + $0x198] sm:$0xff] }
 0x3cb   :  { %2678 = vperm.xlu0 %3544, %v3595_v42   ;;  %2666 = vperm.xlu1 %3543, %v3596_v39   ;;  %v3599_v39 = vld [vmem:[%s5657_s1 + $0x1c0] sm:$0xff] }
 0x3cc   :  { %v5264_v43 = vpop.permute.xlu0 %2319  ;;  %v5266_v4 = vpop.permute.xlu1 %2317 }
 0x3cd   :  { %5814 = vst [vmem:[#allocation132_spill] sm:$0xff] %v5264_v43  ;;  %5815 = vst [vmem:[#allocation133_spill] sm:$0xff] %v5266_v4  ;;  %v3600_v43 = vld [vmem:[%s5657_s1 + $0x1a8] sm:$0xff] }
 0x3cf   :  { %2686 = vperm.xlu0 %3544, %v3597_v46   ;;  %2674 = vperm.xlu1 %3543, %v3598_v41   ;;  %v3601_v41 = vld [vmem:[%s5657_s1 + $0x1d0] sm:$0xff] }
 0x3d0   :  { %v5274_v42 = vpop.permute.xlu0 %2323  ;;  %v5276_v38 = vpop.permute.xlu1 %2321 }
 0x3d1   :  { %5816 = vst [vmem:[#allocation134_spill] sm:$0xff] %v5274_v42  ;;  %5817 = vst [vmem:[#allocation135_spill] sm:$0xff] %v5276_v38  ;;  %v3602_v42 = vld [vmem:[%s5657_s1 + $0x1b8] sm:$0xff] }
 0x3d3   :  { %2694 = vperm.xlu0 %3544, %v3599_v39   ;;  %2682 = vperm.xlu1 %3543, %v3600_v43   ;;  %v3603_v43 = vld [vmem:[%s5657_s1 + $0x1e0] sm:$0xff] }
 0x3d4   :  { %v5284_v46 = vpop.permute.xlu0 %2327  ;;  %v5286_v4 = vpop.permute.xlu1 %2325 }
 0x3d5   :  { %5818 = vst [vmem:[#allocation136_spill] sm:$0xff] %v5284_v46  ;;  %5819 = vst [vmem:[#allocation137_spill] sm:$0xff] %v5286_v4  ;;  %v3604_v46 = vld [vmem:[%s5657_s1 + $0x1c8] sm:$0xff] }
 0x3d7   :  { %2702 = vperm.xlu0 %3544, %v3601_v41   ;;  %2690 = vperm.xlu1 %3543, %v3602_v42   ;;  %v3605_v42 = vld [vmem:[%s5657_s1 + $0x1f0] sm:$0xff] }
 0x3d8   :  { %v5294_v39 = vpop.permute.xlu0 %2331  ;;  %v5296_v38 = vpop.permute.xlu1 %2329 }
 0x3d9   :  { %5820 = vst [vmem:[#allocation138_spill] sm:$0xff] %v5294_v39  ;;  %5821 = vst [vmem:[#allocation139_spill] sm:$0xff] %v5296_v38  ;;  %v3606_v39 = vld [vmem:[%s5657_s1 + $0x1d8] sm:$0xff] }
 0x3db   :  { %2710 = vperm.xlu0 %3544, %v3603_v43   ;;  %2698 = vperm.xlu1 %3543, %v3604_v46   ;;  %v3607_v46 = vld [vmem:[%s5657_s1 + $0x1e8] sm:$0xff]  ;;  %s3705_s1 = smov [#allocation4]  }
 0x3dc   :  { %v5304_v41 = vpop.permute.xlu0 %2335  ;;  %v5306_v4 = vpop.permute.xlu1 %2333  ;;  %s3179_s6 = sshll.u32 %s3705_s1, 4  ;;  %s3180_s6 = int_to_ptr.vmem [resolvable:$true] %s3179_s6 }
 0x3dd   :  { %5822 = vst [vmem:[#allocation140_spill] sm:$0xff] %v5304_v41  ;;  %5823 = vst [vmem:[#allocation141_spill] sm:$0xff] %v5306_v4  ;;  %s3673_s7 = scalar_lea.vmem %s3180_s6, 8192  ;;  %p3678_p3 = scmp.lt.s32.totalorder %s3180_s6, %s3180_s6 }
 0x3de   :  { %p3674_p2 = scmp.ne.s32.totalorder %s3180_s6, %s3673_s7  ;;  %p3679_p4 = scmp.lt.s32.totalorder %s3673_s7, %s3673_s7 }
 0x3df   :  { %2718 = vperm.xlu0 %3544, %v3605_v42   ;;  %2706 = vperm.xlu1 %3543, %v3606_v39  }
 0x3e0   :  { %v5314_v43 = vpop.permute.xlu0 %2339  ;;  %v5316_v38 = vpop.permute.xlu1 %2337  ;;  %p3680_p5 = por %p3679_p4, %p3678_p3 }
 0x3e1   :  { %5824 = vst [vmem:[#allocation142_spill] sm:$0xff] %v5314_v43  ;;  %5825 = vst [vmem:[#allocation143_spill] sm:$0xff] %v5316_v38 }
 0x3e2   :  { %p3681_p6 = pnand %p3680_p5, %p3674_p2 }
 0x3e3   :  { %2714 = vperm.xlu1 %3543, %v3607_v46  }
 0x3e6   :  { %v2475_v41 = vpop.permute.xlu0 %2474  ;;  %v2471_v4 = vpop.permute.xlu1 %2470 }
 0x3e7   :  { %v2726_v48 = vmul.f32 %v2475_v41, %v4750_v31  ;;  %v2725_v42 = vmul.f32 %v2471_v4, %v4748_v23  ;;  %2722 = vperm.xlu1 %3543, %v3608_v37  }
 0x3e9   :  { %2853 = vrot.lane.b32.xlu0 %v2725_v42, %s3704_s5 }
 0x3ea   :  { %v2487_v39 = vpop.permute.xlu0 %2486  ;;  %v2479_v43 = vpop.permute.xlu1 %2478 }
 0x3eb   :  { %v2727_v38 = vmul.f32 %v2479_v43, %v4756_v44  ;;  %2855 = vrot.lane.b32.xlu1 %v2726_v48, %s3704_s5  ;;  %v2729_v46 = vmul.f32 %v2487_v39, %v4766_v32 }
 0x3ed   :  { %2857 = vrot.lane.b32.xlu0 %v2727_v38, %s3704_s5 }
 0x3ee   :  { %v2495_v31 = vpop.permute.xlu0 %2494  ;;  %v2483_v23 = vpop.permute.xlu1 %2482 }
 0x3ef   :  { %v2728_v4 = vmul.f32 %v2483_v23, %v4758_v27  ;;  %v2731_v42 = vmul.f32 %v2495_v31, %v4774_v30 }
 0x3f1   :  { %2861 = vrot.lane.b32.xlu0 %v2729_v46, %s3704_s5  ;;  %2859 = vrot.lane.b32.xlu1 %v2728_v4, %s3704_s5 }
 0x3f2   :  { %v2503_v37 = vpop.permute.xlu0 %2502  ;;  %v2491_v41 = vpop.permute.xlu1 %2490 }
 0x3f3   :  { %v2730_v44 = vmul.f32 %v2491_v41, %v4764_v28  ;;  %v2733_v48 = vmul.f32 %v2503_v37, %v4782_v33 }
 0x3f5   :  { %2865 = vrot.lane.b32.xlu0 %v2731_v42, %s3704_s5  ;;  %2863 = vrot.lane.b32.xlu1 %v2730_v44, %s3704_s5 }
 0x3f6   :  { %v2511_v32 = vpop.permute.xlu0 %2510  ;;  %v2499_v38 = vpop.permute.xlu1 %2498 }
 0x3f7   :  { %v2732_v27 = vmul.f32 %v2499_v38, %v4772_v29  ;;  %v2735_v30 = vmul.f32 %v2511_v32, %v4790_v36 }
 0x3f9   :  { %2869 = vrot.lane.b32.xlu0 %v2733_v48, %s3704_s5  ;;  %2867 = vrot.lane.b32.xlu1 %v2732_v27, %s3704_s5 }
 0x3fa   :  { %v2519_v43 = vpop.permute.xlu0 %2518  ;;  %v2507_v39 = vpop.permute.xlu1 %2506 }
 0x3fb   :  { %v2734_v28 = vmul.f32 %v2507_v39, %v4780_v34  ;;  %v2737_v33 = vmul.f32 %v2519_v43, %v4798_v21 }
 0x3fd   :  { %2873 = vrot.lane.b32.xlu0 %v2735_v30, %s3704_s5  ;;  %2871 = vrot.lane.b32.xlu1 %v2734_v28, %s3704_s5 }
 0x3fe   :  { %v2527_v46 = vpop.permute.xlu0 %2526  ;;  %v2515_v31 = vpop.permute.xlu1 %2514 }
 0x3ff   :  { %v2736_v29 = vmul.f32 %v2515_v31, %v4788_v25  ;;  %v2739_v36 = vmul.f32 %v2527_v46, %v4806_v19 }
 0x401   :  { %2877 = vrot.lane.b32.xlu0 %v2737_v33, %s3704_s5  ;;  %2875 = vrot.lane.b32.xlu1 %v2736_v29, %s3704_s5 }
 0x402   :  { %v2535_v23 = vpop.permute.xlu0 %2534  ;;  %v2523_v4 = vpop.permute.xlu1 %2522 }
 0x403   :  { %v2738_v34 = vmul.f32 %v2523_v4, %v4796_v26  ;;  %v2741_v21 = vmul.f32 %v2535_v23, %v4814_v17 }
 0x405   :  { %2881 = vrot.lane.b32.xlu0 %v2739_v36, %s3704_s5  ;;  %2879 = vrot.lane.b32.xlu1 %v2738_v34, %s3704_s5 }
 0x406   :  { %v2543_v37 = vpop.permute.xlu0 %2542  ;;  %v2531_v41 = vpop.permute.xlu1 %2530 }
 0x407   :  { %v2740_v25 = vmul.f32 %v2531_v41, %v4804_v24  ;;  %v2743_v19 = vmul.f32 %v2543_v37, %v4822_v15 }
 0x409   :  { %2885 = vrot.lane.b32.xlu0 %v2741_v21, %s3704_s5  ;;  %2883 = vrot.lane.b32.xlu1 %v2740_v25, %s3704_s5 }
 0x40a   :  { %v2551_v42 = vpop.permute.xlu0 %2550  ;;  %v2539_v44 = vpop.permute.xlu1 %2538 }
 0x40b   :  { %v2742_v26 = vmul.f32 %v2539_v44, %v4812_v22  ;;  %v2745_v17 = vmul.f32 %v2551_v42, %v4830_v13 }
 0x40d   :  { %2889 = vrot.lane.b32.xlu0 %v2743_v19, %s3704_s5  ;;  %2887 = vrot.lane.b32.xlu1 %v2742_v26, %s3704_s5 }
 0x40e   :  { %v2559_v32 = vpop.permute.xlu0 %2558  ;;  %v2547_v38 = vpop.permute.xlu1 %2546 }
 0x40f   :  { %v2744_v24 = vmul.f32 %v2547_v38, %v4820_v20  ;;  %v2747_v15 = vmul.f32 %v2559_v32, %v4838_v11 }
 0x411   :  { %2893 = vrot.lane.b32.xlu0 %v2745_v17, %s3704_s5  ;;  %2891 = vrot.lane.b32.xlu1 %v2744_v24, %s3704_s5 }
 0x412   :  { %v2567_v48 = vpop.permute.xlu0 %2566  ;;  %v2555_v27 = vpop.permute.xlu1 %2554 }
 0x413   :  { %v2746_v22 = vmul.f32 %v2555_v27, %v4828_v18  ;;  %v2749_v13 = vmul.f32 %v2567_v48, %v4846_v8 }
 0x415   :  { %2897 = vrot.lane.b32.xlu0 %v2747_v15, %s3704_s5  ;;  %2895 = vrot.lane.b32.xlu1 %v2746_v22, %s3704_s5 }
 0x416   :  { %v2575_v43 = vpop.permute.xlu0 %2574  ;;  %v2563_v39 = vpop.permute.xlu1 %2562 }
 0x417   :  { %v2748_v20 = vmul.f32 %v2563_v39, %v4836_v16  ;;  %v2751_v11 = vmul.f32 %v2575_v43, %v4854_v6 }
 0x419   :  { %2901 = vrot.lane.b32.xlu0 %v2749_v13, %s3704_s5  ;;  %2899 = vrot.lane.b32.xlu1 %v2748_v20, %s3704_s5  ;;  %v5826_v13 = vld [vmem:[#allocation12_spill] sm:$0xff] }
 0x41a   :  { %v2583_v30 = vpop.permute.xlu0 %2582  ;;  %v2571_v28 = vpop.permute.xlu1 %2570 }
 0x41b   :  { %v2750_v18 = vmul.f32 %v2571_v28, %v4844_v14  ;;  %v2753_v8 = vmul.f32 %v2583_v30, %v4862_v3  ;;  %v5827_v28 = vld [vmem:[#allocation74_spill] sm:$0xff] }
 0x41d   :  { %2905 = vrot.lane.b32.xlu0 %v2751_v11, %s3704_s5  ;;  %2903 = vrot.lane.b32.xlu1 %v2750_v18, %s3704_s5  ;;  %v5828_v11 = vld [vmem:[#allocation72_spill] sm:$0xff] }
 0x41e   :  { %v2591_v46 = vpop.permute.xlu0 %2590  ;;  %v2579_v31 = vpop.permute.xlu1 %2578 }
 0x41f   :  { %v2752_v16 = vmul.f32 %v2579_v31, %v4852_v12  ;;  %v2755_v6 = vmul.f32 %v2591_v46, %v4870_v1  ;;  %v5829_v31 = vld [vmem:[#allocation76_spill] sm:$0xff] }
 0x421   :  { %2909 = vrot.lane.b32.xlu0 %v2753_v8, %s3704_s5  ;;  %2907 = vrot.lane.b32.xlu1 %v2752_v16, %s3704_s5  ;;  %v5830_v8 = vld [vmem:[#allocation73_spill] sm:$0xff] }
 0x422   :  { %v2599_v33 = vpop.permute.xlu0 %2598  ;;  %v2587_v29 = vpop.permute.xlu1 %2586 }
 0x423   :  { %v2754_v14 = vmul.f32 %v2587_v29, %v4860_v10  ;;  %v2757_v3 = vmul.f32 %v2599_v33, %v4878_v63 }
 0x425   :  { %2913 = vrot.lane.b32.xlu0 %v2755_v6, %s3704_s5  ;;  %2911 = vrot.lane.b32.xlu1 %v2754_v14, %s3704_s5  ;;  %v5831_v6 = vld [vmem:[#allocation78_spill] sm:$0xff] }
 0x426   :  { %v2607_v23 = vpop.permute.xlu0 %2606  ;;  %v2595_v4 = vpop.permute.xlu1 %2594 }
 0x427   :  { %v2756_v12 = vmul.f32 %v2595_v4, %v4868_v7  ;;  %v2759_v1 = vmul.f32 %v2607_v23, %v4886_v61  ;;  %v5832_v23 = vld [vmem:[#allocation75_spill] sm:$0xff] }
 0x429   :  { %2917 = vrot.lane.b32.xlu0 %v2757_v3, %s3704_s5  ;;  %2915 = vrot.lane.b32.xlu1 %v2756_v12, %s3704_s5 }
 0x42a   :  { %v2615_v36 = vpop.permute.xlu0 %2614  ;;  %v2603_v34 = vpop.permute.xlu1 %2602 }
 0x42b   :  { %v2758_v10 = vmul.f32 %v2603_v34, %v4876_v5  ;;  %v2761_v63 = vmul.f32 %v2615_v36, %v4894_v59  ;;  %v3609_v36 = vld [vmem:[#allocation4] sm:$0xff]  ;;  %v5833_v34 = vld [vmem:[#allocation14_spill] sm:$0xff] }
 0x42d   :  { %2921 = vrot.lane.b32.xlu0 %v2759_v1, %s3704_s5  ;;  %2919 = vrot.lane.b32.xlu1 %v2758_v10, %s3704_s5  ;;  %v1765_v1 = vmul.f32 %v3609_v36, %v5833_v34  ;;  %v5851_v36 = vld [vmem:[#allocation19_spill] sm:$0xff] }
 0x42e   :  { %v2623_v37 = vpop.permute.xlu0 %2622  ;;  %v2611_v41 = vpop.permute.xlu1 %2610 }
 0x42f   :  { %v2760_v7 = vmul.f32 %v2611_v41, %v4884_v2  ;;  %v2763_v61 = vmul.f32 %v2623_v37, %v4902_v57  ;;  %v5834_v37 = vld [vmem:[#allocation77_spill] sm:$0xff] }
 0x431   :  { %2925 = vrot.lane.b32.xlu0 %v2761_v63, %s3704_s5  ;;  %2923 = vrot.lane.b32.xlu1 %v2760_v7, %s3704_s5  ;;  %v2405_v63 = vadd.f32 %v5006_v50, %v1765_v1  ;;  %v3618_v1 = vld [vmem:[#allocation4 + $0x50] sm:$0xff] }
 0x432   :  { %v2631_v21 = vpop.permute.xlu0 %2630  ;;  %v2619_v25 = vpop.permute.xlu1 %2618 }
 0x433   :  { %v2762_v5 = vmul.f32 %v2619_v25, %v4892_v0  ;;  %v2765_v59 = vmul.f32 %v2631_v21, %v4910_v55  ;;  %v3610_v25 = vld [vmem:[#allocation4 + $0x10] sm:$0xff] }
 0x435   :  { %2929 = vrot.lane.b32.xlu0 %v2763_v61, %s3704_s5  ;;  %2927 = vrot.lane.b32.xlu1 %v2762_v5, %s3704_s5  ;;  %v5835_v61 = vld [vmem:[#allocation13_spill] sm:$0xff] }
 0x436   :  { %v2639_v42 = vpop.permute.xlu0 %2638  ;;  %v2627_v44 = vpop.permute.xlu1 %2626  ;;  %v1767_v5 = vmul.f32 %v3610_v25, %v5835_v61  ;;  %v5854_v25 = vld [vmem:[#allocation91_spill] sm:$0xff] }
 0x437   :  { %v2764_v2 = vmul.f32 %v2627_v44, %v4900_v62  ;;  %v2767_v57 = vmul.f32 %v2639_v42, %v4918_v54 }
 0x439   :  { %2933 = vrot.lane.b32.xlu0 %v2765_v59, %s3704_s5  ;;  %2931 = vrot.lane.b32.xlu1 %v2764_v2, %s3704_s5  ;;  %v5836_v59 = vld [vmem:[#allocation79_spill] sm:$0xff] }
 0x43a   :  { %v2647_v19 = vpop.permute.xlu0 %2646  ;;  %v2635_v26 = vpop.permute.xlu1 %2634 }
 0x43b   :  { %v2766_v0 = vmul.f32 %v2635_v26, %v4908_v60  ;;  %v2769_v55 = vmul.f32 %v2647_v19, %v4926_v52 }
 0x43d   :  { %2937 = vrot.lane.b32.xlu0 %v2767_v57, %s3704_s5  ;;  %2935 = vrot.lane.b32.xlu1 %v2766_v0, %s3704_s5  ;;  %v3611_v57 = vld [vmem:[#allocation4 + $0x8] sm:$0xff] }
 0x43e   :  { %v2655_v32 = vpop.permute.xlu0 %2654  ;;  %v2643_v38 = vpop.permute.xlu1 %2642  ;;  %v5838_v0 = vld [vmem:[#allocation16_spill] sm:$0xff] }
 0x43f   :  { %v2768_v62 = vmul.f32 %v2643_v38, %v4916_v58  ;;  %v2771_v54 = vmul.f32 %v2655_v32, %v4934_v51  ;;  %v1766_v32 = vmul.f32 %v3611_v57, %v5838_v0  ;;  %v3612_v38 = vld [vmem:[#allocation4 + $0x20] sm:$0xff]  ;;  %v5857_v0 = vld [vmem:[#allocation88_spill] sm:$0xff] }
 0x441   :  { %2941 = vrot.lane.b32.xlu0 %v2769_v55, %s3704_s5  ;;  %2939 = vrot.lane.b32.xlu1 %v2768_v62, %s3704_s5  ;;  %v5839_v55 = vld [vmem:[#allocation18_spill] sm:$0xff] }
 0x442   :  { %v2663_v17 = vpop.permute.xlu0 %2662  ;;  %v2651_v24 = vpop.permute.xlu1 %2650  ;;  %v1769_v62 = vmul.f32 %v3612_v38, %v5839_v55  ;;  %v5858_v38 = vld [vmem:[#allocation93_spill] sm:$0xff] }
 0x443   :  { %v2770_v60 = vmul.f32 %v2651_v24, %v4924_v56  ;;  %v2773_v52 = vmul.f32 %v2663_v17, %v4942_v49  ;;  %v5840_v17 = vld [vmem:[#allocation80_spill] sm:$0xff] }
 0x445   :  { %2945 = vrot.lane.b32.xlu0 %v2771_v54, %s3704_s5  ;;  %2943 = vrot.lane.b32.xlu1 %v2770_v60, %s3704_s5  ;;  %v5841_v54 = vld [vmem:[#allocation81_spill] sm:$0xff] }
 0x446   :  { %v2671_v48 = vpop.permute.xlu0 %2670  ;;  %v2659_v27 = vpop.permute.xlu1 %2658  ;;  %v2406_v60 = vadd.f32 %v5841_v54, %v1766_v32 }
 0x447   :  { %v2772_v58 = vmul.f32 %v2659_v27, %v4932_v9  ;;  %v2775_v51 = vmul.f32 %v2671_v48, %v4950_v47  ;;  %v5842_v48 = vld [vmem:[#allocation85_spill] sm:$0xff] }
 0x448   :  { %v2409_v27 = vadd.f32 %v5842_v48, %v1769_v62  ;;  %v5860_v48 = vld [vmem:[#allocation28_spill] sm:$0xff] }
 0x449   :  { %2949 = vrot.lane.b32.xlu0 %v2773_v52, %s3704_s5  ;;  %2947 = vrot.lane.b32.xlu1 %v2772_v58, %s3704_s5 }
 0x44a   :  { %v2679_v15 = vpop.permute.xlu0 %2678  ;;  %v2667_v22 = vpop.permute.xlu1 %2666 }
 0x44b   :  { %v2774_v56 = vmul.f32 %v2667_v22, %v4940_v53  ;;  %v2777_v49 = vmul.f32 %v2679_v15, %v4958_v45  ;;  %v3613_v15 = vld [vmem:[#allocation4 + $0x18] sm:$0xff]  ;;  %v5843_v22 = vld [vmem:[#allocation15_spill] sm:$0xff] }
 0x44d   :  { %2953 = vrot.lane.b32.xlu0 %v2775_v51, %s3704_s5  ;;  %2951 = vrot.lane.b32.xlu1 %v2774_v56, %s3704_s5  ;;  %v1768_v51 = vmul.f32 %v3613_v15, %v5843_v22  ;;  %v3614_v56 = vld [vmem:[#allocation4 + $0x30] sm:$0xff]  ;;  %v5861_v15 = vld [vmem:[#allocation90_spill] sm:$0xff] }
 0x44e   :  { %v2687_v43 = vpop.permute.xlu0 %2686  ;;  %v2675_v39 = vpop.permute.xlu1 %2674 }
 0x44f   :  { %v2776_v9 = vmul.f32 %v2675_v39, %v5826_v13  ;;  %v2779_v47 = vmul.f32 %v2687_v43, %v5827_v28  ;;  %v5844_v43 = vld [vmem:[#allocation20_spill] sm:$0xff] }
 0x450   :  { %v1771_v39 = vmul.f32 %v3614_v56, %v5844_v43 }
 0x451   :  { %2957 = vrot.lane.b32.xlu0 %v2777_v49, %s3704_s5  ;;  %2955 = vrot.lane.b32.xlu1 %v2776_v9, %s3704_s5  ;;  %v5845_v9 = vld [vmem:[#allocation82_spill] sm:$0xff] }
 0x452   :  { %v2695_v20 = vpop.permute.xlu0 %2694  ;;  %v2683_v30 = vpop.permute.xlu1 %2682 }
 0x453   :  { %v2778_v53 = vmul.f32 %v2683_v30, %v5828_v11  ;;  %v2781_v45 = vmul.f32 %v2695_v20, %v5829_v31  ;;  %v2408_v20 = vadd.f32 %v5845_v9, %v1768_v51  ;;  %v5846_v30 = vld [vmem:[#allocation87_spill] sm:$0xff] }
 0x454   :  { %v2411_v28 = vadd.f32 %v5846_v30, %v1771_v39  ;;  %v3616_v31 = vld [vmem:[#allocation4 + $0x40] sm:$0xff]  ;;  %v5864_v30 = vld [vmem:[#allocation30_spill] sm:$0xff] }
 0x455   :  { %2961 = vrot.lane.b32.xlu0 %v2779_v47, %s3704_s5  ;;  %2959 = vrot.lane.b32.xlu1 %v2778_v53, %s3704_s5  ;;  %v3615_v53 = vld [vmem:[#allocation4 + $0x28] sm:$0xff]  ;;  %v5862_v51 = vld [vmem:[#allocation95_spill] sm:$0xff] }
 0x456   :  { %v2703_v18 = vpop.permute.xlu0 %2702  ;;  %v2691_v46 = vpop.permute.xlu1 %2690 }
 0x457   :  { %v2780_v16 = vmul.f32 %v2691_v46, %v5830_v8  ;;  %v2783_v14 = vmul.f32 %v2703_v18, %v5831_v6  ;;  %v5847_v18 = vld [vmem:[#allocation17_spill] sm:$0xff] }
 0x458   :  { %v1770_v46 = vmul.f32 %v3615_v53, %v5847_v18  ;;  %v5865_v53 = vld [vmem:[#allocation92_spill] sm:$0xff] }
 0x459   :  { %2965 = vrot.lane.b32.xlu0 %v2781_v45, %s3704_s5  ;;  %2963 = vrot.lane.b32.xlu1 %v2780_v16, %s3704_s5  ;;  %v5848_v45 = vld [vmem:[#allocation22_spill] sm:$0xff] }
 0x45a   :  { %v2711_v33 = vpop.permute.xlu0 %2710  ;;  %v2699_v29 = vpop.permute.xlu1 %2698  ;;  %v1773_v8 = vmul.f32 %v3616_v31, %v5848_v45 }
 0x45b   :  { %v2782_v4 = vmul.f32 %v2699_v29, %v5832_v23  ;;  %v2785_v10 = vmul.f32 %v2711_v33, %v4990_v40  ;;  %v5837_v40 = vld [vmem:[#allocation83_spill] sm:$0xff]  ;;  %v5849_v29 = vld [vmem:[#allocation84_spill] sm:$0xff] }
 0x45c   :  { %v2407_v19 = vadd.f32 %v5837_v40, %v1767_v5  ;;  %v2410_v6 = vadd.f32 %v5849_v29, %v1770_v46  ;;  %v3620_v40 = vld [vmem:[#allocation4 + $0x60] sm:$0xff]  ;;  %v5866_v46 = vld [vmem:[#allocation97_spill] sm:$0xff] }
 0x45d   :  { %2969 = vrot.lane.b32.xlu0 %v2783_v14, %s3704_s5  ;;  %2967 = vrot.lane.b32.xlu1 %v2782_v4, %s3704_s5  ;;  %v5850_v14 = vld [vmem:[#allocation89_spill] sm:$0xff] }
 0x45e   :  { %v2719_v3 = vpop.permute.xlu0 %2718  ;;  %v2707_v12 = vpop.permute.xlu1 %2706  ;;  %v2413_v23 = vadd.f32 %v5850_v14, %v1773_v8  ;;  %v5868_v14 = vld [vmem:[#allocation32_spill] sm:$0xff] }
 0x45f   :  { %v2784_v41 = vmul.f32 %v2707_v12, %v5834_v37  ;;  %v2787_v42 = vmul.f32 %v2719_v3, %v4998_v35  ;;  %v3617_v12 = vld [vmem:[#allocation4 + $0x38] sm:$0xff] }
 0x460   :  { %v1772_v34 = vmul.f32 %v3617_v12, %v5851_v36  ;;  %v5869_v12 = vld [vmem:[#allocation94_spill] sm:$0xff] }
 0x461   :  { %2973 = vrot.lane.b32.xlu0 %v2785_v10, %s3704_s5  ;;  %2971 = vrot.lane.b32.xlu1 %v2784_v41, %s3704_s5  ;;  %v5852_v10 = vld [vmem:[#allocation24_spill] sm:$0xff] }
 0x462   :  { %v2854_v7 = vpop.permute.xlu0 %2853  ;;  %v2715_v21 = vpop.permute.xlu1 %2714  ;;  %v1775_v37 = vmul.f32 %v3618_v1, %v5852_v10 }
 0x463   :  { %v3045_v44 = vadd.f32 %v2854_v7, %v2405_v63  ;;  %v2786_v2 = vmul.f32 %v2715_v21, %v5836_v59  ;;  %v5853_v7 = vld [vmem:[#allocation86_spill] sm:$0xff]  ;;  %v5855_v59 = vld [vmem:[#allocation21_spill] sm:$0xff] }
 0x464   :  { %v2412_v21 = vadd.f32 %v5853_v7, %v1772_v34  ;;  %v2415_v61 = vadd.f32 %v5854_v25, %v1775_v37  ;;  %v5870_v34 = vld [vmem:[#allocation99_spill] sm:$0xff]  ;;  %v5872_v25 = vld [vmem:[#allocation34_spill] sm:$0xff] }
 0x465   :  { %3110 = vst.msk [vmem:[#allocation4] sm:$0xff] %vm3109_vm4, %v3045_v44  ;;  %2977 = vrot.lane.b32.xlu0 %v2787_v42, %s3704_s5  ;;  %2975 = vrot.lane.b32.xlu1 %v2786_v2, %s3704_s5  ;;  %v3619_v44 = vld [vmem:[#allocation4 + $0x48] sm:$0xff] }
 0x466   :  { %v2858_v50 = vpop.permute.xlu0 %2857  ;;  %v2723_v26 = vpop.permute.xlu1 %2722  ;;  %v1774_v2 = vmul.f32 %v3619_v44, %v5855_v59  ;;  %v5873_v44 = vld [vmem:[#allocation96_spill] sm:$0xff] }
 0x467   :  { %v3047_v35 = vadd.f32 %v2858_v50, %v2407_v19  ;;  %v2788_v24 = vmul.f32 %v2723_v26, %v5840_v17  ;;  %v5856_v19 = vld [vmem:[#allocation26_spill] sm:$0xff] }
 0x468   :  { %v1777_v50 = vmul.f32 %v3620_v40, %v5856_v19  ;;  %v2414_v32 = vadd.f32 %v5857_v0, %v1774_v2  ;;  %v3621_v17 = vld [vmem:[#allocation4 + $0x58] sm:$0xff]  ;;  %v5874_v2 = vld [vmem:[#allocation101_spill] sm:$0xff] }
 0x469   :  { %3112 = vst.msk [vmem:[#allocation4 + $0x10] sm:$0xff] %vm3109_vm4, %v3047_v35  ;;  %2979 = vrot.lane.b32.xlu1 %v2788_v24, %s3704_s5  ;;  %v5859_v24 = vld [vmem:[#allocation23_spill] sm:$0xff] }
 0x46a   :  { %v2862_v52 = vpop.permute.xlu0 %2861  ;;  %v2856_v58 = vpop.permute.xlu1 %2855  ;;  %v2417_v55 = vadd.f32 %v5858_v38, %v1777_v50  ;;  %v1776_v54 = vmul.f32 %v3621_v17, %v5859_v24  ;;  %v5876_v38 = vld [vmem:[#allocation36_spill] sm:$0xff]  ;;  %v5877_v17 = vld [vmem:[#allocation98_spill] sm:$0xff] }
 0x46b   :  { %v3049_v49 = vadd.f32 %v2862_v52, %v2409_v27  ;;  %v3046_v13 = vadd.f32 %v2856_v58, %v2406_v60  ;;  %v3622_v60 = vld [vmem:[#allocation4 + $0x70] sm:$0xff] }
 0x46c   :  { %v1779_v27 = vmul.f32 %v3622_v60, %v5860_v48  ;;  %v2416_v22 = vadd.f32 %v5861_v15, %v1776_v54  ;;  %v5878_v54 = vld [vmem:[#allocation103_spill] sm:$0xff] }
 0x46d   :  { %3114 = vst.msk [vmem:[#allocation4 + $0x20] sm:$0xff] %vm3109_vm4, %v3049_v49  ;;  %3111 = vst.msk [vmem:[#allocation4 + $0x8] sm:$0xff] %vm3109_vm4, %v3046_v13  ;;  %v3623_v49 = vld [vmem:[#allocation4 + $0x68] sm:$0xff]  ;;  %v5863_v13 = vld [vmem:[#allocation25_spill] sm:$0xff] }
 0x46e   :  { %v2866_v47 = vpop.permute.xlu0 %2865  ;;  %v2860_v11 = vpop.permute.xlu1 %2859  ;;  %v2419_v56 = vadd.f32 %v5862_v51, %v1779_v27  ;;  %v1778_v9 = vmul.f32 %v3623_v49, %v5863_v13  ;;  %v5880_v51 = vld [vmem:[#allocation38_spill] sm:$0xff]  ;;  %v5881_v49 = vld [vmem:[#allocation100_spill] sm:$0xff] }
 0x46f   :  { %v3051_v16 = vadd.f32 %v2866_v47, %v2411_v28  ;;  %v3048_v33 = vadd.f32 %v2860_v11, %v2408_v20  ;;  %v3624_v20 = vld [vmem:[#allocation4 + $0x80] sm:$0xff] }
 0x470   :  { %v1781_v28 = vmul.f32 %v3624_v20, %v5864_v30  ;;  %v2418_v18 = vadd.f32 %v5865_v53, %v1778_v9  ;;  %v5882_v9 = vld [vmem:[#allocation105_spill] sm:$0xff] }
 0x471   :  { %3116 = vst.msk [vmem:[#allocation4 + $0x30] sm:$0xff] %vm3109_vm4, %v3051_v16  ;;  %3113 = vst.msk [vmem:[#allocation4 + $0x18] sm:$0xff] %vm3109_vm4, %v3048_v33  ;;  %v3625_v16 = vld [vmem:[#allocation4 + $0x78] sm:$0xff]  ;;  %v5867_v33 = vld [vmem:[#allocation27_spill] sm:$0xff] }
 0x472   :  { %v2870_v4 = vpop.permute.xlu0 %2869  ;;  %v2864_v3 = vpop.permute.xlu1 %2863  ;;  %v2421_v31 = vadd.f32 %v5866_v46, %v1781_v28  ;;  %v1780_v29 = vmul.f32 %v3625_v16, %v5867_v33  ;;  %v5884_v46 = vld [vmem:[#allocation40_spill] sm:$0xff]  ;;  %v5885_v16 = vld [vmem:[#allocation102_spill] sm:$0xff] }
 0x473   :  { %v3053_v41 = vadd.f32 %v2870_v4, %v2413_v23  ;;  %v3050_v63 = vadd.f32 %v2864_v3, %v2410_v6  ;;  %v3626_v6 = vld [vmem:[#allocation4 + $0x90] sm:$0xff] }
 0x474   :  { %v1783_v23 = vmul.f32 %v3626_v6, %v5868_v14  ;;  %v2420_v36 = vadd.f32 %v5869_v12, %v1780_v29  ;;  %v5886_v29 = vld [vmem:[#allocation107_spill] sm:$0xff] }
 0x475   :  { %3118 = vst.msk [vmem:[#allocation4 + $0x40] sm:$0xff] %vm3109_vm4, %v3053_v41  ;;  %3115 = vst.msk [vmem:[#allocation4 + $0x28] sm:$0xff] %vm3109_vm4, %v3050_v63  ;;  %v3627_v41 = vld [vmem:[#allocation4 + $0x88] sm:$0xff]  ;;  %v5871_v63 = vld [vmem:[#allocation29_spill] sm:$0xff] }
 0x476   :  { %v2874_v5 = vpop.permute.xlu0 %2873  ;;  %v2868_v42 = vpop.permute.xlu1 %2867  ;;  %v2423_v1 = vadd.f32 %v5870_v34, %v1783_v23  ;;  %v1782_v7 = vmul.f32 %v3627_v41, %v5871_v63  ;;  %v5888_v34 = vld [vmem:[#allocation42_spill] sm:$0xff]  ;;  %v5889_v41 = vld [vmem:[#allocation104_spill] sm:$0xff] }
 0x477   :  { %v3055_v26 = vadd.f32 %v2874_v5, %v2415_v61  ;;  %v3052_v57 = vadd.f32 %v2868_v42, %v2412_v21  ;;  %v3628_v21 = vld [vmem:[#allocation4 + $0xa0] sm:$0xff] }
 0x478   :  { %v1785_v61 = vmul.f32 %v3628_v21, %v5872_v25  ;;  %v2422_v59 = vadd.f32 %v5873_v44, %v1782_v7  ;;  %v5890_v7 = vld [vmem:[#allocation109_spill] sm:$0xff] }
 0x479   :  { %3120 = vst.msk [vmem:[#allocation4 + $0x50] sm:$0xff] %vm3109_vm4, %v3055_v26  ;;  %3117 = vst.msk [vmem:[#allocation4 + $0x38] sm:$0xff] %vm3109_vm4, %v3052_v57  ;;  %v3629_v26 = vld [vmem:[#allocation4 + $0x98] sm:$0xff]  ;;  %v5875_v57 = vld [vmem:[#allocation31_spill] sm:$0xff] }
 0x47a   :  { %v2878_v62 = vpop.permute.xlu0 %2877  ;;  %v2872_v35 = vpop.permute.xlu1 %2871  ;;  %v2425_v40 = vadd.f32 %v5874_v2, %v1785_v61  ;;  %v1784_v0 = vmul.f32 %v3629_v26, %v5875_v57  ;;  %v5892_v2 = vld [vmem:[#allocation44_spill] sm:$0xff]  ;;  %v5893_v26 = vld [vmem:[#allocation106_spill] sm:$0xff] }
 0x47b   :  { %v3057_v52 = vadd.f32 %v2878_v62, %v2417_v55  ;;  %v3054_v58 = vadd.f32 %v2872_v35, %v2414_v32  ;;  %v3630_v32 = vld [vmem:[#allocation4 + $0xb0] sm:$0xff] }
 0x47c   :  { %v1787_v55 = vmul.f32 %v3630_v32, %v5876_v38  ;;  %v2424_v24 = vadd.f32 %v5877_v17, %v1784_v0  ;;  %v5894_v0 = vld [vmem:[#allocation111_spill] sm:$0xff] }
 0x47d   :  { %3122 = vst.msk [vmem:[#allocation4 + $0x60] sm:$0xff] %vm3109_vm4, %v3057_v52  ;;  %3119 = vst.msk [vmem:[#allocation4 + $0x48] sm:$0xff] %vm3109_vm4, %v3054_v58  ;;  %v3631_v52 = vld [vmem:[#allocation4 + $0xa8] sm:$0xff]  ;;  %v5879_v58 = vld [vmem:[#allocation33_spill] sm:$0xff] }
 0x47e   :  { %v2882_v43 = vpop.permute.xlu0 %2881  ;;  %v2876_v39 = vpop.permute.xlu1 %2875  ;;  %v2427_v60 = vadd.f32 %v5878_v54, %v1787_v55  ;;  %v1786_v15 = vmul.f32 %v3631_v52, %v5879_v58  ;;  %v5896_v54 = vld [vmem:[#allocation46_spill] sm:$0xff]  ;;  %v5897_v52 = vld [vmem:[#allocation108_spill] sm:$0xff] }
 0x47f   :  { %v3059_v47 = vadd.f32 %v2882_v43, %v2419_v56  ;;  %v3056_v11 = vadd.f32 %v2876_v39, %v2416_v22  ;;  %v3632_v22 = vld [vmem:[#allocation4 + $0xc0] sm:$0xff] }
 0x480   :  { %v1789_v56 = vmul.f32 %v3632_v22, %v5880_v51  ;;  %v2426_v13 = vadd.f32 %v5881_v49, %v1786_v15  ;;  %v5898_v15 = vld [vmem:[#allocation113_spill] sm:$0xff] }
 0x481   :  { %3124 = vst.msk [vmem:[#allocation4 + $0x70] sm:$0xff] %vm3109_vm4, %v3059_v47  ;;  %3121 = vst.msk [vmem:[#allocation4 + $0x58] sm:$0xff] %vm3109_vm4, %v3056_v11  ;;  %v3633_v47 = vld [vmem:[#allocation4 + $0xb8] sm:$0xff]  ;;  %v5883_v11 = vld [vmem:[#allocation35_spill] sm:$0xff] }
 0x482   :  { %v2886_v45 = vpop.permute.xlu0 %2885  ;;  %v2880_v8 = vpop.permute.xlu1 %2879  ;;  %v2429_v20 = vadd.f32 %v5882_v9, %v1789_v56  ;;  %v1788_v53 = vmul.f32 %v3633_v47, %v5883_v11  ;;  %v5900_v9 = vld [vmem:[#allocation48_spill] sm:$0xff]  ;;  %v5901_v47 = vld [vmem:[#allocation110_spill] sm:$0xff] }
 0x483   :  { %v3061_v4 = vadd.f32 %v2886_v45, %v2421_v31  ;;  %v3058_v3 = vadd.f32 %v2880_v8, %v2418_v18  ;;  %v3634_v18 = vld [vmem:[#allocation4 + $0xd0] sm:$0xff] }
 0x484   :  { %v1791_v31 = vmul.f32 %v3634_v18, %v5884_v46  ;;  %v2428_v33 = vadd.f32 %v5885_v16, %v1788_v53  ;;  %v5902_v53 = vld [vmem:[#allocation115_spill] sm:$0xff] }
 0x485   :  { %3126 = vst.msk [vmem:[#allocation4 + $0x80] sm:$0xff] %vm3109_vm4, %v3061_v4  ;;  %3123 = vst.msk [vmem:[#allocation4 + $0x68] sm:$0xff] %vm3109_vm4, %v3058_v3  ;;  %v3635_v4 = vld [vmem:[#allocation4 + $0xc8] sm:$0xff]  ;;  %v5887_v3 = vld [vmem:[#allocation37_spill] sm:$0xff] }
 0x486   :  { %v2890_v10 = vpop.permute.xlu0 %2889  ;;  %v2884_v37 = vpop.permute.xlu1 %2883  ;;  %v2431_v6 = vadd.f32 %v5886_v29, %v1791_v31  ;;  %v1790_v12 = vmul.f32 %v3635_v4, %v5887_v3  ;;  %v5904_v29 = vld [vmem:[#allocation50_spill] sm:$0xff]  ;;  %v5905_v4 = vld [vmem:[#allocation112_spill] sm:$0xff] }
 0x487   :  { %v3063_v5 = vadd.f32 %v2890_v10, %v2423_v1  ;;  %v3060_v42 = vadd.f32 %v2884_v37, %v2420_v36  ;;  %v3636_v36 = vld [vmem:[#allocation4 + $0xe0] sm:$0xff] }
 0x488   :  { %v1793_v1 = vmul.f32 %v3636_v36, %v5888_v34  ;;  %v2430_v63 = vadd.f32 %v5889_v41, %v1790_v12  ;;  %v5906_v12 = vld [vmem:[#allocation117_spill] sm:$0xff] }
 0x489   :  { %3128 = vst.msk [vmem:[#allocation4 + $0x90] sm:$0xff] %vm3109_vm4, %v3063_v5  ;;  %3125 = vst.msk [vmem:[#allocation4 + $0x78] sm:$0xff] %vm3109_vm4, %v3060_v42  ;;  %v3637_v5 = vld [vmem:[#allocation4 + $0xd8] sm:$0xff]  ;;  %v5891_v42 = vld [vmem:[#allocation39_spill] sm:$0xff] }
 0x48a   :  { %v2894_v19 = vpop.permute.xlu0 %2893  ;;  %v2888_v50 = vpop.permute.xlu1 %2887  ;;  %v2433_v21 = vadd.f32 %v5890_v7, %v1793_v1  ;;  %v1792_v44 = vmul.f32 %v3637_v5, %v5891_v42  ;;  %v5908_v7 = vld [vmem:[#allocation52_spill] sm:$0xff]  ;;  %v5909_v5 = vld [vmem:[#allocation114_spill] sm:$0xff] }
 0x48b   :  { %v3065_v62 = vadd.f32 %v2894_v19, %v2425_v40  ;;  %v3062_v35 = vadd.f32 %v2888_v50, %v2422_v59  ;;  %v3638_v59 = vld [vmem:[#allocation4 + $0xf0] sm:$0xff] }
 0x48c   :  { %v1795_v40 = vmul.f32 %v3638_v59, %v5892_v2  ;;  %v2432_v57 = vadd.f32 %v5893_v26, %v1792_v44  ;;  %v5910_v44 = vld [vmem:[#allocation119_spill] sm:$0xff] }
 0x48d   :  { %3130 = vst.msk [vmem:[#allocation4 + $0xa0] sm:$0xff] %vm3109_vm4, %v3065_v62  ;;  %3127 = vst.msk [vmem:[#allocation4 + $0x88] sm:$0xff] %vm3109_vm4, %v3062_v35  ;;  %v3639_v62 = vld [vmem:[#allocation4 + $0xe8] sm:$0xff]  ;;  %v5895_v35 = vld [vmem:[#allocation41_spill] sm:$0xff] }
 0x48e   :  { %v2898_v48 = vpop.permute.xlu0 %2897  ;;  %v2892_v27 = vpop.permute.xlu1 %2891  ;;  %v2435_v32 = vadd.f32 %v5894_v0, %v1795_v40  ;;  %v1794_v17 = vmul.f32 %v3639_v62, %v5895_v35  ;;  %v5912_v0 = vld [vmem:[#allocation54_spill] sm:$0xff]  ;;  %v5913_v62 = vld [vmem:[#allocation116_spill] sm:$0xff] }
 0x48f   :  { %v3067_v43 = vadd.f32 %v2898_v48, %v2427_v60  ;;  %v3064_v39 = vadd.f32 %v2892_v27, %v2424_v24  ;;  %v3640_v24 = vld [vmem:[#allocation4 + $0x100] sm:$0xff] }
 0x490   :  { %v1797_v60 = vmul.f32 %v3640_v24, %v5896_v54  ;;  %v2434_v58 = vadd.f32 %v5897_v52, %v1794_v17  ;;  %v5914_v17 = vld [vmem:[#allocation121_spill] sm:$0xff] }
 0x491   :  { %3132 = vst.msk [vmem:[#allocation4 + $0xb0] sm:$0xff] %vm3109_vm4, %v3067_v43  ;;  %3129 = vst.msk [vmem:[#allocation4 + $0x98] sm:$0xff] %vm3109_vm4, %v3064_v39  ;;  %v3641_v43 = vld [vmem:[#allocation4 + $0xf8] sm:$0xff]  ;;  %v5899_v39 = vld [vmem:[#allocation43_spill] sm:$0xff] }
 0x492   :  { %v2902_v30 = vpop.permute.xlu0 %2901  ;;  %v2896_v28 = vpop.permute.xlu1 %2895  ;;  %v2437_v22 = vadd.f32 %v5898_v15, %v1797_v60  ;;  %v1796_v49 = vmul.f32 %v3641_v43, %v5899_v39  ;;  %v5916_v15 = vld [vmem:[#allocation56_spill] sm:$0xff]  ;;  %v5917_v43 = vld [vmem:[#allocation118_spill] sm:$0xff] }
 0x493   :  { %v3069_v45 = vadd.f32 %v2902_v30, %v2429_v20  ;;  %v3066_v8 = vadd.f32 %v2896_v28, %v2426_v13  ;;  %v3642_v13 = vld [vmem:[#allocation4 + $0x110] sm:$0xff] }
 0x494   :  { %v1799_v20 = vmul.f32 %v3642_v13, %v5900_v9  ;;  %v2436_v11 = vadd.f32 %v5901_v47, %v1796_v49  ;;  %v5918_v49 = vld [vmem:[#allocation123_spill] sm:$0xff] }
 0x495   :  { %3134 = vst.msk [vmem:[#allocation4 + $0xc0] sm:$0xff] %vm3109_vm4, %v3069_v45  ;;  %3131 = vst.msk [vmem:[#allocation4 + $0xa8] sm:$0xff] %vm3109_vm4, %v3066_v8  ;;  %v3643_v45 = vld [vmem:[#allocation4 + $0x108] sm:$0xff]  ;;  %v5903_v8 = vld [vmem:[#allocation45_spill] sm:$0xff] }
 0x496   :  { %v2906_v14 = vpop.permute.xlu0 %2905  ;;  %v2900_v23 = vpop.permute.xlu1 %2899  ;;  %v2439_v18 = vadd.f32 %v5902_v53, %v1799_v20  ;;  %v1798_v16 = vmul.f32 %v3643_v45, %v5903_v8  ;;  %v5920_v53 = vld [vmem:[#allocation58_spill] sm:$0xff]  ;;  %v5921_v45 = vld [vmem:[#allocation120_spill] sm:$0xff] }
 0x497   :  { %v3071_v10 = vadd.f32 %v2906_v14, %v2431_v6  ;;  %v3068_v37 = vadd.f32 %v2900_v23, %v2428_v33  ;;  %v3644_v33 = vld [vmem:[#allocation4 + $0x120] sm:$0xff] }
 0x498   :  { %v1801_v6 = vmul.f32 %v3644_v33, %v5904_v29  ;;  %v2438_v3 = vadd.f32 %v5905_v4, %v1798_v16  ;;  %v5922_v16 = vld [vmem:[#allocation125_spill] sm:$0xff] }
 0x499   :  { %3136 = vst.msk [vmem:[#allocation4 + $0xd0] sm:$0xff] %vm3109_vm4, %v3071_v10  ;;  %3133 = vst.msk [vmem:[#allocation4 + $0xb8] sm:$0xff] %vm3109_vm4, %v3068_v37  ;;  %v3645_v10 = vld [vmem:[#allocation4 + $0x118] sm:$0xff]  ;;  %v5907_v37 = vld [vmem:[#allocation47_spill] sm:$0xff] }
 0x49a   :  { %v2910_v25 = vpop.permute.xlu0 %2909  ;;  %v2904_v61 = vpop.permute.xlu1 %2903  ;;  %v2441_v36 = vadd.f32 %v5906_v12, %v1801_v6  ;;  %v1800_v41 = vmul.f32 %v3645_v10, %v5907_v37  ;;  %v5924_v12 = vld [vmem:[#allocation60_spill] sm:$0xff]  ;;  %v5925_v10 = vld [vmem:[#allocation122_spill] sm:$0xff] }
 0x49b   :  { %v3073_v19 = vadd.f32 %v2910_v25, %v2433_v21  ;;  %v3070_v50 = vadd.f32 %v2904_v61, %v2430_v63  ;;  %v3646_v63 = vld [vmem:[#allocation4 + $0x130] sm:$0xff] }
 0x49c   :  { %v1803_v21 = vmul.f32 %v3646_v63, %v5908_v7  ;;  %v2440_v42 = vadd.f32 %v5909_v5, %v1800_v41  ;;  %v5926_v41 = vld [vmem:[#allocation127_spill] sm:$0xff] }
 0x49d   :  { %3138 = vst.msk [vmem:[#allocation4 + $0xe0] sm:$0xff] %vm3109_vm4, %v3073_v19  ;;  %3135 = vst.msk [vmem:[#allocation4 + $0xc8] sm:$0xff] %vm3109_vm4, %v3070_v50  ;;  %v3647_v19 = vld [vmem:[#allocation4 + $0x128] sm:$0xff]  ;;  %v5911_v50 = vld [vmem:[#allocation49_spill] sm:$0xff] }
 0x49e   :  { %v2914_v38 = vpop.permute.xlu0 %2913  ;;  %v2908_v55 = vpop.permute.xlu1 %2907  ;;  %v2443_v59 = vadd.f32 %v5910_v44, %v1803_v21  ;;  %v1802_v26 = vmul.f32 %v3647_v19, %v5911_v50  ;;  %v5928_v44 = vld [vmem:[#allocation62_spill] sm:$0xff]  ;;  %v5929_v19 = vld [vmem:[#allocation124_spill] sm:$0xff] }
 0x49f   :  { %v3075_v48 = vadd.f32 %v2914_v38, %v2435_v32  ;;  %v3072_v27 = vadd.f32 %v2908_v55, %v2432_v57  ;;  %v3648_v57 = vld [vmem:[#allocation4 + $0x140] sm:$0xff] }
 0x4a0   :  { %v1805_v32 = vmul.f32 %v3648_v57, %v5912_v0  ;;  %v2442_v35 = vadd.f32 %v5913_v62, %v1802_v26  ;;  %v5930_v26 = vld [vmem:[#allocation129_spill] sm:$0xff] }
 0x4a1   :  { %3140 = vst.msk [vmem:[#allocation4 + $0xf0] sm:$0xff] %vm3109_vm4, %v3075_v48  ;;  %3137 = vst.msk [vmem:[#allocation4 + $0xd8] sm:$0xff] %vm3109_vm4, %v3072_v27  ;;  %v3649_v48 = vld [vmem:[#allocation4 + $0x138] sm:$0xff]  ;;  %v5915_v27 = vld [vmem:[#allocation51_spill] sm:$0xff] }
 0x4a2   :  { %v2918_v51 = vpop.permute.xlu0 %2917  ;;  %v2912_v56 = vpop.permute.xlu1 %2911  ;;  %v2445_v24 = vadd.f32 %v5914_v17, %v1805_v32  ;;  %v1804_v52 = vmul.f32 %v3649_v48, %v5915_v27  ;;  %v5932_v17 = vld [vmem:[#allocation64_spill] sm:$0xff]  ;;  %v5933_v48 = vld [vmem:[#allocation126_spill] sm:$0xff] }
 0x4a3   :  { %v3077_v30 = vadd.f32 %v2918_v51, %v2437_v22  ;;  %v3074_v28 = vadd.f32 %v2912_v56, %v2434_v58  ;;  %v3650_v58 = vld [vmem:[#allocation4 + $0x150] sm:$0xff] }
 0x4a4   :  { %v1807_v22 = vmul.f32 %v3650_v58, %v5916_v15  ;;  %v2444_v39 = vadd.f32 %v5917_v43, %v1804_v52  ;;  %v5934_v52 = vld [vmem:[#allocation131_spill] sm:$0xff] }
 0x4a5   :  { %3142 = vst.msk [vmem:[#allocation4 + $0x100] sm:$0xff] %vm3109_vm4, %v3077_v30  ;;  %3139 = vst.msk [vmem:[#allocation4 + $0xe8] sm:$0xff] %vm3109_vm4, %v3074_v28  ;;  %v3651_v30 = vld [vmem:[#allocation4 + $0x148] sm:$0xff]  ;;  %v5919_v28 = vld [vmem:[#allocation53_spill] sm:$0xff] }
 0x4a6   :  { %v2922_v46 = vpop.permute.xlu0 %2921  ;;  %v2916_v31 = vpop.permute.xlu1 %2915  ;;  %v2447_v13 = vadd.f32 %v5918_v49, %v1807_v22  ;;  %v1806_v47 = vmul.f32 %v3651_v30, %v5919_v28  ;;  %v5936_v49 = vld [vmem:[#allocation66_spill] sm:$0xff]  ;;  %v5937_v30 = vld [vmem:[#allocation128_spill] sm:$0xff] }
 0x4a7   :  { %v3079_v14 = vadd.f32 %v2922_v46, %v2439_v18  ;;  %v3076_v23 = vadd.f32 %v2916_v31, %v2436_v11  ;;  %v3652_v11 = vld [vmem:[#allocation4 + $0x160] sm:$0xff] }
 0x4a8   :  { %v1809_v18 = vmul.f32 %v3652_v11, %v5920_v53  ;;  %v2446_v8 = vadd.f32 %v5921_v45, %v1806_v47  ;;  %v5938_v47 = vld [vmem:[#allocation133_spill] sm:$0xff] }
 0x4a9   :  { %3144 = vst.msk [vmem:[#allocation4 + $0x110] sm:$0xff] %vm3109_vm4, %v3079_v14  ;;  %3141 = vst.msk [vmem:[#allocation4 + $0xf8] sm:$0xff] %vm3109_vm4, %v3076_v23  ;;  %v3653_v14 = vld [vmem:[#allocation4 + $0x158] sm:$0xff]  ;;  %v5923_v23 = vld [vmem:[#allocation55_spill] sm:$0xff] }
 0x4aa   :  { %v2926_v34 = vpop.permute.xlu0 %2925  ;;  %v2920_v1 = vpop.permute.xlu1 %2919  ;;  %v2449_v33 = vadd.f32 %v5922_v16, %v1809_v18  ;;  %v1808_v4 = vmul.f32 %v3653_v14, %v5923_v23  ;;  %v5940_v16 = vld [vmem:[#allocation68_spill] sm:$0xff]  ;;  %v5941_v14 = vld [vmem:[#allocation130_spill] sm:$0xff] }
 0x4ab   :  { %v3081_v25 = vadd.f32 %v2926_v34, %v2441_v36  ;;  %v3078_v61 = vadd.f32 %v2920_v1, %v2438_v3  ;;  %v3654_v3 = vld [vmem:[#allocation4 + $0x170] sm:$0xff] }
 0x4ac   :  { %v1811_v36 = vmul.f32 %v3654_v3, %v5924_v12  ;;  %v2448_v37 = vadd.f32 %v5925_v10, %v1808_v4  ;;  %v5942_v4 = vld [vmem:[#allocation135_spill] sm:$0xff] }
 0x4ad   :  { %3146 = vst.msk [vmem:[#allocation4 + $0x120] sm:$0xff] %vm3109_vm4, %v3081_v25  ;;  %3143 = vst.msk [vmem:[#allocation4 + $0x108] sm:$0xff] %vm3109_vm4, %v3078_v61  ;;  %v3655_v25 = vld [vmem:[#allocation4 + $0x168] sm:$0xff]  ;;  %v5927_v61 = vld [vmem:[#allocation57_spill] sm:$0xff] }
 0x4ae   :  { %v2930_v2 = vpop.permute.xlu0 %2929  ;;  %v2924_v40 = vpop.permute.xlu1 %2923  ;;  %v2451_v63 = vadd.f32 %v5926_v41, %v1811_v36  ;;  %v1810_v5 = vmul.f32 %v3655_v25, %v5927_v61  ;;  %v5944_v41 = vld [vmem:[#allocation70_spill] sm:$0xff]  ;;  %v5945_v25 = vld [vmem:[#allocation132_spill] sm:$0xff] }
 0x4af   :  { %v3083_v38 = vadd.f32 %v2930_v2, %v2443_v59  ;;  %v3080_v55 = vadd.f32 %v2924_v40, %v2440_v42  ;;  %v3656_v42 = vld [vmem:[#allocation4 + $0x180] sm:$0xff] }
 0x4b0   :  { %v1813_v59 = vmul.f32 %v3656_v42, %v5928_v44  ;;  %v2450_v50 = vadd.f32 %v5929_v19, %v1810_v5  ;;  %v5946_v5 = vld [vmem:[#allocation137_spill] sm:$0xff] }
 0x4b1   :  { %3148 = vst.msk [vmem:[#allocation4 + $0x130] sm:$0xff] %vm3109_vm4, %v3083_v38  ;;  %3145 = vst.msk [vmem:[#allocation4 + $0x118] sm:$0xff] %vm3109_vm4, %v3080_v55  ;;  %v3657_v38 = vld [vmem:[#allocation4 + $0x178] sm:$0xff]  ;;  %v5931_v55 = vld [vmem:[#allocation59_spill] sm:$0xff] }
 0x4b2   :  { %v2934_v54 = vpop.permute.xlu0 %2933  ;;  %v2928_v60 = vpop.permute.xlu1 %2927  ;;  %v2453_v57 = vadd.f32 %v5930_v26, %v1813_v59  ;;  %v1812_v62 = vmul.f32 %v3657_v38, %v5931_v55  ;;  %v5948_v26 = vld [vmem:[#allocation71_spill] sm:$0xff]  ;;  %v5949_v38 = vld [vmem:[#allocation134_spill] sm:$0xff] }
 0x4b3   :  { %v3085_v51 = vadd.f32 %v2934_v54, %v2445_v24  ;;  %v3082_v56 = vadd.f32 %v2928_v60, %v2442_v35  ;;  %v3658_v35 = vld [vmem:[#allocation4 + $0x190] sm:$0xff] }
 0x4b4   :  { %v1815_v24 = vmul.f32 %v3658_v35, %v5932_v17  ;;  %v2452_v27 = vadd.f32 %v5933_v48, %v1812_v62  ;;  %v5950_v62 = vld [vmem:[#allocation139_spill] sm:$0xff] }
 0x4b5   :  { %3150 = vst.msk [vmem:[#allocation4 + $0x140] sm:$0xff] %vm3109_vm4, %v3085_v51  ;;  %3147 = vst.msk [vmem:[#allocation4 + $0x128] sm:$0xff] %vm3109_vm4, %v3082_v56  ;;  %v3659_v51 = vld [vmem:[#allocation4 + $0x188] sm:$0xff]  ;;  %v5935_v56 = vld [vmem:[#allocation61_spill] sm:$0xff] }
 0x4b6   :  { %v2938_v9 = vpop.permute.xlu0 %2937  ;;  %v2932_v20 = vpop.permute.xlu1 %2931  ;;  %v2455_v58 = vadd.f32 %v5934_v52, %v1815_v24  ;;  %v1814_v43 = vmul.f32 %v3659_v51, %v5935_v56  ;;  %v5952_v52 = vld [vmem:[#allocation8_spill] sm:$0xff] }
 0x4b7   :  { %v3087_v46 = vadd.f32 %v2938_v9, %v2447_v13  ;;  %v3084_v31 = vadd.f32 %v2932_v20, %v2444_v39  ;;  %v3660_v39 = vld [vmem:[#allocation4 + $0x1a0] sm:$0xff]  ;;  %v5953_v51 = vld [vmem:[#allocation136_spill] sm:$0xff] }
 0x4b8   :  { %v1817_v13 = vmul.f32 %v3660_v39, %v5936_v49  ;;  %v2454_v28 = vadd.f32 %v5937_v30, %v1814_v43  ;;  %v5954_v43 = vld [vmem:[#allocation141_spill] sm:$0xff] }
 0x4b9   :  { %3152 = vst.msk [vmem:[#allocation4 + $0x150] sm:$0xff] %vm3109_vm4, %v3087_v46  ;;  %3149 = vst.msk [vmem:[#allocation4 + $0x138] sm:$0xff] %vm3109_vm4, %v3084_v31  ;;  %v3661_v46 = vld [vmem:[#allocation4 + $0x198] sm:$0xff]  ;;  %v5939_v31 = vld [vmem:[#allocation63_spill] sm:$0xff] }
 0x4ba   :  { %v2942_v29 = vpop.permute.xlu0 %2941  ;;  %v2936_v6 = vpop.permute.xlu1 %2935  ;;  %v2457_v11 = vadd.f32 %v5938_v47, %v1817_v13  ;;  %v1816_v45 = vmul.f32 %v3661_v46, %v5939_v31  ;;  %v5956_v47 = vld [vmem:[#allocation10_spill] sm:$0xff] }
 0x4bb   :  { %v3089_v34 = vadd.f32 %v2942_v29, %v2449_v33  ;;  %v3086_v1 = vadd.f32 %v2936_v6, %v2446_v8  ;;  %v3662_v8 = vld [vmem:[#allocation4 + $0x1b0] sm:$0xff]  ;;  %v5957_v46 = vld [vmem:[#allocation138_spill] sm:$0xff] }
 0x4bc   :  { %v1819_v33 = vmul.f32 %v3662_v8, %v5940_v16  ;;  %v2456_v23 = vadd.f32 %v5941_v14, %v1816_v45  ;;  %v5958_v45 = vld [vmem:[#allocation143_spill] sm:$0xff] }
 0x4bd   :  { %3154 = vst.msk [vmem:[#allocation4 + $0x160] sm:$0xff] %vm3109_vm4, %v3089_v34  ;;  %3151 = vst.msk [vmem:[#allocation4 + $0x148] sm:$0xff] %vm3109_vm4, %v3086_v1  ;;  %v3663_v34 = vld [vmem:[#allocation4 + $0x1a8] sm:$0xff]  ;;  %v5943_v1 = vld [vmem:[#allocation65_spill] sm:$0xff] }
 0x4be   :  { %v2946_v7 = vpop.permute.xlu0 %2945  ;;  %v2940_v21 = vpop.permute.xlu1 %2939  ;;  %v2459_v3 = vadd.f32 %v5942_v4, %v1819_v33  ;;  %v1818_v10 = vmul.f32 %v3663_v34, %v5943_v1  ;;  %v3672_v34 = vld [vmem:[#allocation4 + $0x1f8] sm:$0xff]  ;;  %v5961_v1 = vld [vmem:[#allocation11_spill] sm:$0xff] }
 0x4bf   :  { %v3091_v2 = vadd.f32 %v2946_v7, %v2451_v63  ;;  %v3088_v40 = vadd.f32 %v2940_v21, %v2448_v37  ;;  %v3664_v37 = vld [vmem:[#allocation4 + $0x1c0] sm:$0xff] }
 0x4c0   :  { %v1821_v63 = vmul.f32 %v3664_v37, %v5944_v41  ;;  %v2458_v61 = vadd.f32 %v5945_v25, %v1818_v10  ;;  %v1828_v10 = vmul.f32 %v3672_v34, %v5961_v1  ;;  %v5962_v41 = vld [vmem:[#allocation142_spill] sm:$0xff] }
 0x4c1   :  { %3156 = vst.msk [vmem:[#allocation4 + $0x170] sm:$0xff] %vm3109_vm4, %v3091_v2  ;;  %3153 = vst.msk [vmem:[#allocation4 + $0x158] sm:$0xff] %vm3109_vm4, %v3088_v40  ;;  %v3665_v2 = vld [vmem:[#allocation4 + $0x1b8] sm:$0xff]  ;;  %v5947_v40 = vld [vmem:[#allocation67_spill] sm:$0xff] }
 0x4c2   :  { %v2950_v0 = vpop.permute.xlu0 %2949  ;;  %v2944_v32 = vpop.permute.xlu1 %2943  ;;  %v2461_v42 = vadd.f32 %v5946_v5, %v1821_v63  ;;  %v1820_v19 = vmul.f32 %v3665_v2, %v5947_v40  ;;  %v2468_v63 = vadd.f32 %v5962_v41, %v1828_v10 }
 0x4c3   :  { %v3093_v54 = vadd.f32 %v2950_v0, %v2453_v57  ;;  %v3090_v60 = vadd.f32 %v2944_v32, %v2450_v50  ;;  %v3666_v50 = vld [vmem:[#allocation4 + $0x1d0] sm:$0xff] }
 0x4c4   :  { %v1823_v57 = vmul.f32 %v3666_v50, %v5948_v26  ;;  %v2460_v55 = vadd.f32 %v5949_v38, %v1820_v19 }
 0x4c5   :  { %3158 = vst.msk [vmem:[#allocation4 + $0x180] sm:$0xff] %vm3109_vm4, %v3093_v54  ;;  %3155 = vst.msk [vmem:[#allocation4 + $0x168] sm:$0xff] %vm3109_vm4, %v3090_v60  ;;  %v3667_v54 = vld [vmem:[#allocation4 + $0x1c8] sm:$0xff]  ;;  %v5951_v60 = vld [vmem:[#allocation69_spill] sm:$0xff] }
 0x4c6   :  { %v2954_v15 = vpop.permute.xlu0 %2953  ;;  %v2948_v22 = vpop.permute.xlu1 %2947  ;;  %v2463_v35 = vadd.f32 %v5950_v62, %v1823_v57  ;;  %v1822_v48 = vmul.f32 %v3667_v54, %v5951_v60 }
 0x4c7   :  { %v3095_v9 = vadd.f32 %v2954_v15, %v2455_v58  ;;  %v3092_v20 = vadd.f32 %v2948_v22, %v2452_v27  ;;  %v3668_v27 = vld [vmem:[#allocation4 + $0x1e0] sm:$0xff] }
 0x4c8   :  { %v1825_v58 = vmul.f32 %v3668_v27, %v5952_v52  ;;  %v2462_v56 = vadd.f32 %v5953_v51, %v1822_v48 }
 0x4c9   :  { %3160 = vst.msk [vmem:[#allocation4 + $0x190] sm:$0xff] %vm3109_vm4, %v3095_v9  ;;  %3157 = vst.msk [vmem:[#allocation4 + $0x178] sm:$0xff] %vm3109_vm4, %v3092_v20  ;;  %v3669_v9 = vld [vmem:[#allocation4 + $0x1d8] sm:$0xff]  ;;  %v5955_v20 = vld [vmem:[#allocation7_spill] sm:$0xff] }
 0x4ca   :  { %v2958_v53 = vpop.permute.xlu0 %2957  ;;  %v2952_v18 = vpop.permute.xlu1 %2951  ;;  %v2465_v39 = vadd.f32 %v5954_v43, %v1825_v58  ;;  %v1824_v30 = vmul.f32 %v3669_v9, %v5955_v20 }
 0x4cb   :  { %v3097_v29 = vadd.f32 %v2958_v53, %v2457_v11  ;;  %v3094_v6 = vadd.f32 %v2952_v18, %v2454_v28  ;;  %v3670_v28 = vld [vmem:[#allocation4 + $0x1f0] sm:$0xff] }
 0x4cc   :  { %v1827_v11 = vmul.f32 %v3670_v28, %v5956_v47  ;;  %v2464_v31 = vadd.f32 %v5957_v46, %v1824_v30 }
 0x4cd   :  { %3162 = vst.msk [vmem:[#allocation4 + $0x1a0] sm:$0xff] %vm3109_vm4, %v3097_v29  ;;  %3159 = vst.msk [vmem:[#allocation4 + $0x188] sm:$0xff] %vm3109_vm4, %v3094_v6  ;;  %v3671_v29 = vld [vmem:[#allocation4 + $0x1e8] sm:$0xff]  ;;  %v5959_v6 = vld [vmem:[#allocation9_spill] sm:$0xff] }
 0x4ce   :  { %v2962_v12 = vpop.permute.xlu0 %2961  ;;  %v2956_v36 = vpop.permute.xlu1 %2955  ;;  %v2467_v8 = vadd.f32 %v5958_v45, %v1827_v11  ;;  %v1826_v14 = vmul.f32 %v3671_v29, %v5959_v6 }
 0x4cf   :  { %v3099_v7 = vadd.f32 %v2962_v12, %v2459_v3  ;;  %v3096_v21 = vadd.f32 %v2956_v36, %v2456_v23  ;;  %v5960_v3 = vld [vmem:[#allocation140_spill] sm:$0xff] }
 0x4d0   :  { %v2466_v12 = vadd.f32 %v5960_v3, %v1826_v14 }
 0x4d1   :  { %3164 = vst.msk [vmem:[#allocation4 + $0x1b0] sm:$0xff] %vm3109_vm4, %v3099_v7  ;;  %3161 = vst.msk [vmem:[#allocation4 + $0x198] sm:$0xff] %vm3109_vm4, %v3096_v21 }
 0x4d2   :  { %v2966_v44 = vpop.permute.xlu0 %2965  ;;  %v2960_v59 = vpop.permute.xlu1 %2959 }
 0x4d3   :  { %v3101_v0 = vadd.f32 %v2966_v44, %v2461_v42  ;;  %v3098_v32 = vadd.f32 %v2960_v59, %v2458_v61 }
 0x4d5   :  { %3166 = vst.msk [vmem:[#allocation4 + $0x1c0] sm:$0xff] %vm3109_vm4, %v3101_v0  ;;  %3163 = vst.msk [vmem:[#allocation4 + $0x1a8] sm:$0xff] %vm3109_vm4, %v3098_v32 }
 0x4d6   :  { %v2970_v17 = vpop.permute.xlu0 %2969  ;;  %v2964_v24 = vpop.permute.xlu1 %2963 }
 0x4d7   :  { %v3103_v15 = vadd.f32 %v2970_v17, %v2463_v35  ;;  %v3100_v22 = vadd.f32 %v2964_v24, %v2460_v55 }
 0x4d9   :  { %3168 = vst.msk [vmem:[#allocation4 + $0x1d0] sm:$0xff] %vm3109_vm4, %v3103_v15  ;;  %3165 = vst.msk [vmem:[#allocation4 + $0x1b8] sm:$0xff] %vm3109_vm4, %v3100_v22 }
 0x4da   :  { %v2974_v49 = vpop.permute.xlu0 %2973  ;;  %v2968_v13 = vpop.permute.xlu1 %2967 }
 0x4db   :  { %v3105_v53 = vadd.f32 %v2974_v49, %v2465_v39  ;;  %v3102_v18 = vadd.f32 %v2968_v13, %v2462_v56 }
 0x4dd   :  { %3170 = vst.msk [vmem:[#allocation4 + $0x1e0] sm:$0xff] %vm3109_vm4, %v3105_v53  ;;  %3167 = vst.msk [vmem:[#allocation4 + $0x1c8] sm:$0xff] %vm3109_vm4, %v3102_v18 }
 0x4de   :  { %v2978_v16 = vpop.permute.xlu0 %2977  ;;  %v2972_v33 = vpop.permute.xlu1 %2971 }
 0x4df   :  { %v3107_v23 = vadd.f32 %v2978_v16, %v2467_v8  ;;  %v3104_v4 = vadd.f32 %v2972_v33, %v2464_v31 }
 0x4e1   :  { %3172 = vst.msk [vmem:[#allocation4 + $0x1f0] sm:$0xff] %vm3109_vm4, %v3107_v23  ;;  %3169 = vst.msk [vmem:[#allocation4 + $0x1d8] sm:$0xff] %vm3109_vm4, %v3104_v4 }
 0x4e2   :  { %v2976_v36 = vpop.permute.xlu1 %2975 }
 0x4e3   :  { %v3106_v37 = vadd.f32 %v2976_v36, %v2466_v12 }
 0x4e5   :  { %3171 = vst.msk [vmem:[#allocation4 + $0x1e8] sm:$0xff] %vm3109_vm4, %v3106_v37 }
 0x4e6   :  { %v2980_v7 = vpop.permute.xlu1 %2979 }
 0x4e7   :  { %v3108_v21 = vadd.f32 %v2980_v7, %v2468_v63 }
 0x4e9   :  { %3173 = vst.msk [vmem:[#allocation4 + $0x1f8] sm:$0xff] %vm3109_vm4, %v3108_v21 }
 0x4ea   :  { %3684 = shalt.err (!%p3681_p6)
}
 0x4eb   :  { %s3685_s10 = scalar_lea.hbm %s5659_s3, 8192 }
 0x4ec   :  { %p3686_p7 = scmp.ne.s32.totalorder %s5659_s3, %s3685_s10  ;;  %p3689_p8 = scmp.lt.u32.totalorder %s3685_s10, %s5659_s3 }
 0x4ee   :  { %p3691_p9 = pnand %p3689_p8, %p3686_p7 }
 0x4f0   :  { %3694 = shalt.err (!%p3691_p9)
}
 0x4f1   :  { %s3706_s15 = smov 128   ;;  %s3707_s16 = smov 8  }
 0x4f2   :  { %3185 = dma.vmem_to_hbm [thread:$0]  %s3180_s6, 8192, %s5659_s3, [#allocation5], %s3706_s15, %s3706_s15, %s3707_s16  }
 0x4f3   :  { %3695 = dma.done.wait [#allocation5], 8192  }
 0x4f4   :  { %3696 = vsyncadd [#allocation5], 4294959104 }
 0x4f5   :  { %3189 = vsyncpa [#allocation5], 1 }

</bundles_post_ra>
